<compile_context>
chip_gen: v5e
topology: v5e:2x2
jax: 0.10.0
libtpu: 0.0.40
codegen_flags: <defaults>
</compile_context>

<pallas_src>
import functools

import jax
import jax.numpy as jnp
from jax.experimental import pallas as pl
from jax.experimental.pallas import tpu as pltpu

INPUT_SIZE = 1
H1 = 500            # PyTorch hidden width
H1_PAD = 512        # lane-aligned padded hidden width used inside the kernel
OUTPUT_SIZE = 1

LANE = 128          # TPU lane width; lane-dense batch tiles are multiples of it
MAX_BLOCK_B = 2048  # batch-tile cap: amortizes step overhead, VMEM-safe on v5e/v6e/v7x


def _mlp_kernel(x_ref, w1_ref, b1_ref, w2_ref, b2_ref, w3_ref, b3_ref, o_ref):
    """Feature-major (transposed) MLP tile.

    x_ref : (1, block_b)       f32   lane-dense input row
    w1_ref: (H1_PAD, 1)        f32   fc1 weight column
    b1_ref: (H1_PAD, 1)        f32
    w2_ref: (H1_PAD, H1_PAD)   f32 or bf16 (stored as W2^T so h2 = w2_ref @ h1)
    b2_ref: (H1_PAD, 1)        f32
    w3_ref: (H1_PAD, 1)        f32   fc3 weight column
    b3_ref: (1, 1)             f32   scalar, lives in SMEM
    o_ref : (1, block_b)       f32   lane-dense output row
    """
    x = x_ref[...]                                             # (1, Bb)

    # fc1 + ReLU: contraction dim K == 1 -> VPU outer-product broadcast,
    # never touches the MXU.
    h = jnp.maximum(w1_ref[...] * x + b1_ref[...], 0.0)        # (512, Bb) f32

    # fc2 + ReLU: the only real matmul -> MXU with f32 accumulation. If w2 was
    # prepared in bf16, cast only the dot operand (VPU/XLU math stays f32).
    if w2_ref.dtype == jnp.bfloat16:
        h = h.astype(jnp.bfloat16)
    h = jnp.dot(w2_ref[...], h, preferred_element_type=jnp.float32)
    h = jnp.maximum(h + b2_ref[...], 0.0)                      # (512, Bb) f32

    # fc3: output dim N == 1 -> elementwise multiply + sublane reduction
    # (VPU/XLU) instead of an N=1 MXU matmul; bias added as an SMEM scalar.
    o = jnp.sum(h * w3_ref[...], axis=0, keepdims=True) + b3_ref[0, 0]
    o_ref[...] = o.astype(o_ref.dtype)                         # (1, Bb)


def prepare_params(params, *, use_bf16_matmul=False):
    """One-time preprocessing: pad 500->512, re-orient feature-major, opt. bf16 w2."""
    w1, b1, w2, b2, w3, b3 = params
    pad = H1_PAD - H1
    w1c = jnp.pad(w1.T.astype(jnp.float32), ((0, pad), (0, 0)))            # (512, 1)
    b1c = jnp.pad(b1.reshape(H1, 1).astype(jnp.float32), ((0, pad), (0, 0)))
    w2t = jnp.pad(w2.T.astype(jnp.float32), ((0, pad), (0, pad)))          # (512, 512)
    if use_bf16_matmul:
        w2t = w2t.astype(jnp.bfloat16)
    b2c = jnp.pad(b2.reshape(H1, 1).astype(jnp.float32), ((0, pad), (0, 0)))
    w3c = jnp.pad(w3.reshape(H1, 1).astype(jnp.float32), ((0, pad), (0, 0)))  # (512, 1)
    b3s = b3.reshape(1, 1).astype(jnp.float32)                             # SMEM scalar
    return (w1c, b1c, w2t, b2c, w3c, b3s)


def _choose_block_b(B):
    """Lane-dense batch tile: multiple of 128, >=2 grid steps when possible, <=2048."""
    if B <= LANE:
        return LANE
    half = pl.cdiv(B, 2)                      # aim for >= 2 grid steps (v7x: 2 TCs)
    return min(MAX_BLOCK_B, LANE * pl.cdiv(half, LANE))


@functools.partial(jax.jit, static_argnames=("block_b",))
def fcn_test_forward(x, prepared, *, block_b=None):
    """x: (B, INPUT_SIZE) f32 -> (B, OUTPUT_SIZE) f32. `prepared` from prepare_params()."""
    w1c, b1c, w2t, b2c, w3c, b3s = prepared
    B = x.shape[0]

    if block_b is None:
        block_b = _choose_block_b(B)
    assert block_b % LANE == 0, "batch tile must be a multiple of the 128-lane width"

    n_steps = pl.cdiv(B, block_b)
    B_pad = n_steps * block_b

    # Lane-dense (1, B) input row; zero-pad awkward batch sizes (the padded
    # columns produce valid-but-discarded outputs).
    x_row = x.reshape(1, B).astype(jnp.float32)
    if B_pad != B:
        x_row = jnp.pad(x_row, ((0, 0), (0, B_pad - B)))

    full = lambda a: pl.BlockSpec(a.shape, lambda i: (0,) * a.ndim)

    out_row = pl.pallas_call(
        _mlp_kernel,
        out_shape=jax.ShapeDtypeStruct((1, B_pad), jnp.float32),
        grid_spec=pltpu.PrefetchScalarGridSpec(
            num_scalar_prefetch=0,
            grid=(n_steps,),
            in_specs=[
                pl.BlockSpec((1, block_b), lambda i: (0, i)),       # x row tile
                full(w1c), full(b1c), full(w2t), full(b2c), full(w3c),
                pl.BlockSpec(memory_space=pltpu.MemorySpace.SMEM),  # b3 scalar
            ],
            out_specs=pl.BlockSpec((1, block_b), lambda i: (0, i)),
        ),
        compiler_params=pltpu.CompilerParams(
            # Independent batch tiles -> shard grid steps across TensorCores.
            dimension_semantics=("parallel",),
            # block_b <= 2048 keeps live VMEM well under the 32 MiB scoped
            # default on v5e/v6e/v7x, so no vmem_limit_bytes override.
        ),
        cost_estimate=pl.CostEstimate(
            flops=2 * B_pad * H1_PAD * H1_PAD + 6 * B_pad * H1_PAD,
            transcendentals=0,
            bytes_accessed=(8 * B_pad
                            + w2t.size * w2t.dtype.itemsize
                            + 4 * (w1c.size + b1c.size + b2c.size + w3c.size + 1)),
        ),
    )(x_row, w1c, b1c, w2t, b2c, w3c, b3s)

    # flatten(1) on a (B, 1) tensor is a no-op; just restore (B, 1).
    return out_row[:, :B].reshape(B, OUTPUT_SIZE)


def init_params(key):
    """Deterministic init matching PyTorch Linear default: U(-1/sqrt(fan_in), +)."""
    def linear(k, fan_in, fan_out):
        kw, kb = jax.random.split(k)
        bound = 1.0 / jnp.sqrt(fan_in)
        w = jax.random.uniform(kw, (fan_in, fan_out), jnp.float32, -bound, bound)
        b = jax.random.uniform(kb, (1, fan_out), jnp.float32, -bound, bound)
        return w, b

    k1, k2, k3 = jax.random.split(key, 3)
    w1, b1 = linear(k1, INPUT_SIZE, H1)
    w2, b2 = linear(k2, H1, H1)
    w3, b3 = linear(k3, H1, OUTPUT_SIZE)
    return (w1, b1, w2, b2, w3, b3)


def reference_forward(x, params):
    w1, b1, w2, b2, w3, b3 = params
    h = jnp.maximum(x @ w1 + b1, 0.0)
    h = jnp.maximum(h @ w2 + b2, 0.0)
    return h @ w3 + b3


if __name__ == "__main__":
    key = jax.random.PRNGKey(0)
    kx, kp = jax.random.split(key)

    params = init_params(kp)

    # One-time preprocessing (padding / re-orientation / optional bf16 w2).
    prepared = prepare_params(params)
    prepared_bf16 = prepare_params(params, use_bf16_matmul=True)

    # Small batch of scalar inputs, like x = rand(N, D=1) in the driver script.
    B = 8
    x = jax.random.uniform(kx, (B, INPUT_SIZE), jnp.float32, -1.0, 1.0)
    ref = reference_forward(x, params)

    out = jax.block_until_ready(fcn_test_forward(x, prepared))
    assert out.shape == (B, OUTPUT_SIZE)
    assert jnp.allclose(out, ref, atol=1e-4, rtol=1e-4)

    # bf16 MXU path (deliberately looser tolerance vs the f32 reference).
    out_bf16 = jax.block_until_ready(fcn_test_forward(x, prepared_bf16))
    assert out_bf16.shape == (B, OUTPUT_SIZE)
    assert jnp.allclose(out_bf16, ref, atol=5e-2, rtol=5e-2)

    # Multi-step grid + batch-padding path (B not a multiple of 128).
    B2 = 300
    x2 = jax.random.uniform(jax.random.PRNGKey(1), (B2, INPUT_SIZE),
                            jnp.float32, -1.0, 1.0)
    out2 = jax.block_until_ready(fcn_test_forward(x2, prepared))
    ref2 = reference_forward(x2, params)
    assert out2.shape == (B2, OUTPUT_SIZE)
    assert jnp.allclose(out2, ref2, atol=1e-4, rtol=1e-4)

    # TODO(synk): nn.Dropout(0.2) is defined in the module but never used in
    # forward(), so it is intentionally omitted (inference no-op).
    print("KERNEL_OK")
</pallas_src>

<mosaic_0001>
module attributes {stable_mosaic.version = 11 : i64} {
  func.func @_mlp_kernel(%arg0: i32, %arg1: memref<1x128xf32, #tpu.memory_space<vmem>>, %arg2: memref<512x1xf32, #tpu.memory_space<vmem>>, %arg3: memref<512x1xf32, #tpu.memory_space<vmem>>, %arg4: memref<512x512xf32, #tpu.memory_space<vmem>>, %arg5: memref<512x1xf32, #tpu.memory_space<vmem>>, %arg6: memref<512x1xf32, #tpu.memory_space<vmem>>, %arg7: memref<1x1xf32, #tpu.memory_space<smem>>, %arg8: memref<1x128xf32, #tpu.memory_space<vmem>>) attributes {dimension_semantics = [#tpu.dimension_semantics<parallel>], iteration_bounds = array<i64: 1>, scalar_prefetch = 0 : i64, scratch_operands = 0 : i64, tpu.core_type = #tpu.core_type<tc>, window_params = [{transform_indices = @transform_0, window_bounds = array<i64: 1, 128>}, {pipeline_mode = #tpu.pipeline_mode<synchronous>, transform_indices = @transform_1, window_bounds = array<i64: 512, 1>}, {pipeline_mode = #tpu.pipeline_mode<synchronous>, transform_indices = @transform_2, window_bounds = array<i64: 512, 1>}, {pipeline_mode = #tpu.pipeline_mode<synchronous>, transform_indices = @transform_3, window_bounds = array<i64: 512, 512>}, {pipeline_mode = #tpu.pipeline_mode<synchronous>, transform_indices = @transform_4, window_bounds = array<i64: 512, 1>}, {pipeline_mode = #tpu.pipeline_mode<synchronous>, transform_indices = @transform_5, window_bounds = array<i64: 512, 1>}, {transform_indices = @transform_6, window_bounds = array<i64: 1, 1>}, {transform_indices = @transform_7, window_bounds = array<i64: 1, 128>}]} {
    %c0 = arith.constant 0 : index
    %c0_0 = arith.constant 0 : index
    %0 = vector.load %arg1[%c0, %c0_0] : memref<1x128xf32, #tpu.memory_space<vmem>>, vector<1x128xf32>
    %c0_1 = arith.constant 0 : index
    %c0_2 = arith.constant 0 : index
    %1 = vector.load %arg2[%c0_1, %c0_2] : memref<512x1xf32, #tpu.memory_space<vmem>>, vector<512x1xf32>
    %2 = vector.broadcast %1 : vector<512x1xf32> to vector<512x128xf32>
    %3 = vector.broadcast %0 : vector<1x128xf32> to vector<512x128xf32>
    %4 = arith.mulf %2, %3 : vector<512x128xf32>
    %c0_3 = arith.constant 0 : index
    %c0_4 = arith.constant 0 : index
    %5 = vector.load %arg3[%c0_3, %c0_4] : memref<512x1xf32, #tpu.memory_space<vmem>>, vector<512x1xf32>
    %6 = vector.broadcast %5 : vector<512x1xf32> to vector<512x128xf32>
    %7 = arith.addf %4, %6 : vector<512x128xf32>
    %cst = arith.constant 0.000000e+00 : f32
    %8 = vector.broadcast %cst : f32 to vector<512x128xf32>
    %9 = arith.maximumf %7, %8 : vector<512x128xf32>
    %c0_5 = arith.constant 0 : index
    %c0_6 = arith.constant 0 : index
    %10 = vector.load %arg4[%c0_5, %c0_6] : memref<512x512xf32, #tpu.memory_space<vmem>>, vector<512x512xf32>
    %cst_7 = arith.constant dense<0.000000e+00> : vector<512x128xf32>
    %11 = tpu.matmul %10, %9, %cst_7 {dimension_numbers = #tpu.dot_dimension_numbers<[1], [0], [0], [1], [0, 0, 1, 1], [], []>} : vector<512x512xf32>, vector<512x128xf32>, vector<512x128xf32> -> vector<512x128xf32>
    %c0_8 = arith.constant 0 : index
    %c0_9 = arith.constant 0 : index
    %12 = vector.load %arg5[%c0_8, %c0_9] : memref<512x1xf32, #tpu.memory_space<vmem>>, vector<512x1xf32>
    %13 = vector.broadcast %12 : vector<512x1xf32> to vector<512x128xf32>
    %14 = arith.addf %11, %13 : vector<512x128xf32>
    %cst_10 = arith.constant 0.000000e+00 : f32
    %15 = vector.broadcast %cst_10 : f32 to vector<512x128xf32>
    %16 = arith.maximumf %14, %15 : vector<512x128xf32>
    %c0_11 = arith.constant 0 : index
    %c0_12 = arith.constant 0 : index
    %17 = vector.load %arg6[%c0_11, %c0_12] : memref<512x1xf32, #tpu.memory_space<vmem>>, vector<512x1xf32>
    %18 = vector.broadcast %17 : vector<512x1xf32> to vector<512x128xf32>
    %19 = arith.mulf %16, %18 : vector<512x128xf32>
    %cst_13 = arith.constant dense<0.000000e+00> : vector<128xf32>
    %20 = vector.multi_reduction <add>, %19, %cst_13 [0] : vector<512x128xf32> to vector<128xf32>
    %21 = vector.shape_cast %20 : vector<128xf32> to vector<1x128xf32>
    %c0_14 = arith.constant 0 : index
    %c0_15 = arith.constant 0 : index
    %22 = memref.load %arg7[%c0_14, %c0_15] : memref<1x1xf32, #tpu.memory_space<smem>>
    %23 = vector.broadcast %22 : f32 to vector<1x128xf32>
    %24 = arith.addf %21, %23 : vector<1x128xf32>
    %c0_16 = arith.constant 0 : index
    %c0_17 = arith.constant 0 : index
    %25 = vector.load %arg8[%c0_16, %c0_17] : memref<1x128xf32, #tpu.memory_space<vmem>>, vector<1x128xf32>
    tpu.vector_store %arg8[%c0_16, %c0_17], %24 {strides = array<i32>} : memref<1x128xf32, #tpu.memory_space<vmem>>, vector<1x128xf32>,
    return
  }
  func.func @transform_0(%arg0: i32) -> (i32, i32) {
    %c0_i32 = arith.constant 0 : i32
    %c0_i32_0 = arith.constant 0 : i32
    return %c0_i32, %arg0 : i32, i32
  }
  func.func @transform_1(%arg0: i32) -> (i32, i32) {
    %c0_i32 = arith.constant 0 : i32
    %c0_i32_0 = arith.constant 0 : i32
    %c0_i32_1 = arith.constant 0 : i32
    return %c0_i32, %c0_i32_0 : i32, i32
  }
  func.func @transform_2(%arg0: i32) -> (i32, i32) {
    %c0_i32 = arith.constant 0 : i32
    %c0_i32_0 = arith.constant 0 : i32
    %c0_i32_1 = arith.constant 0 : i32
    return %c0_i32, %c0_i32_0 : i32, i32
  }
  func.func @transform_3(%arg0: i32) -> (i32, i32) {
    %c0_i32 = arith.constant 0 : i32
    %c0_i32_0 = arith.constant 0 : i32
    %c0_i32_1 = arith.constant 0 : i32
    return %c0_i32, %c0_i32_0 : i32, i32
  }
  func.func @transform_4(%arg0: i32) -> (i32, i32) {
    %c0_i32 = arith.constant 0 : i32
    %c0_i32_0 = arith.constant 0 : i32
    %c0_i32_1 = arith.constant 0 : i32
    return %c0_i32, %c0_i32_0 : i32, i32
  }
  func.func @transform_5(%arg0: i32) -> (i32, i32) {
    %c0_i32 = arith.constant 0 : i32
    %c0_i32_0 = arith.constant 0 : i32
    %c0_i32_1 = arith.constant 0 : i32
    return %c0_i32, %c0_i32_0 : i32, i32
  }
  func.func @transform_6(%arg0: i32) -> (i32, i32) {
    %c0_i32 = arith.constant 0 : i32
    %c0_i32_0 = arith.constant 0 : i32
    %c0_i32_1 = arith.constant 0 : i32
    return %c0_i32, %c0_i32_0 : i32, i32
  }
  func.func @transform_7(%arg0: i32) -> (i32, i32) {
    %c0_i32 = arith.constant 0 : i32
    %c0_i32_0 = arith.constant 0 : i32
    return %c0_i32, %arg0 : i32, i32
  }
}

</mosaic_0001>

<bundles_post_ra>
// kernel: fcn_test_forward.1
= control target key start
LH: loop header
LB: loop body
LE: loop exit
PB: predicated region body
PF: predicated region fallthrough
CT: control target
= control target key end

     0   :  { %v3061_v0 = vmov 0   ;;  %s5652_s1 = inlined_call_operand.vmem [shape: f32[512,1], index: 1, kind: input, shape index: {}]   ;;  %s5653_s0 = inlined_call_operand.vmem [shape: f32[1,128], index: 0, kind: input, shape index: {}]   ;;  %s5654_s2 = inlined_call_operand.vmem [shape: f32[512,1], index: 2, kind: input, shape index: {}]   ;;  %s5655_s4 = inlined_call_operand.vmem [shape: f32[512,1], index: 4, kind: input, shape index: {}]   ;;  %s5656_s3 = inlined_call_operand.vmem [shape: f32[512,512], index: 3, kind: input, shape index: {}]   ;;  %s5657_s5 = inlined_call_operand.vmem [shape: f32[512,1], index: 5, kind: input, shape index: {}]   ;;  %s5658_s6 = inlined_call_operand.<no memory space> [shape: f32[1,1], index: 6, kind: input, shape index: {}]   ;;  %s5659_s7 = inlined_call_operand.vmem [shape: f32[1,128], index: 7, kind: output, shape index: {}]  }
   0x1   :  { %3059 = vset.pattern.permute.xlu2 %v3061_v0  ;;  %3058 = vset.pattern.permute.xlu1 %v3061_v0  ;;  %v32_v1 = vld [vmem:[%s5652_s1 + $0x20] sm:$0xff]  ;;  %v30_v2 = vld [vmem:[%s5652_s1 + $0x10] sm:$0xff]  ;;  %v33_v4 = vld [vmem:[%s5652_s1 + $0x28] sm:$0xff] }
   0x2   :  { %v28_v3 = vld [vmem:[%s5652_s1] sm:$0xff]  ;;  %3057 = vset.pattern.permute.xlu0 %v3061_v0  ;;  %114 = vperm.xlu2 %3059, %v32_v1   ;;  %v31_v5 = vld [vmem:[%s5652_s1 + $0x18] sm:$0xff]  ;;  %v29_v6 = vld [vmem:[%s5652_s1 + $0x8] sm:$0xff] }
   0x3   :  { %104 = vperm.xlu1 %3058, %v30_v2   ;;  %94 = vperm.xlu0 %3057, %v28_v3   ;;  %v36_v7 = vld [vmem:[%s5652_s1 + $0x40] sm:$0xff]  ;;  %v35_v8 = vld [vmem:[%s5652_s1 + $0x38] sm:$0xff]  ;;  %v34_v9 = vld [vmem:[%s5652_s1 + $0x30] sm:$0xff] }
   0x4   :  { %v39_v10 = vld [vmem:[%s5652_s1 + $0x58] sm:$0xff]  ;;  %v38_v11 = vld [vmem:[%s5652_s1 + $0x50] sm:$0xff]  ;;  %v37_v12 = vld [vmem:[%s5652_s1 + $0x48] sm:$0xff] }
   0x5   :  { %v42_v13 = vld [vmem:[%s5652_s1 + $0x70] sm:$0xff]  ;;  %v41_v14 = vld [vmem:[%s5652_s1 + $0x68] sm:$0xff]  ;;  %v40_v15 = vld [vmem:[%s5652_s1 + $0x60] sm:$0xff] }
   0x6   :  { %v45_v16 = vld [vmem:[%s5652_s1 + $0x88] sm:$0xff]  ;;  %v44_v17 = vld [vmem:[%s5652_s1 + $0x80] sm:$0xff]  ;;  %v43_v18 = vld [vmem:[%s5652_s1 + $0x78] sm:$0xff] }
   0x7   :  { %v48_v19 = vld [vmem:[%s5652_s1 + $0xa0] sm:$0xff]  ;;  %v47_v20 = vld [vmem:[%s5652_s1 + $0x98] sm:$0xff]  ;;  %v46_v21 = vld [vmem:[%s5652_s1 + $0x90] sm:$0xff] }
   0x8   :  { %v51_v22 = vld [vmem:[%s5652_s1 + $0xb8] sm:$0xff]  ;;  %v50_v23 = vld [vmem:[%s5652_s1 + $0xb0] sm:$0xff]  ;;  %v49_v24 = vld [vmem:[%s5652_s1 + $0xa8] sm:$0xff] }
   0x9   :  { %v54_v25 = vld [vmem:[%s5652_s1 + $0xd0] sm:$0xff]  ;;  %v53_v26 = vld [vmem:[%s5652_s1 + $0xc8] sm:$0xff]  ;;  %v52_v27 = vld [vmem:[%s5652_s1 + $0xc0] sm:$0xff] }
   0xa   :  { %119 = vperm.xlu2 %3059, %v33_v4   ;;  %v57_v28 = vld [vmem:[%s5652_s1 + $0xe8] sm:$0xff]  ;;  %v56_v29 = vld [vmem:[%s5652_s1 + $0xe0] sm:$0xff]  ;;  %v55_v30 = vld [vmem:[%s5652_s1 + $0xd8] sm:$0xff] }
   0xb   :  { %109 = vperm.xlu1 %3058, %v31_v5   ;;  %99 = vperm.xlu0 %3057, %v29_v6   ;;  %v60_v31 = vld [vmem:[%s5652_s1 + $0x100] sm:$0xff]  ;;  %v59_v32 = vld [vmem:[%s5652_s1 + $0xf8] sm:$0xff]  ;;  %v58_v33 = vld [vmem:[%s5652_s1 + $0xf0] sm:$0xff] }
   0xc   :  { %v63_v34 = vld [vmem:[%s5652_s1 + $0x118] sm:$0xff]  ;;  %v62_v35 = vld [vmem:[%s5652_s1 + $0x110] sm:$0xff]  ;;  %v61_v36 = vld [vmem:[%s5652_s1 + $0x108] sm:$0xff] }
   0xd   :  { %v66_v38 = vld [vmem:[%s5652_s1 + $0x130] sm:$0xff]  ;;  %v65_v39 = vld [vmem:[%s5652_s1 + $0x128] sm:$0xff]  ;;  %v64_v40 = vld [vmem:[%s5652_s1 + $0x120] sm:$0xff] }
   0xe   :  { %v69_v42 = vld [vmem:[%s5652_s1 + $0x148] sm:$0xff]  ;;  %v68_v43 = vld [vmem:[%s5652_s1 + $0x140] sm:$0xff]  ;;  %v67_v44 = vld [vmem:[%s5652_s1 + $0x138] sm:$0xff] }
   0xf   :  { %v72_v46 = vld [vmem:[%s5652_s1 + $0x160] sm:$0xff]  ;;  %v71_v47 = vld [vmem:[%s5652_s1 + $0x158] sm:$0xff]  ;;  %v70_v48 = vld [vmem:[%s5652_s1 + $0x150] sm:$0xff] }
  0x10   :  { %v75_v52 = vld [vmem:[%s5652_s1 + $0x178] sm:$0xff]  ;;  %v74_v53 = vld [vmem:[%s5652_s1 + $0x170] sm:$0xff]  ;;  %v73_v54 = vld [vmem:[%s5652_s1 + $0x168] sm:$0xff] }
  0x11   :  { %v78_v58 = vld [vmem:[%s5652_s1 + $0x190] sm:$0xff]  ;;  %v77_v59 = vld [vmem:[%s5652_s1 + $0x188] sm:$0xff]  ;;  %v76_v60 = vld [vmem:[%s5652_s1 + $0x180] sm:$0xff] }
  0x12   :  { %134 = vperm.xlu2 %3059, %v36_v7   ;;  %v81_v0 = vld [vmem:[%s5652_s1 + $0x1a8] sm:$0xff]  ;;  %v80_v1 = vld [vmem:[%s5652_s1 + $0x1a0] sm:$0xff]  ;;  %v79_v2 = vld [vmem:[%s5652_s1 + $0x198] sm:$0xff] }
  0x13   :  { %129 = vperm.xlu1 %3058, %v35_v8   ;;  %124 = vperm.xlu0 %3057, %v34_v9   ;;  %v84_v6 = vld [vmem:[%s5652_s1 + $0x1c0] sm:$0xff]  ;;  %v83_v7 = vld [vmem:[%s5652_s1 + $0x1b8] sm:$0xff]  ;;  %v82_v8 = vld [vmem:[%s5652_s1 + $0x1b0] sm:$0xff] }
  0x1a   :  { %149 = vperm.xlu2 %3059, %v39_v10  }
  0x1b   :  { %144 = vperm.xlu1 %3058, %v38_v11   ;;  %139 = vperm.xlu0 %3057, %v37_v12   ;;  %v87_v12 = vld [vmem:[%s5652_s1 + $0x1d8] sm:$0xff] }
  0x22   :  { %164 = vperm.xlu2 %3059, %v42_v13   ;;  %v86_v13 = vld [vmem:[%s5652_s1 + $0x1d0] sm:$0xff] }
  0x23   :  { %159 = vperm.xlu1 %3058, %v41_v14   ;;  %154 = vperm.xlu0 %3057, %v40_v15   ;;  %v85_v14 = vld [vmem:[%s5652_s1 + $0x1c8] sm:$0xff] }
  0x2a   :  { %179 = vperm.xlu2 %3059, %v45_v16  }
  0x2b   :  { %174 = vperm.xlu1 %3058, %v44_v17   ;;  %169 = vperm.xlu0 %3057, %v43_v18   ;;  %v90_v18 = vld [vmem:[%s5652_s1 + $0x1f0] sm:$0xff] }
  0x32   :  { %194 = vperm.xlu2 %3059, %v48_v19   ;;  %v89_v19 = vld [vmem:[%s5652_s1 + $0x1e8] sm:$0xff] }
  0x33   :  { %189 = vperm.xlu1 %3058, %v47_v20   ;;  %184 = vperm.xlu0 %3057, %v46_v21   ;;  %v88_v20 = vld [vmem:[%s5652_s1 + $0x1e0] sm:$0xff] }
  0x3a   :  { %209 = vperm.xlu2 %3059, %v51_v22  }
  0x3b   :  { %204 = vperm.xlu1 %3058, %v50_v23   ;;  %199 = vperm.xlu0 %3057, %v49_v24   ;;  %v480_v24 = vld [vmem:[%s5654_s2 + $0x8] sm:$0xff] }
  0x42   :  { %224 = vperm.xlu2 %3059, %v54_v25   ;;  %v479_v25 = vld [vmem:[%s5654_s2] sm:$0xff] }
  0x43   :  { %219 = vperm.xlu1 %3058, %v53_v26   ;;  %214 = vperm.xlu0 %3057, %v52_v27   ;;  %v91_v26 = vld [vmem:[%s5652_s1 + $0x1f8] sm:$0xff] }
  0x4a   :  { %239 = vperm.xlu2 %3059, %v57_v28  }
  0x4b   :  { %234 = vperm.xlu1 %3058, %v56_v29   ;;  %229 = vperm.xlu0 %3057, %v55_v30   ;;  %v483_v30 = vld [vmem:[%s5654_s2 + $0x20] sm:$0xff] }
  0x52   :  { %254 = vperm.xlu2 %3059, %v60_v31   ;;  %v482_v31 = vld [vmem:[%s5654_s2 + $0x18] sm:$0xff] }
  0x53   :  { %249 = vperm.xlu1 %3058, %v59_v32   ;;  %244 = vperm.xlu0 %3057, %v58_v33   ;;  %v481_v32 = vld [vmem:[%s5654_s2 + $0x10] sm:$0xff] }
  0x5a   :  { %269 = vperm.xlu2 %3059, %v63_v34  }
  0x5b   :  { %264 = vperm.xlu1 %3058, %v62_v35   ;;  %259 = vperm.xlu0 %3057, %v61_v36   ;;  %v486_v36 = vld [vmem:[%s5654_s2 + $0x38] sm:$0xff] }
  0x5c   :  { %v3210_v37 = vpop.permute.xlu2 %114 }
  0x62   :  { %284 = vperm.xlu2 %3059, %v66_v38   ;;  %v485_v38 = vld [vmem:[%s5654_s2 + $0x30] sm:$0xff] }
  0x63   :  { %279 = vperm.xlu1 %3058, %v65_v39   ;;  %274 = vperm.xlu0 %3057, %v64_v40   ;;  %v484_v39 = vld [vmem:[%s5654_s2 + $0x28] sm:$0xff] }
  0x64   :  { %v3221_v41 = vpop.permute.xlu2 %119 }
  0x6a   :  { %299 = vperm.xlu2 %3059, %v69_v42  }
  0x6b   :  { %294 = vperm.xlu1 %3058, %v68_v43   ;;  %289 = vperm.xlu0 %3057, %v67_v44   ;;  %v489_v44 = vld [vmem:[%s5654_s2 + $0x50] sm:$0xff] }
  0x6c   :  { %v3232_v45 = vpop.permute.xlu2 %134 }
  0x72   :  { %314 = vperm.xlu2 %3059, %v72_v46   ;;  %v488_v46 = vld [vmem:[%s5654_s2 + $0x48] sm:$0xff] }
  0x73   :  { %309 = vperm.xlu1 %3058, %v71_v47   ;;  %304 = vperm.xlu0 %3057, %v70_v48   ;;  %v487_v47 = vld [vmem:[%s5654_s2 + $0x40] sm:$0xff] }
  0x74   :  { %v3243_v49 = vpop.permute.xlu2 %149 }
  0x75   :  { %v3245_v50 = vpop.permute.xlu1 %104  ;;  %v3247_v51 = vpop.permute.xlu0 %94 }
  0x7a   :  { %329 = vperm.xlu2 %3059, %v75_v52  }
  0x7b   :  { %324 = vperm.xlu1 %3058, %v74_v53   ;;  %319 = vperm.xlu0 %3057, %v73_v54   ;;  %v492_v54 = vld [vmem:[%s5654_s2 + $0x68] sm:$0xff] }
  0x7c   :  { %v3258_v55 = vpop.permute.xlu2 %164 }
  0x7d   :  { %v3260_v56 = vpop.permute.xlu1 %109  ;;  %v3262_v57 = vpop.permute.xlu0 %99 }
  0x82   :  { %344 = vperm.xlu2 %3059, %v78_v58   ;;  %v491_v58 = vld [vmem:[%s5654_s2 + $0x60] sm:$0xff] }
  0x83   :  { %339 = vperm.xlu1 %3058, %v77_v59   ;;  %334 = vperm.xlu0 %3057, %v76_v60   ;;  %v490_v59 = vld [vmem:[%s5654_s2 + $0x58] sm:$0xff] }
  0x84   :  { %v3273_v61 = vpop.permute.xlu2 %179 }
  0x85   :  { %v3275_v62 = vpop.permute.xlu1 %129  ;;  %v3277_v63 = vpop.permute.xlu0 %124 }
  0x8a   :  { %359 = vperm.xlu2 %3059, %v81_v0  }
  0x8b   :  { %354 = vperm.xlu1 %3058, %v80_v1   ;;  %349 = vperm.xlu0 %3057, %v79_v2   ;;  %v495_v2 = vld [vmem:[%s5654_s2 + $0x80] sm:$0xff] }
  0x8c   :  { %v3288_v3 = vpop.permute.xlu2 %194 }
  0x8d   :  { %v3290_v4 = vpop.permute.xlu1 %144  ;;  %v3292_v5 = vpop.permute.xlu0 %139 }
  0x92   :  { %374 = vperm.xlu2 %3059, %v84_v6   ;;  %v494_v6 = vld [vmem:[%s5654_s2 + $0x78] sm:$0xff] }
  0x93   :  { %369 = vperm.xlu1 %3058, %v83_v7   ;;  %364 = vperm.xlu0 %3057, %v82_v8   ;;  %v493_v7 = vld [vmem:[%s5654_s2 + $0x70] sm:$0xff] }
  0x94   :  { %v3303_v9 = vpop.permute.xlu2 %209 }
  0x95   :  { %v3305_v10 = vpop.permute.xlu1 %159  ;;  %v3307_v11 = vpop.permute.xlu0 %154 }
  0x9a   :  { %389 = vperm.xlu2 %3059, %v87_v12  }
  0x9b   :  { %384 = vperm.xlu1 %3058, %v86_v13   ;;  %379 = vperm.xlu0 %3057, %v85_v14   ;;  %v498_v14 = vld [vmem:[%s5654_s2 + $0x98] sm:$0xff] }
  0x9c   :  { %v3318_v15 = vpop.permute.xlu2 %224 }
  0x9d   :  { %v3320_v16 = vpop.permute.xlu1 %174  ;;  %v3322_v17 = vpop.permute.xlu0 %169 }
  0xa2   :  { %404 = vperm.xlu2 %3059, %v90_v18   ;;  %v497_v18 = vld [vmem:[%s5654_s2 + $0x90] sm:$0xff] }
  0xa3   :  { %399 = vperm.xlu1 %3058, %v89_v19   ;;  %394 = vperm.xlu0 %3057, %v88_v20   ;;  %v496_v19 = vld [vmem:[%s5654_s2 + $0x88] sm:$0xff] }
  0xa4   :  { %v3333_v21 = vpop.permute.xlu2 %239 }
  0xa5   :  { %v3335_v22 = vpop.permute.xlu1 %189  ;;  %v3337_v23 = vpop.permute.xlu0 %184 }
  0xaa   :  { %550 = vperm.xlu2 %3059, %v480_v24  }
  0xab   :  { %545 = vperm.xlu1 %3058, %v479_v25   ;;  %409 = vperm.xlu0 %3057, %v91_v26   ;;  %v501_v26 = vld [vmem:[%s5654_s2 + $0xb0] sm:$0xff] }
  0xac   :  { %v3348_v27 = vpop.permute.xlu2 %254 }
  0xad   :  { %5660 = vst [vmem:[#allocation3_spill] sm:$0xff] %v3348_v27  ;;  %v3350_v28 = vpop.permute.xlu1 %204  ;;  %v3352_v29 = vpop.permute.xlu0 %199 }
  0xb2   :  { %565 = vperm.xlu2 %3059, %v483_v30   ;;  %v500_v30 = vld [vmem:[%s5654_s2 + $0xa8] sm:$0xff] }
  0xb3   :  { %560 = vperm.xlu1 %3058, %v482_v31   ;;  %555 = vperm.xlu0 %3057, %v481_v32   ;;  %v499_v31 = vld [vmem:[%s5654_s2 + $0xa0] sm:$0xff] }
  0xb4   :  { %v3363_v33 = vpop.permute.xlu2 %269 }
  0xb5   :  { %5661 = vst [vmem:[#allocation4_spill] sm:$0xff] %v3363_v33  ;;  %v3365_v34 = vpop.permute.xlu1 %219  ;;  %v3367_v35 = vpop.permute.xlu0 %214  ;;  %v532_v33 = vld [vmem:[%s5654_s2 + $0x1a8] sm:$0xff] }
  0xba   :  { %580 = vperm.xlu2 %3059, %v486_v36  }
  0xbb   :  { %575 = vperm.xlu1 %3058, %v485_v38   ;;  %570 = vperm.xlu0 %3057, %v484_v39   ;;  %v504_v39 = vld [vmem:[%s5654_s2 + $0xc8] sm:$0xff] }
  0xbc   :  { %v3378_v40 = vpop.permute.xlu2 %284 }
  0xbd   :  { %5662 = vst [vmem:[#allocation5_spill] sm:$0xff] %v3378_v40  ;;  %v3380_v42 = vpop.permute.xlu1 %234  ;;  %v3382_v43 = vpop.permute.xlu0 %229  ;;  %v535_v40 = vld [vmem:[%s5654_s2 + $0x1c0] sm:$0xff] }
  0xc2   :  { %595 = vperm.xlu2 %3059, %v489_v44   ;;  %v503_v44 = vld [vmem:[%s5654_s2 + $0xc0] sm:$0xff] }
  0xc3   :  { %590 = vperm.xlu1 %3058, %v488_v46   ;;  %585 = vperm.xlu0 %3057, %v487_v47   ;;  %v502_v46 = vld [vmem:[%s5654_s2 + $0xb8] sm:$0xff] }
  0xc4   :  { %v3393_v48 = vpop.permute.xlu2 %299 }
  0xc5   :  { %5663 = vst [vmem:[#allocation6_spill] sm:$0xff] %v3393_v48  ;;  %v3395_v52 = vpop.permute.xlu1 %249  ;;  %v3397_v53 = vpop.permute.xlu0 %244 }
  0xca   :  { %610 = vperm.xlu2 %3059, %v492_v54  }
  0xcb   :  { %605 = vperm.xlu1 %3058, %v491_v58   ;;  %600 = vperm.xlu0 %3057, %v490_v59   ;;  %v507_v59 = vld [vmem:[%s5654_s2 + $0xe0] sm:$0xff] }
  0xcc   :  { %v3408_v60 = vpop.permute.xlu2 %314 }
  0xcd   :  { %5664 = vst [vmem:[#allocation7_spill] sm:$0xff] %v3408_v60  ;;  %v3410_v0 = vpop.permute.xlu1 %264  ;;  %v3412_v1 = vpop.permute.xlu0 %259 }
  0xce   :  { %5665 = vst [vmem:[#allocation8_spill] sm:$0xff] %v3410_v0  ;;  %v533_v0 = vld [vmem:[%s5654_s2 + $0x1b0] sm:$0xff] }
  0xcf   :  { %5666 = vst [vmem:[#allocation9_spill] sm:$0xff] %v3412_v1  ;;  %v534_v1 = vld [vmem:[%s5654_s2 + $0x1b8] sm:$0xff] }
  0xd2   :  { %625 = vperm.xlu2 %3059, %v495_v2   ;;  %v506_v2 = vld [vmem:[%s5654_s2 + $0xd8] sm:$0xff] }
  0xd3   :  { %620 = vperm.xlu1 %3058, %v494_v6   ;;  %615 = vperm.xlu0 %3057, %v493_v7   ;;  %v505_v6 = vld [vmem:[%s5654_s2 + $0xd0] sm:$0xff] }
  0xd4   :  { %v3423_v8 = vpop.permute.xlu2 %329 }
  0xd5   :  { %v3425_v12 = vpop.permute.xlu1 %279  ;;  %v3427_v13 = vpop.permute.xlu0 %274 }
  0xd6   :  { %5667 = vst [vmem:[#allocation10_spill] sm:$0xff] %v3425_v12  ;;  %v536_v12 = vld [vmem:[%s5654_s2 + $0x1c8] sm:$0xff] }
  0xd7   :  { %5668 = vst [vmem:[#allocation11_spill] sm:$0xff] %v3427_v13  ;;  %v537_v13 = vld [vmem:[%s5654_s2 + $0x1d0] sm:$0xff] }
  0xda   :  { %640 = vperm.xlu2 %3059, %v498_v14  }
  0xdb   :  { %635 = vperm.xlu1 %3058, %v497_v18   ;;  %630 = vperm.xlu0 %3057, %v496_v19   ;;  %v510_v19 = vld [vmem:[%s5654_s2 + $0xf8] sm:$0xff] }
  0xdc   :  { %v3438_v20 = vpop.permute.xlu2 %344 }
  0xdd   :  { %5669 = vst [vmem:[#allocation12_spill] sm:$0xff] %v3438_v20  ;;  %v3440_v24 = vpop.permute.xlu1 %294  ;;  %v3442_v25 = vpop.permute.xlu0 %289  ;;  %v519_v20 = vld [vmem:[%s5654_s2 + $0x140] sm:$0xff] }
  0xde   :  { %5670 = vst [vmem:[#allocation13_spill] sm:$0xff] %v3440_v24 }
  0xdf   :  { %5671 = vst [vmem:[#allocation14_spill] sm:$0xff] %v3442_v25 }
  0xe2   :  { %655 = vperm.xlu2 %3059, %v501_v26   ;;  %v509_v26 = vld [vmem:[%s5654_s2 + $0xf0] sm:$0xff] }
  0xe3   :  { %650 = vperm.xlu1 %3058, %v500_v30   ;;  %645 = vperm.xlu0 %3057, %v499_v31   ;;  %v508_v30 = vld [vmem:[%s5654_s2 + $0xe8] sm:$0xff] }
  0xe4   :  { %v3453_v32 = vpop.permute.xlu2 %359 }
  0xe5   :  { %5672 = vst [vmem:[#allocation15_spill] sm:$0xff] %v3453_v32  ;;  %v3455_v36 = vpop.permute.xlu1 %309  ;;  %v3457_v38 = vpop.permute.xlu0 %304  ;;  %v522_v32 = vld [vmem:[%s5654_s2 + $0x158] sm:$0xff] }
  0xe6   :  { %5673 = vst [vmem:[#allocation16_spill] sm:$0xff] %v3455_v36 }
  0xe7   :  { %5674 = vst [vmem:[#allocation17_spill] sm:$0xff] %v3457_v38 }
  0xea   :  { %670 = vperm.xlu2 %3059, %v504_v39  }
  0xeb   :  { %665 = vperm.xlu1 %3058, %v503_v44   ;;  %660 = vperm.xlu0 %3057, %v502_v46   ;;  %v513_v46 = vld [vmem:[%s5654_s2 + $0x110] sm:$0xff] }
  0xec   :  { %v3468_v47 = vpop.permute.xlu2 %374 }
  0xed   :  { %5675 = vst [vmem:[#allocation18_spill] sm:$0xff] %v3468_v47  ;;  %v3470_v54 = vpop.permute.xlu1 %324  ;;  %v3472_v58 = vpop.permute.xlu0 %319  ;;  %v525_v47 = vld [vmem:[%s5654_s2 + $0x170] sm:$0xff] }
  0xee   :  { %5676 = vst [vmem:[#allocation19_spill] sm:$0xff] %v3472_v58  ;;  %v538_v58 = vld [vmem:[%s5654_s2 + $0x1d8] sm:$0xff] }
  0xf2   :  { %685 = vperm.xlu2 %3059, %v507_v59   ;;  %v512_v59 = vld [vmem:[%s5654_s2 + $0x108] sm:$0xff] }
  0xf3   :  { %680 = vperm.xlu1 %3058, %v506_v2   ;;  %675 = vperm.xlu0 %3057, %v505_v6   ;;  %v511_v2 = vld [vmem:[%s5654_s2 + $0x100] sm:$0xff] }
  0xf4   :  { %v3483_v7 = vpop.permute.xlu2 %389 }
  0xf5   :  { %5677 = vst [vmem:[#allocation20_spill] sm:$0xff] %v3483_v7  ;;  %v3485_v14 = vpop.permute.xlu1 %339  ;;  %v3487_v18 = vpop.permute.xlu0 %334  ;;  %v528_v7 = vld [vmem:[%s5654_s2 + $0x188] sm:$0xff] }
  0xf6   :  { %5678 = vst [vmem:[#allocation21_spill] sm:$0xff] %v3485_v14 }
  0xf7   :  { %5679 = vst [vmem:[#allocation22_spill] sm:$0xff] %v3487_v18  ;;  %v515_v18 = vld [vmem:[%s5654_s2 + $0x120] sm:$0xff] }
  0xfa   :  { %700 = vperm.xlu2 %3059, %v510_v19  }
  0xfb   :  { %695 = vperm.xlu1 %3058, %v509_v26   ;;  %690 = vperm.xlu0 %3057, %v508_v30   ;;  %v516_v30 = vld [vmem:[%s5654_s2 + $0x128] sm:$0xff] }
  0xfc   :  { %v3498_v31 = vpop.permute.xlu2 %404 }
  0xfd   :  { %5680 = vst [vmem:[#allocation23_spill] sm:$0xff] %v3498_v31  ;;  %v3500_v39 = vpop.permute.xlu1 %354  ;;  %v3502_v44 = vpop.permute.xlu0 %349  ;;  %v530_v31 = vld [vmem:[%s5654_s2 + $0x198] sm:$0xff] }
  0xfe   :  { %5681 = vst [vmem:[#allocation24_spill] sm:$0xff] %v3500_v39 }
  0xff   :  { %5682 = vst [vmem:[#allocation25_spill] sm:$0xff] %v3502_v44  ;;  %v518_v44 = vld [vmem:[%s5654_s2 + $0x138] sm:$0xff] }
 0x102   :  { %715 = vperm.xlu2 %3059, %v513_v46   ;;  %v514_v46 = vld [vmem:[%s5654_s2 + $0x118] sm:$0xff] }
 0x103   :  { %710 = vperm.xlu1 %3058, %v512_v59   ;;  %705 = vperm.xlu0 %3057, %v511_v2  }
 0x104   :  { %v3513_v6 = vpop.permute.xlu2 %550 }
 0x105   :  { %v3515_v19 = vpop.permute.xlu1 %369  ;;  %v3517_v26 = vpop.permute.xlu0 %364 }
 0x106   :  { %5683 = vst [vmem:[#allocation26_spill] sm:$0xff] %v3515_v19 }
 0x107   :  { %5684 = vst [vmem:[#allocation27_spill] sm:$0xff] %v3517_v26  ;;  %v521_v26 = vld [vmem:[%s5654_s2 + $0x150] sm:$0xff] }
 0x10a   :  { %730 = vperm.xlu2 %3059, %v516_v30   ;;  %v517_v30 = vld [vmem:[%s5654_s2 + $0x130] sm:$0xff] }
 0x10b   :  { %725 = vperm.xlu1 %3058, %v515_v18   ;;  %720 = vperm.xlu0 %3057, %v514_v46  }
 0x10c   :  { %v3528_v59 = vpop.permute.xlu2 %565 }
 0x10d   :  { %v3530_v2 = vpop.permute.xlu1 %384  ;;  %v3532_v14 = vpop.permute.xlu0 %379 }
 0x10e   :  { %5685 = vst [vmem:[#allocation28_spill] sm:$0xff] %v3530_v2 }
 0x10f   :  { %5686 = vst [vmem:[#allocation29_spill] sm:$0xff] %v3532_v14  ;;  %v524_v14 = vld [vmem:[%s5654_s2 + $0x168] sm:$0xff] }
 0x112   :  { %745 = vperm.xlu2 %3059, %v519_v20   ;;  %v520_v20 = vld [vmem:[%s5654_s2 + $0x148] sm:$0xff] }
 0x113   :  { %740 = vperm.xlu1 %3058, %v518_v44   ;;  %735 = vperm.xlu0 %3057, %v517_v30  }
 0x114   :  { %v3543_v18 = vpop.permute.xlu2 %580 }
 0x115   :  { %v3545_v46 = vpop.permute.xlu1 %399  ;;  %v3547_v39 = vpop.permute.xlu0 %394 }
 0x116   :  { %5687 = vst [vmem:[#allocation30_spill] sm:$0xff] %v3545_v46  ;;  %v526_v46 = vld [vmem:[%s5654_s2 + $0x178] sm:$0xff] }
 0x117   :  { %5688 = vst [vmem:[#allocation31_spill] sm:$0xff] %v3547_v39  ;;  %v527_v39 = vld [vmem:[%s5654_s2 + $0x180] sm:$0xff] }
 0x11a   :  { %760 = vperm.xlu2 %3059, %v522_v32   ;;  %v523_v32 = vld [vmem:[%s5654_s2 + $0x160] sm:$0xff] }
 0x11b   :  { %755 = vperm.xlu1 %3058, %v521_v26   ;;  %750 = vperm.xlu0 %3057, %v520_v20  }
 0x11c   :  { %v3558_v44 = vpop.permute.xlu2 %595 }
 0x11d   :  { %v3560_v30 = vpop.permute.xlu1 %545  ;;  %v3562_v19 = vpop.permute.xlu0 %409 }
 0x11e   :  { %5689 = vst [vmem:[#allocation32_spill] sm:$0xff] %v3562_v19  ;;  %v531_v19 = vld [vmem:[%s5654_s2 + $0x1a0] sm:$0xff] }
 0x122   :  { %775 = vperm.xlu2 %3059, %v525_v47  }
 0x123   :  { %770 = vperm.xlu1 %3058, %v524_v14   ;;  %765 = vperm.xlu0 %3057, %v523_v32  }
 0x124   :  { %v611_v26 = vpop.permute.xlu2 %610 }
 0x125   :  { %v3573_v20 = vpop.permute.xlu1 %560  ;;  %v3575_v2 = vpop.permute.xlu0 %555 }
 0x12a   :  { %790 = vperm.xlu2 %3059, %v528_v7   ;;  %v529_v7 = vld [vmem:[%s5654_s2 + $0x190] sm:$0xff] }
 0x12b   :  { %785 = vperm.xlu1 %3058, %v527_v39   ;;  %780 = vperm.xlu0 %3057, %v526_v46  }
 0x12c   :  { %v3586_v47 = vpop.permute.xlu2 %625 }
 0x12d   :  { %v3588_v14 = vpop.permute.xlu1 %575  ;;  %v3590_v32 = vpop.permute.xlu0 %570 }
 0x132   :  { %805 = vperm.xlu2 %3059, %v531_v19  }
 0x133   :  { %800 = vperm.xlu1 %3058, %v530_v31   ;;  %795 = vperm.xlu0 %3057, %v529_v7  }
 0x134   :  { %v3601_v39 = vpop.permute.xlu2 %640 }
 0x135   :  { %v591_v46 = vpop.permute.xlu1 %590  ;;  %v586_v27 = vpop.permute.xlu0 %585 }
 0x13a   :  { %820 = vperm.xlu2 %3059, %v534_v1  }
 0x13b   :  { %815 = vperm.xlu1 %3058, %v533_v0   ;;  %810 = vperm.xlu0 %3057, %v532_v33   ;;  %v3626_v33 = vld [vmem:[%s5653_s0] ss:$0 sm:$0xff] }
 0x13c   :  { %v3612_v31 = vpop.permute.xlu2 %655  ;;  %v429_v0 = vmul.f32 %v3626_v33, %v3258_v55  ;;  %v430_v1 = vmul.f32 %v3626_v33, %v3322_v17  ;;  %v428_v38 = vmul.f32 %v3626_v33, %v3305_v10  ;;  %v539_v17 = vld [vmem:[%s5654_s2 + $0x1e0] sm:$0xff]  ;;  %v426_v10 = vmul.f32 %v3626_v33, %v3243_v49 }
 0x13d   :  { %v606_v19 = vpop.permute.xlu1 %605  ;;  %v601_v7 = vpop.permute.xlu0 %600  ;;  %v424_v49 = vmul.f32 %v3626_v33, %v3292_v5  ;;  %v541_v5 = vld [vmem:[%s5654_s2 + $0x1f0] sm:$0xff] }
 0x13e   :  { %v876_v55 = vadd.f32 %v611_v26, %v428_v38 }
 0x140   :  { %v940_v26 = vmax.f32 %v876_v55, 0.0 }
 0x142   :  { %835 = vperm.xlu2 %3059, %v537_v13  }
 0x143   :  { %830 = vperm.xlu1 %3058, %v536_v12   ;;  %825 = vperm.xlu0 %3057, %v535_v40   ;;  %v540_v12 = vld [vmem:[%s5654_s2 + $0x1e8] sm:$0xff]  ;;  %v427_v40 = vmul.f32 %v3626_v33, %v3307_v11  ;;  %v425_v11 = vmul.f32 %v3626_v33, %v3290_v4  ;;  %v1247_v4 = vld [vmem:[%s5655_s4] sm:$0xff] }
 0x144   :  { %v3632_v25 = vpop.permute.xlu2 %670 }
 0x145   :  { %v621_v24 = vpop.permute.xlu1 %620  ;;  %v616_v48 = vpop.permute.xlu0 %615 }
 0x146   :  { %v877_v36 = vadd.f32 %v616_v48, %v429_v0  ;;  %v878_v60 = vadd.f32 %v621_v24, %v430_v1  ;;  %v875_v48 = vadd.f32 %v606_v19, %v427_v40  ;;  %v873_v19 = vadd.f32 %v3558_v44, %v425_v11  ;;  %v542_v40 = vld [vmem:[%s5654_s2 + $0x1f8] sm:$0xff] }
 0x147   :  { %v422_v44 = vmul.f32 %v3626_v33, %v3275_v62  ;;  %v420_v11 = vmul.f32 %v3626_v33, %v3221_v41  ;;  %v1249_v41 = vld [vmem:[%s5655_s4 + $0x10] sm:$0xff] }
 0x148   :  { %v942_v13 = vmax.f32 %v878_v60, 0.0  ;;  %v941_v24 = vmax.f32 %v877_v36, 0.0  ;;  %v874_v60 = vadd.f32 %v601_v7, %v426_v10  ;;  %v939_v36 = vmax.f32 %v875_v48, 0.0 }
 0x149   :  { %v872_v7 = vadd.f32 %v591_v46, %v424_v49  ;;  %v421_v46 = vmul.f32 %v3626_v33, %v3277_v63  ;;  %v1250_v63 = vld [vmem:[%s5655_s4 + $0x18] sm:$0xff]  ;;  %v868_v49 = vadd.f32 %v3590_v32, %v420_v11  ;;  %v417_v32 = vmul.f32 %v3626_v33, %v3245_v50  ;;  %v1253_v50 = vld [vmem:[%s5655_s4 + $0x30] sm:$0xff]  ;;  %v1255_v11 = vld [vmem:[%s5655_s4 + $0x40] sm:$0xff] }
 0x14a   :  { %1631 = vmatpush.msra.mxu0 %v942_v13  ;;  %850 = vperm.xlu2 %3059, %v540_v12   ;;  %v938_v12 = vmax.f32 %v874_v60, 0.0  ;;  %v937_v13 = vmax.f32 %v873_v19, 0.0 }
 0x14b   :  { %845 = vperm.xlu1 %3058, %v539_v17   ;;  %840 = vperm.xlu0 %3057, %v538_v58   ;;  %v423_v58 = vmul.f32 %v3626_v33, %v3232_v45  ;;  %v446_v45 = vmul.f32 %v3626_v33, %v3395_v52  ;;  %v870_v17 = vadd.f32 %v3543_v18, %v422_v44  ;;  %v936_v48 = vmax.f32 %v872_v7, 0.0 }
 0x14c   :  { %1632 = vmatpush.msra.mxu0 %v941_v24  ;;  %v3651_v38 = vpop.permute.xlu2 %685  ;;  %v869_v52 = vadd.f32 %v3588_v14, %v421_v46  ;;  %v419_v18 = vmul.f32 %v3626_v33, %v3210_v37  ;;  %v1248_v14 = vld [vmem:[%s5655_s4 + $0x8] sm:$0xff] }
 0x14d   :  { %v3653_v0 = vpop.permute.xlu1 %635  ;;  %v3655_v1 = vpop.permute.xlu0 %630  ;;  %v871_v55 = vadd.f32 %v586_v27, %v423_v58  ;;  %v934_v19 = vmax.f32 %v870_v17, 0.0 }
 0x14e   :  { %1633 = vmatpush.msra.mxu0 %v940_v26  ;;  %v933_v37 = vmax.f32 %v869_v52, 0.0  ;;  %v1254_v52 = vld [vmem:[%s5655_s4 + $0x38] sm:$0xff] }
 0x14f   :  { %v935_v60 = vmax.f32 %v871_v55, 0.0 }
 0x150   :  { %1634 = vmatpush.msra.mxu0 %v939_v36  ;;  %v418_v36 = vmul.f32 %v3626_v33, %v3260_v56  ;;  %v416_v56 = vmul.f32 %v3626_v33, %v3262_v57  ;;  %v1251_v57 = vld [vmem:[%s5655_s4 + $0x20] sm:$0xff] }
 0x152   :  { %1635 = vmatpush.msra.mxu0 %v938_v12  ;;  %1313 = vperm.xlu2 %3059, %v1247_v4   ;;  %v867_v4 = vadd.f32 %v3528_v59, %v419_v18  ;;  %v866_v58 = vadd.f32 %v3573_v20, %v418_v36  ;;  %v932_v12 = vmax.f32 %v868_v49, 0.0  ;;  %v865_v59 = vadd.f32 %v3575_v2, %v417_v32  ;;  %v995_v36 = vld [vmem:[%s5656_s3 + $0x20] sm:$0xff]  ;;  %v1257_v32 = vld [vmem:[%s5655_s4 + $0x50] sm:$0xff] }
 0x153   :  { %860 = vperm.xlu1 %3058, %v542_v40   ;;  %855 = vperm.xlu0 %3057, %v541_v5   ;;  %v415_v20 = vmul.f32 %v3626_v33, %v3247_v51  ;;  %v864_v55 = vadd.f32 %v3513_v6, %v416_v56 }
 0x154   :  { %1636 = vmatpush.msra.mxu0 %v937_v13  ;;  %v701_v10 = vpop.permute.xlu2 %700  ;;  %v931_v44 = vmax.f32 %v867_v4, 0.0  ;;  %v930_v13 = vmax.f32 %v866_v58, 0.0  ;;  %v929_v46 = vmax.f32 %v865_v59, 0.0  ;;  %v441_v58 = vmul.f32 %v3626_v33, %v3318_v15 }
 0x155   :  { %v3678_v24 = vpop.permute.xlu1 %650  ;;  %v3680_v62 = vpop.permute.xlu0 %645  ;;  %v894_v27 = vadd.f32 %v701_v10, %v446_v45  ;;  %v1252_v45 = vld [vmem:[%s5655_s4 + $0x28] sm:$0xff]  ;;  %v863_v2 = vadd.f32 %v3560_v30, %v415_v20  ;;  %v928_v6 = vmax.f32 %v864_v55, 0.0  ;;  %v439_v15 = vmul.f32 %v3626_v33, %v3367_v35  ;;  %v1261_v35 = vld [vmem:[%s5655_s4 + $0x70] sm:$0xff] }
 0x156   :  { %1637 = vmatpush.msra.mxu0 %v936_v48  ;;  %v1256_v30 = vld [vmem:[%s5655_s4 + $0x48] sm:$0xff] }
 0x157   :  { %v958_v26 = vmax.f32 %v894_v27, 0.0  ;;  %v927_v48 = vmax.f32 %v863_v2, 0.0  ;;  %v991_v27 = vld [vmem:[%s5656_s3] sm:$0xff] }
 0x158   :  { %1638 = vmatpush.msra.mxu0 %v935_v60  ;;  %v444_v60 = vmul.f32 %v3626_v33, %v3333_v21  ;;  %v1259_v21 = vld [vmem:[%s5655_s4 + $0x60] sm:$0xff] }
 0x159   :  { %1840 = vmatpush.msra.mxu1 %v958_v26  ;;  %v445_v26 = vmul.f32 %v3626_v33, %v3397_v53  ;;  %v442_v53 = vmul.f32 %v3626_v33, %v3382_v43  ;;  %v440_v43 = vmul.f32 %v3626_v33, %v3365_v34  ;;  %v999_v34 = vld [vmem:[%s5656_s3 + $0x40] sm:$0xff] }
 0x15a   :  { %1639 = vmatpush.msra.mxu0 %v934_v19  ;;  %1328 = vperm.xlu2 %3059, %v1250_v63   ;;  %v443_v19 = vmul.f32 %v3626_v33, %v3380_v42  ;;  %v1258_v42 = vld [vmem:[%s5655_s4 + $0x58] sm:$0xff] }
 0x15b   :  { %1323 = vperm.xlu1 %3058, %v1249_v41   ;;  %1318 = vperm.xlu0 %3057, %v1248_v14   ;;  %v888_v55 = vadd.f32 %v3632_v25, %v440_v43  ;;  %v1260_v25 = vld [vmem:[%s5655_s4 + $0x68] sm:$0xff] }
 0x15c   :  { %1640 = vmatpush.msra.mxu0 %v933_v37  ;;  %v3703_v7 = vpop.permute.xlu2 %715  ;;  %v891_v4 = vadd.f32 %v3651_v38, %v443_v19 }
 0x15d   :  { %v3705_v40 = vpop.permute.xlu1 %665  ;;  %v3707_v5 = vpop.permute.xlu0 %660 }
 0x15e   :  { %1641 = vmatpush.msra.mxu0 %v932_v12  ;;  %v887_v2 = vadd.f32 %v3705_v40, %v439_v15  ;;  %v436_v40 = vmul.f32 %v3626_v33, %v3352_v29  ;;  %v1003_v29 = vld [vmem:[%s5656_s3 + $0x60] sm:$0xff]  ;;  %v1270_v15 = vld [vmem:[%s5655_s4 + $0xb8] sm:$0xff] }
 0x160   :  { %1642 = vmatpush.msra.mxu0 %v931_v44  ;;  %v955_v44 = vmax.f32 %v891_v4, 0.0 }
 0x162   :  { %1643 = vmatpush.msra.mxu0 %v930_v13  ;;  %1343 = vperm.xlu2 %3059, %v1253_v50  }
 0x163   :  { %1338 = vperm.xlu1 %3058, %v1252_v45   ;;  %1333 = vperm.xlu0 %3057, %v1251_v57   ;;  %v1262_v45 = vld [vmem:[%s5655_s4 + $0x78] sm:$0xff]  ;;  %v438_v57 = vmul.f32 %v3626_v33, %v3303_v9  ;;  %v952_v9 = vmax.f32 %v888_v55, 0.0  ;;  %v1269_v55 = vld [vmem:[%s5655_s4 + $0xb0] sm:$0xff] }
 0x164   :  { %1644 = vmatpush.msra.mxu0 %v929_v46  ;;  %v3725_v51 = vpop.permute.xlu2 %730 }
 0x165   :  { %v681_v17 = vpop.permute.xlu1 %680  ;;  %v676_v10 = vpop.permute.xlu0 %675 }
 0x166   :  { %1645 = vmatpush.msra.mxu0 %v928_v6  ;;  %v890_v12 = vadd.f32 %v681_v17, %v442_v53  ;;  %v889_v38 = vadd.f32 %v676_v10, %v441_v58  ;;  %v437_v6 = vmul.f32 %v3626_v33, %v3350_v28  ;;  %v886_v17 = vadd.f32 %v3707_v5, %v438_v57 }
 0x167   :  { %v435_v28 = vmul.f32 %v3626_v33, %v3288_v3  ;;  %v884_v5 = vadd.f32 %v3678_v24, %v436_v40  ;;  %v1264_v3 = vld [vmem:[%s5655_s4 + $0x88] sm:$0xff]  ;;  %v1263_v24 = vld [vmem:[%s5655_s4 + $0x80] sm:$0xff] }
 0x168   :  { %1646 = vmatpush.msra.mxu0 %v927_v48  ;;  %v954_v13 = vmax.f32 %v890_v12, 0.0  ;;  %v953_v46 = vmax.f32 %v889_v38, 0.0  ;;  %v885_v10 = vadd.f32 %v3612_v31, %v437_v6  ;;  %v1265_v31 = vld [vmem:[%s5655_s4 + $0x90] sm:$0xff]  ;;  %v992_v12 = vld [vmem:[%s5656_s3 + $0x8] sm:$0xff]  ;;  %v1011_v38 = vld [vmem:[%s5656_s3 + $0xa0] sm:$0xff]  ;;  %v462_v6 = vmul.f32 %v3626_v33, %v3423_v8 }
 0x169   :  { %1647 = vmatmul.f32.vlgmr.msra.gmra.mxu0 %v991_v27  ;;  %v951_v27 = vmax.f32 %v887_v2, 0.0  ;;  %v1015_v2 = vld [vmem:[%s5656_s3 + $0xc0] sm:$0xff]  ;;  %v1000_v40 = vld [vmem:[%s5656_s3 + $0x48] sm:$0xff] }
 0x16a   :  { %1358 = vperm.xlu2 %3059, %v1256_v30   ;;  %v1019_v8 = vld [vmem:[%s5656_s3 + $0xe0] sm:$0xff] }
 0x16b   :  { %1353 = vperm.xlu1 %3058, %v1255_v11   ;;  %1348 = vperm.xlu0 %3057, %v1254_v52   ;;  %v950_v52 = vmax.f32 %v886_v17, 0.0  ;;  %v461_v17 = vmul.f32 %v3626_v33, %v3470_v54  ;;  %v1277_v54 = vld [vmem:[%s5655_s4 + $0xf0] sm:$0xff] }
 0x16c   :  { %v3743_v63 = vpop.permute.xlu2 %745 }
 0x16d   :  { %v696_v18 = vpop.permute.xlu1 %695  ;;  %v691_v49 = vpop.permute.xlu0 %690 }
 0x16e   :  { %v893_v41 = vadd.f32 %v696_v18, %v445_v26  ;;  %v892_v14 = vadd.f32 %v691_v49, %v444_v60  ;;  %v434_v60 = vmul.f32 %v3626_v33, %v3335_v22  ;;  %v883_v26 = vadd.f32 %v3680_v62, %v435_v28  ;;  %v5690_v28 = vld [vmem:[#allocation19_spill] sm:$0xff] }
 0x16f   :  { %v949_v18 = vmax.f32 %v885_v10, 0.0  ;;  %v433_v49 = vmul.f32 %v3626_v33, %v3337_v23  ;;  %v948_v22 = vmax.f32 %v884_v5, 0.0  ;;  %v432_v62 = vmul.f32 %v3626_v33, %v3273_v61  ;;  %v1007_v61 = vld [vmem:[%s5656_s3 + $0x80] sm:$0xff] }
 0x170   :  { %v957_v37 = vmax.f32 %v893_v41, 0.0  ;;  %v956_v56 = vmax.f32 %v892_v14, 0.0  ;;  %v882_v19 = vadd.f32 %v3601_v39, %v434_v60  ;;  %v431_v23 = vmul.f32 %v3626_v33, %v3320_v16  ;;  %v1267_v16 = vld [vmem:[%s5655_s4 + $0xa0] sm:$0xff] }
 0x171   :  { %1650 = vmatmul.f32.gmra.mxu0 %v995_v36  ;;  %v881_v41 = vadd.f32 %v3653_v0, %v433_v49  ;;  %v947_v36 = vmax.f32 %v883_v26, 0.0  ;;  %v880_v39 = vadd.f32 %v3655_v1, %v432_v62  ;;  %v1268_v0 = vld [vmem:[%s5655_s4 + $0xa8] sm:$0xff]  ;;  %v1266_v1 = vld [vmem:[%s5655_s4 + $0x98] sm:$0xff]  ;;  %v460_v5 = vmul.f32 %v3626_v33, %v5690_v28  ;;  %v5693_v62 = vld [vmem:[#allocation17_spill] sm:$0xff] }
 0x172   :  { %1841 = vmatpush.msra.mxu1 %v957_v37  ;;  %1373 = vperm.xlu2 %3059, %v1259_v21   ;;  %v946_v4 = vmax.f32 %v882_v19, 0.0  ;;  %v879_v37 = vadd.f32 %v3586_v47, %v431_v23 }
 0x173   :  { %1368 = vperm.xlu1 %3058, %v1258_v42   ;;  %1363 = vperm.xlu0 %3057, %v1257_v32   ;;  %v945_v42 = vmax.f32 %v881_v41, 0.0  ;;  %v944_v32 = vmax.f32 %v880_v39, 0.0  ;;  %v457_v41 = vmul.f32 %v3626_v33, %v5693_v62  ;;  %v1012_v62 = vld [vmem:[%s5656_s3 + $0xa8] sm:$0xff] }
 0x174   :  { %1842 = vmatpush.msra.mxu1 %v956_v56  ;;  %v3766_v59 = vpop.permute.xlu2 %760  ;;  %v943_v47 = vmax.f32 %v879_v37, 0.0  ;;  %v5694_v37 = vld [vmem:[#allocation6_spill] sm:$0xff] }
 0x175   :  { %v3768_v50 = vpop.permute.xlu1 %710  ;;  %v3770_v20 = vpop.permute.xlu0 %705 }
 0x176   :  { %1843 = vmatpush.msra.mxu1 %v955_v44  ;;  %v1271_v44 = vld [vmem:[%s5655_s4 + $0xc0] sm:$0xff] }
 0x178   :  { %1844 = vmatpush.msra.mxu1 %v954_v13 }
 0x179   :  { %1653 = vmatmul.f32.gmra.mxu0 %v999_v34  ;;  %v996_v34 = vld [vmem:[%s5656_s3 + $0x28] sm:$0xff] }
 0x17a   :  { %1845 = vmatpush.msra.mxu1 %v953_v46  ;;  %1388 = vperm.xlu2 %3059, %v1262_v45   ;;  %v1274_v46 = vld [vmem:[%s5655_s4 + $0xd8] sm:$0xff] }
 0x17b   :  { %1383 = vperm.xlu1 %3058, %v1261_v35   ;;  %1378 = vperm.xlu0 %3057, %v1260_v25   ;;  %v1273_v35 = vld [vmem:[%s5655_s4 + $0xd0] sm:$0xff]  ;;  %v1272_v25 = vld [vmem:[%s5655_s4 + $0xc8] sm:$0xff] }
 0x17c   :  { %1846 = vmatpush.msra.mxu1 %v952_v9  ;;  %v3796_v48 = vpop.permute.xlu2 %775 }
 0x17d   :  { %v3798_v30 = vpop.permute.xlu1 %725  ;;  %v3800_v11 = vpop.permute.xlu0 %720 }
 0x17e   :  { %1847 = vmatpush.msra.mxu1 %v951_v27 }
 0x180   :  { %1848 = vmatpush.msra.mxu1 %v950_v52  ;;  %v909_v52 = vadd.f32 %v3796_v48, %v461_v17  ;;  %v1275_v48 = vld [vmem:[%s5655_s4 + $0xe0] sm:$0xff] }
 0x181   :  { %1656 = vmatmul.f32.gmra.mxu0 %v1003_v29 }
 0x182   :  { %1849 = vmatpush.msra.mxu1 %v949_v18  ;;  %1403 = vperm.xlu2 %3059, %v1265_v31   ;;  %v5691_v31 = vld [vmem:[#allocation7_spill] sm:$0xff]  ;;  %v973_v19 = vmax.f32 %v909_v52, 0.0 }
 0x183   :  { %1398 = vperm.xlu1 %3058, %v1264_v3   ;;  %1393 = vperm.xlu0 %3057, %v1263_v24   ;;  %v459_v60 = vmul.f32 %v3626_v33, %v5691_v31  ;;  %v1276_v3 = vld [vmem:[%s5655_s4 + $0xe8] sm:$0xff]  ;;  %v1283_v52 = vld [vmem:[%s5655_s4 + $0x120] sm:$0xff] }
 0x184   :  { %1850 = vmatpush.msra.mxu1 %v948_v22  ;;  %v3826_v14 = vpop.permute.xlu2 %790  ;;  %v5692_v24 = vld [vmem:[#allocation16_spill] sm:$0xff] }
 0x185   :  { %v3828_v21 = vpop.permute.xlu1 %740  ;;  %v3830_v53 = vpop.permute.xlu0 %735  ;;  %v458_v49 = vmul.f32 %v3626_v33, %v5692_v24 }
 0x186   :  { %1851 = vmatpush.msra.mxu1 %v947_v36 }
 0x187   :  { %v906_v36 = vadd.f32 %v3766_v59, %v458_v49  ;;  %v1023_v59 = vld [vmem:[%s5656_s3 + $0x100] sm:$0xff] }
 0x188   :  { %1852 = vmatpush.msra.mxu1 %v946_v4  ;;  %v1004_v4 = vld [vmem:[%s5656_s3 + $0x68] sm:$0xff] }
 0x189   :  { %1659 = vmatmul.f32.gmra.mxu0 %v1007_v61 }
 0x18a   :  { %1853 = vmatpush.msra.mxu1 %v945_v42  ;;  %1418 = vperm.xlu2 %3059, %v1268_v0   ;;  %v456_v42 = vmul.f32 %v3626_v33, %v5694_v37 }
 0x18b   :  { %1413 = vperm.xlu1 %3058, %v1267_v16   ;;  %1408 = vperm.xlu0 %3057, %v1266_v1  }
 0x18c   :  { %1854 = vmatpush.msra.mxu1 %v944_v32  ;;  %v3848_v58 = vpop.permute.xlu2 %805  ;;  %v1280_v32 = vld [vmem:[%s5655_s4 + $0x108] sm:$0xff] }
 0x18d   :  { %v756_v56 = vpop.permute.xlu1 %755  ;;  %v3853_v43 = vpop.permute.xlu0 %750 }
 0x18e   :  { %1855 = vmatpush.msra.mxu1 %v943_v47  ;;  %v905_v16 = vadd.f32 %v756_v56, %v457_v41  ;;  %v5695_v47 = vld [vmem:[#allocation13_spill] sm:$0xff]  ;;  %v1279_v56 = vld [vmem:[%s5655_s4 + $0x100] sm:$0xff] }
 0x18f   :  { %1856 = vmatmul.f32.vlgmr.msra.gmra.mxu1 %v992_v12  ;;  %v455_v12 = vmul.f32 %v3626_v33, %v5695_v47  ;;  %v1284_v47 = vld [vmem:[%s5655_s4 + $0x128] sm:$0xff] }
 0x191   :  { %1662 = vmatmul.f32.gmra.mxu0 %v1011_v38  ;;  %v904_v38 = vadd.f32 %v3853_v43, %v456_v42  ;;  %v5697_v43 = vld [vmem:[#allocation5_spill] sm:$0xff]  ;;  %v1286_v42 = vld [vmem:[%s5655_s4 + $0x138] sm:$0xff] }
 0x192   :  { %1433 = vperm.xlu2 %3059, %v1271_v44   ;;  %v970_v44 = vmax.f32 %v906_v36, 0.0  ;;  %v5702_v36 = vld [vmem:[#allocation9_spill] sm:$0xff] }
 0x193   :  { %1428 = vperm.xlu1 %3058, %v1270_v15   ;;  %1423 = vperm.xlu0 %3057, %v1269_v55   ;;  %v1278_v15 = vld [vmem:[%s5655_s4 + $0xf8] sm:$0xff] }
 0x194   :  { %v3867_v13 = vpop.permute.xlu2 %820  ;;  %v5696_v55 = vld [vmem:[#allocation14_spill] sm:$0xff] }
 0x195   :  { %v771_v45 = vpop.permute.xlu1 %770  ;;  %v766_v57 = vpop.permute.xlu0 %765 }
 0x196   :  { %v908_v26 = vadd.f32 %v771_v45, %v460_v5  ;;  %v907_v22 = vadd.f32 %v766_v57, %v459_v60  ;;  %v903_v45 = vadd.f32 %v3743_v63, %v455_v12  ;;  %v969_v57 = vmax.f32 %v905_v16, 0.0  ;;  %v1281_v60 = vld [vmem:[%s5655_s4 + $0x110] sm:$0xff]  ;;  %v5703_v16 = vld [vmem:[#allocation3_spill] sm:$0xff] }
 0x197   :  { %1859 = vmatmul.f32.gmra.mxu1 %v996_v34  ;;  %v454_v34 = vmul.f32 %v3626_v33, %v5696_v55 }
 0x198   :  { %v972_v23 = vmax.f32 %v908_v26, 0.0  ;;  %v971_v1 = vmax.f32 %v907_v22, 0.0  ;;  %v967_v5 = vmax.f32 %v903_v45, 0.0  ;;  %v5700_v26 = vld [vmem:[#allocation4_spill] sm:$0xff]  ;;  %v993_v45 = vld [vmem:[%s5656_s3 + $0x10] sm:$0xff] }
 0x199   :  { %1665 = vmatmul.f32.gmra.mxu0 %v1015_v2  ;;  %v453_v2 = vmul.f32 %v3626_v33, %v5697_v43  ;;  %v1288_v43 = vld [vmem:[%s5655_s4 + $0x148] sm:$0xff] }
 0x19a   :  { %1448 = vperm.xlu2 %3059, %v1274_v46   ;;  %v902_v46 = vadd.f32 %v3828_v21, %v454_v34  ;;  %v1027_v21 = vld [vmem:[%s5656_s3 + $0x120] sm:$0xff] }
 0x19b   :  { %1443 = vperm.xlu1 %3058, %v1273_v35   ;;  %1438 = vperm.xlu0 %3057, %v1272_v25   ;;  %v968_v25 = vmax.f32 %v904_v38, 0.0  ;;  %v901_v28 = vadd.f32 %v3830_v53, %v453_v2  ;;  %v1282_v53 = vld [vmem:[%s5655_s4 + $0x118] sm:$0xff]  ;;  %v1287_v2 = vld [vmem:[%s5655_s4 + $0x140] sm:$0xff] }
 0x19c   :  { %v3888_v9 = vpop.permute.xlu2 %835  ;;  %v966_v31 = vmax.f32 %v902_v46, 0.0  ;;  %v5704_v46 = vld [vmem:[#allocation23_spill] sm:$0xff] }
 0x19d   :  { %v3893_v10 = vpop.permute.xlu1 %785  ;;  %v781_v27 = vpop.permute.xlu0 %780 }
 0x19e   :  { %v910_v29 = vadd.f32 %v781_v27, %v462_v6  ;;  %v1008_v6 = vld [vmem:[%s5656_s3 + $0x88] sm:$0xff] }
 0x19f   :  { %1862 = vmatmul.f32.gmra.mxu1 %v1000_v40  ;;  %v5698_v40 = vld [vmem:[#allocation10_spill] sm:$0xff] }
 0x1a0   :  { %v974_v18 = vmax.f32 %v910_v29, 0.0  ;;  %v452_v27 = vmul.f32 %v3626_v33, %v5698_v40 }
 0x1a1   :  { %1668 = vmatmul.f32.gmra.mxu0 %v1019_v8  ;;  %v5699_v8 = vld [vmem:[#allocation11_spill] sm:$0xff] }
 0x1a2   :  { %2049 = vmatpush.msra.mxu2 %v974_v18  ;;  %1463 = vperm.xlu2 %3059, %v1277_v54   ;;  %v451_v29 = vmul.f32 %v3626_v33, %v5699_v8  ;;  %v900_v54 = vadd.f32 %v3725_v51, %v452_v27  ;;  %v450_v18 = vmul.f32 %v3626_v33, %v5700_v26  ;;  %v5701_v51 = vld [vmem:[#allocation8_spill] sm:$0xff]  ;;  %v5707_v26 = vld [vmem:[#allocation31_spill] sm:$0xff] }
 0x1a3   :  { %1458 = vperm.xlu1 %3058, %v1276_v3   ;;  %1453 = vperm.xlu0 %3057, %v1275_v48   ;;  %v965_v48 = vmax.f32 %v901_v28, 0.0  ;;  %v449_v24 = vmul.f32 %v3626_v33, %v5701_v51  ;;  %v1020_v28 = vld [vmem:[%s5656_s3 + $0xe8] sm:$0xff]  ;;  %v1291_v51 = vld [vmem:[%s5655_s4 + $0x160] sm:$0xff] }
 0x1a4   :  { %2050 = vmatpush.msra.mxu2 %v973_v19  ;;  %v3917_v39 = vpop.permute.xlu2 %850  ;;  %v899_v3 = vadd.f32 %v3798_v30, %v451_v29  ;;  %v898_v49 = vadd.f32 %v3800_v11, %v450_v18  ;;  %v964_v22 = vmax.f32 %v900_v54, 0.0  ;;  %v1031_v11 = vld [vmem:[%s5656_s3 + $0x140] sm:$0xff]  ;;  %v475_v18 = vmul.f32 %v3626_v33, %v5707_v26 }
 0x1a5   :  { %v3922_v61 = vpop.permute.xlu1 %800  ;;  %v3924_v0 = vpop.permute.xlu0 %795  ;;  %v1039_v54 = vld [vmem:[%s5656_s3 + $0x180] sm:$0xff] }
 0x1a6   :  { %2051 = vmatpush.msra.mxu2 %v972_v23  ;;  %v448_v23 = vmul.f32 %v3626_v33, %v5702_v36  ;;  %v963_v37 = vmax.f32 %v899_v3, 0.0 }
 0x1a7   :  { %1865 = vmatmul.f32.gmra.mxu1 %v1004_v4  ;;  %v897_v4 = vadd.f32 %v3703_v7, %v449_v24  ;;  %v1285_v7 = vld [vmem:[%s5655_s4 + $0x130] sm:$0xff]  ;;  %v1290_v24 = vld [vmem:[%s5655_s4 + $0x158] sm:$0xff] }
 0x1a8   :  { %2052 = vmatpush.msra.mxu2 %v971_v1  ;;  %v447_v1 = vmul.f32 %v3626_v33, %v5703_v16 }
 0x1a9   :  { %1671 = vmatmul.f32.gmra.mxu0 %v1023_v59  ;;  %v896_v59 = vadd.f32 %v3768_v50, %v448_v23  ;;  %v961_v38 = vmax.f32 %v897_v4, 0.0 }
 0x1aa   :  { %2053 = vmatpush.msra.mxu2 %v970_v44  ;;  %1478 = vperm.xlu2 %3059, %v1280_v32   ;;  %v962_v32 = vmax.f32 %v898_v49, 0.0  ;;  %v895_v12 = vadd.f32 %v3770_v20, %v447_v1  ;;  %v1035_v20 = vld [vmem:[%s5656_s3 + $0x160] sm:$0xff]  ;;  %v5708_v49 = vld [vmem:[#allocation20_spill] sm:$0xff] }
 0x1ab   :  { %1473 = vperm.xlu1 %3058, %v1279_v56   ;;  %1468 = vperm.xlu0 %3057, %v1278_v15   ;;  %v960_v44 = vmax.f32 %v896_v59, 0.0  ;;  %v1016_v56 = vld [vmem:[%s5656_s3 + $0xc8] sm:$0xff]  ;;  %v5710_v59 = vld [vmem:[#allocation29_spill] sm:$0xff] }
 0x1ac   :  { %2054 = vmatpush.msra.mxu2 %v969_v57  ;;  %v3949_v35 = vpop.permute.xlu2 %1313  ;;  %v959_v34 = vmax.f32 %v895_v12, 0.0  ;;  %v1289_v57 = vld [vmem:[%s5655_s4 + $0x150] sm:$0xff]  ;;  %v1043_v12 = vld [vmem:[%s5656_s3 + $0x1a0] sm:$0xff] }
 0x1ad   :  { %v3954_v17 = vpop.permute.xlu1 %815  ;;  %v3956_v63 = vpop.permute.xlu0 %810 }
 0x1ae   :  { %2055 = vmatpush.msra.mxu2 %v968_v25  ;;  %v477_v25 = vmul.f32 %v3626_v33, %v5704_v46 }
 0x1af   :  { %1868 = vmatmul.f32.gmra.mxu1 %v1008_v6  ;;  %v5705_v6 = vld [vmem:[#allocation32_spill] sm:$0xff] }
 0x1b0   :  { %2056 = vmatpush.msra.mxu2 %v967_v5  ;;  %v478_v40 = vmul.f32 %v3626_v33, %v5705_v6 }
 0x1b1   :  { %1674 = vmatmul.f32.gmra.mxu0 %v1027_v21 }
 0x1b2   :  { %2057 = vmatpush.msra.mxu2 %v966_v31  ;;  %1493 = vperm.xlu2 %3059, %v1283_v52   ;;  %v5706_v52 = vld [vmem:[#allocation30_spill] sm:$0xff]  ;;  %v997_v31 = vld [vmem:[%s5656_s3 + $0x30] sm:$0xff] }
 0x1b3   :  { %1488 = vperm.xlu1 %3058, %v1282_v53   ;;  %1483 = vperm.xlu0 %3057, %v1281_v60   ;;  %v476_v8 = vmul.f32 %v3626_v33, %v5706_v52  ;;  %v1292_v60 = vld [vmem:[%s5655_s4 + $0x168] sm:$0xff] }
 0x1b4   :  { %2058 = vmatpush.msra.mxu2 %v965_v48  ;;  %v3982_v19 = vpop.permute.xlu2 %1328 }
 0x1b5   :  { %v3987_v41 = vpop.permute.xlu1 %830  ;;  %v3989_v30 = vpop.permute.xlu0 %825  ;;  %v924_v3 = vadd.f32 %v3917_v39, %v476_v8  ;;  %v5709_v39 = vld [vmem:[#allocation28_spill] sm:$0xff] }
 0x1b6   :  { %2059 = vmatpush.msra.mxu2 %v964_v22  ;;  %v474_v22 = vmul.f32 %v3626_v33, %v5708_v49  ;;  %v473_v23 = vmul.f32 %v3626_v33, %v5709_v39  ;;  %v1032_v39 = vld [vmem:[%s5656_s3 + $0x148] sm:$0xff] }
 0x1b7   :  { %1871 = vmatmul.f32.gmra.mxu1 %v1012_v62  ;;  %v988_v4 = vmax.f32 %v924_v3, 0.0  ;;  %v1296_v3 = vld [vmem:[%s5655_s4 + $0x188] sm:$0xff] }
 0x1b8   :  { %2060 = vmatpush.msra.mxu2 %v963_v37 }
 0x1b9   :  { %1677 = vmatmul.f32.gmra.mxu0 %v1031_v11 }
 0x1ba   :  { %2061 = vmatpush.msra.mxu2 %v962_v32  ;;  %1508 = vperm.xlu2 %3059, %v1286_v42   ;;  %v1024_v42 = vld [vmem:[%s5656_s3 + $0x108] sm:$0xff]  ;;  %v472_v32 = vmul.f32 %v3626_v33, %v5710_v59 }
 0x1bb   :  { %1503 = vperm.xlu1 %3058, %v1285_v7   ;;  %1498 = vperm.xlu0 %3057, %v1284_v47   ;;  %v921_v7 = vadd.f32 %v3888_v9, %v473_v23 }
 0x1bc   :  { %2062 = vmatpush.msra.mxu2 %v961_v38  ;;  %v4010_v50 = vpop.permute.xlu2 %1343  ;;  %v1001_v38 = vld [vmem:[%s5656_s3 + $0x50] sm:$0xff]  ;;  %v920_v9 = vadd.f32 %v3987_v41, %v472_v32  ;;  %v5713_v41 = vld [vmem:[#allocation27_spill] sm:$0xff] }
 0x1bd   :  { %v846_v15 = vpop.permute.xlu1 %845  ;;  %v841_v55 = vpop.permute.xlu0 %840  ;;  %v469_v46 = vmul.f32 %v3626_v33, %v5713_v41  ;;  %v1304_v41 = vld [vmem:[%s5655_s4 + $0x1c8] sm:$0xff] }
 0x1be   :  { %2063 = vmatpush.msra.mxu2 %v960_v44  ;;  %v923_v62 = vadd.f32 %v846_v15, %v475_v18  ;;  %v922_v37 = vadd.f32 %v841_v55, %v474_v22  ;;  %v1295_v44 = vld [vmem:[%s5655_s4 + $0x180] sm:$0xff]  ;;  %v984_v6 = vmax.f32 %v920_v9, 0.0  ;;  %v1297_v18 = vld [vmem:[%s5655_s4 + $0x190] sm:$0xff] }
 0x1bf   :  { %1874 = vmatmul.f32.gmra.mxu1 %v1016_v56  ;;  %v5711_v56 = vld [vmem:[#allocation18_spill] sm:$0xff]  ;;  %v917_v8 = vadd.f32 %v3954_v17, %v469_v46 }
 0x1c0   :  { %2064 = vmatpush.msra.mxu2 %v959_v34  ;;  %v987_v47 = vmax.f32 %v923_v62, 0.0  ;;  %v471_v15 = vmul.f32 %v3626_v33, %v5711_v56  ;;  %v986_v55 = vmax.f32 %v922_v37, 0.0  ;;  %v1294_v34 = vld [vmem:[%s5655_s4 + $0x178] sm:$0xff]  ;;  %v1300_v56 = vld [vmem:[%s5655_s4 + $0x1a8] sm:$0xff] }
 0x1c1   :  { %1680 = vmatmul.f32.gmra.mxu0 %v1035_v20  ;;  %2065 = vmatmul.f32.vlgmr.msra.gmra.mxu2 %v993_v45  ;;  %v1293_v20 = vld [vmem:[%s5655_s4 + $0x170] sm:$0xff]  ;;  %v5712_v45 = vld [vmem:[#allocation26_spill] sm:$0xff]  ;;  %v981_v49 = vmax.f32 %v917_v8, 0.0 }
 0x1c2   :  { %1523 = vperm.xlu2 %3059, %v1289_v57   ;;  %v470_v57 = vmul.f32 %v3626_v33, %v5712_v45 }
 0x1c3   :  { %1518 = vperm.xlu1 %3058, %v1288_v43   ;;  %1513 = vperm.xlu0 %3057, %v1287_v2   ;;  %v985_v43 = vmax.f32 %v921_v7, 0.0  ;;  %v919_v2 = vadd.f32 %v3989_v30, %v471_v15  ;;  %v1009_v7 = vld [vmem:[%s5656_s3 + $0x90] sm:$0xff]  ;;  %v1299_v15 = vld [vmem:[%s5655_s4 + $0x1a0] sm:$0xff] }
 0x1c4   :  { %v4034_v27 = vpop.permute.xlu2 %1358 }
 0x1c5   :  { %v861_v5 = vpop.permute.xlu1 %860  ;;  %v856_v21 = vpop.permute.xlu0 %855 }
 0x1c6   :  { %v925_v29 = vadd.f32 %v856_v21, %v477_v25  ;;  %v926_v53 = vadd.f32 %v861_v5, %v478_v40  ;;  %v918_v25 = vadd.f32 %v3867_v13, %v470_v57  ;;  %v5714_v21 = vld [vmem:[#allocation15_spill] sm:$0xff] }
 0x1c7   :  { %1877 = vmatmul.f32.gmra.mxu1 %v1020_v28  ;;  %v1028_v28 = vld [vmem:[%s5656_s3 + $0x128] sm:$0xff]  ;;  %v468_v52 = vmul.f32 %v3626_v33, %v5714_v21  ;;  %v1047_v13 = vld [vmem:[%s5656_s3 + $0x1c0] sm:$0xff] }
 0x1c8   :  { %v990_v48 = vmax.f32 %v926_v53, 0.0  ;;  %v989_v36 = vmax.f32 %v925_v29, 0.0  ;;  %v983_v29 = vmax.f32 %v919_v2, 0.0  ;;  %v5715_v53 = vld [vmem:[#allocation24_spill] sm:$0xff]  ;;  %v982_v26 = vmax.f32 %v918_v25, 0.0  ;;  %v994_v2 = vld [vmem:[%s5656_s3 + $0x18] sm:$0xff] }
 0x1c9   :  { %1683 = vmatmul.f32.gmra.mxu0 %v1039_v54  ;;  %2068 = vmatmul.f32.gmra.mxu2 %v997_v31  ;;  %v1005_v54 = vld [vmem:[%s5656_s3 + $0x70] sm:$0xff]  ;;  %v1298_v31 = vld [vmem:[%s5655_s4 + $0x198] sm:$0xff]  ;;  %v916_v17 = vadd.f32 %v3956_v63, %v468_v52  ;;  %v5717_v63 = vld [vmem:[#allocation12_spill] sm:$0xff] }
 0x1ca   :  { %2258 = vmatpush.msra.mxu3 %v990_v48  ;;  %1538 = vperm.xlu2 %3059, %v1292_v60   ;;  %v467_v60 = vmul.f32 %v3626_v33, %v5715_v53  ;;  %v5716_v48 = vld [vmem:[#allocation25_spill] sm:$0xff]  ;;  %v465_v22 = vmul.f32 %v3626_v33, %v5717_v63  ;;  %v1303_v25 = vld [vmem:[%s5655_s4 + $0x1c0] sm:$0xff]  ;;  %v1306_v53 = vld [vmem:[%s5655_s4 + $0x1d8] sm:$0xff] }
 0x1cb   :  { %1533 = vperm.xlu1 %3058, %v1291_v51   ;;  %1528 = vperm.xlu0 %3057, %v1290_v24   ;;  %v466_v51 = vmul.f32 %v3626_v33, %v5716_v48  ;;  %v1310_v63 = vld [vmem:[%s5655_s4 + $0x1f8] sm:$0xff] }
 0x1cc   :  { %2259 = vmatpush.msra.mxu3 %v989_v36  ;;  %v4063_v11 = vpop.permute.xlu2 %1373  ;;  %v915_v24 = vadd.f32 %v3848_v58, %v467_v60  ;;  %v980_v36 = vmax.f32 %v916_v17, 0.0  ;;  %v5718_v58 = vld [vmem:[#allocation21_spill] sm:$0xff]  ;;  %v913_v59 = vadd.f32 %v3924_v0, %v465_v22  ;;  %v1044_v17 = vld [vmem:[%s5656_s3 + $0x1a8] sm:$0xff] }
 0x1cd   :  { %v4068_v16 = vpop.permute.xlu1 %1323  ;;  %v4070_v1 = vpop.permute.xlu0 %1318  ;;  %v914_v62 = vadd.f32 %v3922_v61, %v466_v51  ;;  %v464_v37 = vmul.f32 %v3626_v33, %v5718_v58  ;;  %v1051_v61 = vld [vmem:[%s5656_s3 + $0x1e0] sm:$0xff]  ;;  %v1305_v60 = vld [vmem:[%s5655_s4 + $0x1d0] sm:$0xff] }
 0x1ce   :  { %2260 = vmatpush.msra.mxu3 %v988_v4  ;;  %v1063_v51 = vld [vmem:[%s5656_s3 + $0x240] sm:$0xff]  ;;  %v1309_v22 = vld [vmem:[%s5655_s4 + $0x1f0] sm:$0xff] }
 0x1cf   :  { %1880 = vmatmul.f32.gmra.mxu1 %v1024_v42  ;;  %v979_v42 = vmax.f32 %v915_v24, 0.0  ;;  %v912_v0 = vadd.f32 %v3826_v14, %v464_v37  ;;  %v1036_v14 = vld [vmem:[%s5656_s3 + $0x168] sm:$0xff]  ;;  %v1021_v24 = vld [vmem:[%s5656_s3 + $0xf0] sm:$0xff] }
 0x1d0   :  { %2261 = vmatpush.msra.mxu3 %v987_v47  ;;  %v1301_v47 = vld [vmem:[%s5655_s4 + $0x1b0] sm:$0xff] }
 0x1d1   :  { %1686 = vmatmul.f32.gmra.mxu0 %v1043_v12  ;;  %2071 = vmatmul.f32.gmra.mxu2 %v1001_v38  ;;  %v5719_v12 = vld [vmem:[#allocation22_spill] sm:$0xff] }
 0x1d2   :  { %2262 = vmatpush.msra.mxu3 %v986_v55  ;;  %1553 = vperm.xlu2 %3059, %v1295_v44   ;;  %v463_v38 = vmul.f32 %v3626_v33, %v5719_v12  ;;  %v978_v44 = vmax.f32 %v914_v62, 0.0  ;;  %v977_v55 = vmax.f32 %v913_v59, 0.0  ;;  %v976_v33 = vmax.f32 %v912_v0, 0.0  ;;  %v1308_v62 = vld [vmem:[%s5655_s4 + $0x1e8] sm:$0xff]  ;;  %v1067_v59 = vld [vmem:[%s5656_s3 + $0x260] sm:$0xff] }
 0x1d3   :  { %1548 = vperm.xlu1 %3058, %v1294_v34   ;;  %1543 = vperm.xlu0 %3057, %v1293_v20   ;;  %v2532_v12 = vld [vmem:[%s5657_s5 + $0x8] sm:$0xff] }
 0x1d4   :  { %2263 = vmatpush.msra.mxu3 %v985_v43  ;;  %v4099_v40 = vpop.permute.xlu2 %1388  ;;  %v911_v9 = vadd.f32 %v3893_v10, %v463_v38  ;;  %v1055_v10 = vld [vmem:[%s5656_s3 + $0x200] sm:$0xff]  ;;  %v1013_v43 = vld [vmem:[%s5656_s3 + $0xb0] sm:$0xff]  ;;  %v1052_v0 = vld [vmem:[%s5656_s3 + $0x1e8] sm:$0xff] }
 0x1d5   :  { %v4104_v5 = vpop.permute.xlu1 %1338  ;;  %v4106_v30 = vpop.permute.xlu0 %1333  ;;  %v2531_v38 = vld [vmem:[%s5657_s5] sm:$0xff] }
 0x1d6   :  { %2264 = vmatpush.msra.mxu3 %v984_v6  ;;  %v975_v45 = vmax.f32 %v911_v9, 0.0  ;;  %v1302_v6 = vld [vmem:[%s5655_s4 + $0x1b8] sm:$0xff] }
 0x1d7   :  { %1883 = vmatmul.f32.gmra.mxu1 %v1028_v28  ;;  %v1040_v28 = vld [vmem:[%s5656_s3 + $0x188] sm:$0xff] }
 0x1d8   :  { %2265 = vmatpush.msra.mxu3 %v983_v29  ;;  %v1059_v29 = vld [vmem:[%s5656_s3 + $0x220] sm:$0xff] }
 0x1d9   :  { %1689 = vmatmul.f32.gmra.mxu0 %v1047_v13  ;;  %2074 = vmatmul.f32.gmra.mxu2 %v1005_v54  ;;  %v1017_v13 = vld [vmem:[%s5656_s3 + $0xd0] sm:$0xff]  ;;  %v998_v54 = vld [vmem:[%s5656_s3 + $0x38] sm:$0xff] }
 0x1da   :  { %2266 = vmatpush.msra.mxu3 %v982_v26  ;;  %1568 = vperm.xlu2 %3059, %v1298_v31   ;;  %v1307_v31 = vld [vmem:[%s5655_s4 + $0x1e0] sm:$0xff] }
 0x1db   :  { %1563 = vperm.xlu1 %3058, %v1297_v18   ;;  %1558 = vperm.xlu0 %3057, %v1296_v3  }
 0x1dc   :  { %2267 = vmatpush.msra.mxu3 %v981_v49  ;;  %v4145_v32 = vpop.permute.xlu2 %1403  ;;  %v1002_v49 = vld [vmem:[%s5656_s3 + $0x58] sm:$0xff] }
 0x1dd   :  { %v4138_v23 = vpop.permute.xlu1 %1353  ;;  %v4140_v4 = vpop.permute.xlu0 %1348 }
 0x1de   :  { %2268 = vmatpush.msra.mxu3 %v980_v36 }
 0x1df   :  { %1886 = vmatmul.f32.gmra.mxu1 %v1032_v39  ;;  %v1048_v39 = vld [vmem:[%s5656_s3 + $0x1c8] sm:$0xff] }
 0x1e0   :  { %2269 = vmatpush.msra.mxu3 %v979_v42 }
 0x1e1   :  { %1692 = vmatmul.f32.gmra.mxu0 %v1051_v61  ;;  %2077 = vmatmul.f32.gmra.mxu2 %v1009_v7  ;;  %v1025_v61 = vld [vmem:[%s5656_s3 + $0x110] sm:$0xff]  ;;  %v1006_v7 = vld [vmem:[%s5656_s3 + $0x78] sm:$0xff] }
 0x1e2   :  { %2270 = vmatpush.msra.mxu3 %v978_v44  ;;  %1583 = vperm.xlu2 %3059, %v1301_v47   ;;  %v2533_v47 = vld [vmem:[%s5657_s5 + $0x10] sm:$0xff] }
 0x1e3   :  { %1578 = vperm.xlu1 %3058, %v1300_v56   ;;  %1573 = vperm.xlu0 %3057, %v1299_v15  }
 0x1e4   :  { %2271 = vmatpush.msra.mxu3 %v977_v55  ;;  %v4187_v46 = vpop.permute.xlu2 %1418  ;;  %v1071_v55 = vld [vmem:[%s5656_s3 + $0x280] sm:$0xff] }
 0x1e5   :  { %v4169_v34 = vpop.permute.xlu1 %1368  ;;  %v4171_v20 = vpop.permute.xlu0 %1363 }
 0x1e6   :  { %v4173_v57 = vpop.f32.mrf.mxu0  ;;  %2272 = vmatpush.msra.mxu3 %v976_v33  ;;  %v1029_v33 = vld [vmem:[%s5656_s3 + $0x130] sm:$0xff] }
 0x1e7   :  { %1889 = vmatmul.f32.gmra.mxu1 %v1036_v14  ;;  %v1010_v14 = vld [vmem:[%s5656_s3 + $0x98] sm:$0xff] }
 0x1e8   :  { %2273 = vmatpush.msra.mxu3 %v975_v45  ;;  %v2536_v45 = vld [vmem:[%s5657_s5 + $0x28] sm:$0xff] }
 0x1e9   :  { %1695 = vmatmul.f32.gmra.mxu0 %v1055_v10  ;;  %2080 = vmatmul.f32.gmra.mxu2 %v1013_v43  ;;  %v2535_v10 = vld [vmem:[%s5657_s5 + $0x20] sm:$0xff]  ;;  %v2534_v43 = vld [vmem:[%s5657_s5 + $0x18] sm:$0xff] }
 0x1ea   :  { %2274 = vmatmul.f32.vlgmr.msra.gmra.mxu3 %v994_v2  ;;  %1598 = vperm.xlu2 %3059, %v1304_v41   ;;  %v1056_v41 = vld [vmem:[%s5656_s3 + $0x208] sm:$0xff] }
 0x1eb   :  { %1593 = vperm.xlu1 %3058, %v1303_v25   ;;  %1588 = vperm.xlu0 %3057, %v1302_v6  }
 0x1ec   :  { %v4222_v26 = vpop.permute.xlu2 %1433 }
 0x1ed   :  { %v4198_v21 = vpop.permute.xlu1 %1383  ;;  %v4200_v52 = vpop.permute.xlu0 %1378  ;;  %5720 = vst [vmem:[#allocation19_spill] sm:$0xff] %v4222_v26 }
 0x1ee   :  { %v4202_v8 = vpop.f32.mrf.mxu0 }
 0x1ef   :  { %1892 = vmatmul.f32.gmra.mxu1 %v1040_v28 }
 0x1f1   :  { %1698 = vmatmul.f32.gmra.mxu0 %v1059_v29  ;;  %2083 = vmatmul.f32.gmra.mxu2 %v1017_v13  ;;  %v1075_v29 = vld [vmem:[%s5656_s3 + $0x2a0] sm:$0xff]  ;;  %v1033_v13 = vld [vmem:[%s5656_s3 + $0x150] sm:$0xff] }
 0x1f2   :  { %2277 = vmatmul.f32.gmra.mxu3 %v998_v54  ;;  %1613 = vperm.xlu2 %3059, %v1307_v31   ;;  %v1014_v54 = vld [vmem:[%s5656_s3 + $0xb8] sm:$0xff]  ;;  %v2539_v31 = vld [vmem:[%s5657_s5 + $0x40] sm:$0xff] }
 0x1f3   :  { %1608 = vperm.xlu1 %3058, %v1306_v53   ;;  %1603 = vperm.xlu0 %3057, %v1305_v60   ;;  %v2538_v60 = vld [vmem:[%s5657_s5 + $0x38] sm:$0xff] }
 0x1f4   :  { %v4251_v36 = vpop.permute.xlu2 %1448 }
 0x1f5   :  { %v4227_v18 = vpop.permute.xlu1 %1398  ;;  %v4229_v3 = vpop.permute.xlu0 %1393  ;;  %5721 = vst [vmem:[#allocation7_spill] sm:$0xff] %v4251_v36 }
 0x1f6   :  { %v4231_v48 = vpop.f32.mrf.mxu0 }
 0x1f7   :  { %1895 = vmatmul.f32.gmra.mxu1 %v1044_v17  ;;  %v2537_v17 = vld [vmem:[%s5657_s5 + $0x30] sm:$0xff] }
 0x1f9   :  { %1701 = vmatmul.f32.gmra.mxu0 %v1063_v51  ;;  %2086 = vmatmul.f32.gmra.mxu2 %v1021_v24  ;;  %v1060_v24 = vld [vmem:[%s5656_s3 + $0x228] sm:$0xff] }
 0x1fa   :  { %2280 = vmatmul.f32.gmra.mxu3 %v1002_v49  ;;  %1628 = vperm.xlu2 %3059, %v1310_v63  }
 0x1fb   :  { %1623 = vperm.xlu1 %3058, %v1309_v22   ;;  %1618 = vperm.xlu0 %3057, %v1308_v62   ;;  %v1079_v62 = vld [vmem:[%s5656_s3 + $0x2c0] sm:$0xff] }
 0x1fc   :  { %v4287_v15 = vpop.permute.xlu2 %1463 }
 0x1fd   :  { %v4256_v58 = vpop.permute.xlu1 %1413  ;;  %v4258_v37 = vpop.permute.xlu0 %1408  ;;  %5723 = vst [vmem:[#allocation17_spill] sm:$0xff] %v4287_v15 }
 0x1fe   :  { %v4260_v42 = vpop.f32.mrf.mxu0 }
 0x1ff   :  { %1898 = vmatmul.f32.gmra.mxu1 %v1048_v39  ;;  %v1037_v39 = vld [vmem:[%s5656_s3 + $0x170] sm:$0xff] }
 0x201   :  { %1704 = vmatmul.f32.gmra.mxu0 %v1067_v59  ;;  %2089 = vmatmul.f32.gmra.mxu2 %v1025_v61  ;;  %v1018_v59 = vld [vmem:[%s5656_s3 + $0xd8] sm:$0xff] }
 0x202   :  { %2283 = vmatmul.f32.gmra.mxu3 %v1006_v7  ;;  %2607 = vperm.xlu2 %3059, %v2533_v47   ;;  %v2542_v61 = vld [vmem:[%s5657_s5 + $0x58] sm:$0xff]  ;;  %v2541_v7 = vld [vmem:[%s5657_s5 + $0x50] sm:$0xff]  ;;  %v2540_v47 = vld [vmem:[%s5657_s5 + $0x48] sm:$0xff] }
 0x203   :  { %2602 = vperm.xlu1 %3058, %v2532_v12   ;;  %2597 = vperm.xlu0 %3057, %v2531_v38  }
 0x204   :  { %v4332_v53 = vpop.permute.xlu2 %1478 }
 0x205   :  { %v4283_v44 = vpop.permute.xlu1 %1428  ;;  %v4285_v56 = vpop.permute.xlu0 %1423  ;;  %5726 = vst [vmem:[#allocation14_spill] sm:$0xff] %v4332_v53 }
 0x206   :  { %5722 = vst [vmem:[#allocation16_spill] sm:$0xff] %v4283_v44  ;;  %v4289_v9 = vpop.f32.mrf.mxu0  ;;  %v1112_v44 = vld [vmem:[%s5656_s3 + $0x3c8] sm:$0xff] }
 0x207   :  { %1901 = vmatmul.f32.gmra.mxu1 %v1052_v0  ;;  %v1064_v0 = vld [vmem:[%s5656_s3 + $0x248] sm:$0xff] }
 0x209   :  { %1707 = vmatmul.f32.gmra.mxu0 %v1071_v55  ;;  %2092 = vmatmul.f32.gmra.mxu2 %v1029_v33 }
 0x20a   :  { %2286 = vmatmul.f32.gmra.mxu3 %v1010_v14  ;;  %2622 = vperm.xlu2 %3059, %v2536_v45   ;;  %v1083_v45 = vld [vmem:[%s5656_s3 + $0x2e0] sm:$0xff] }
 0x20b   :  { %2617 = vperm.xlu1 %3058, %v2535_v10   ;;  %2612 = vperm.xlu0 %3057, %v2534_v43   ;;  %v1041_v10 = vld [vmem:[%s5656_s3 + $0x190] sm:$0xff]  ;;  %v1022_v43 = vld [vmem:[%s5656_s3 + $0xf8] sm:$0xff] }
 0x20c   :  { %v4309_v2 = vpop.f32.mrf.mxu1  ;;  %v4369_v12 = vpop.permute.xlu2 %1493 }
 0x20d   :  { %v4314_v25 = vpop.permute.xlu1 %1443  ;;  %v4316_v6 = vpop.permute.xlu0 %1438  ;;  %5729 = vst [vmem:[#allocation11_spill] sm:$0xff] %v4369_v12 }
 0x20e   :  { %5724 = vst [vmem:[#allocation6_spill] sm:$0xff] %v4314_v25  ;;  %v4318_v28 = vpop.f32.mrf.mxu0 }
 0x20f   :  { %5725 = vst [vmem:[#allocation13_spill] sm:$0xff] %v4316_v6  ;;  %1904 = vmatmul.f32.gmra.mxu1 %v1056_v41  ;;  %v2545_v41 = vld [vmem:[%s5657_s5 + $0x70] sm:$0xff] }
 0x211   :  { %1710 = vmatmul.f32.gmra.mxu0 %v1075_v29  ;;  %2095 = vmatmul.f32.gmra.mxu2 %v1033_v13  ;;  %v2544_v29 = vld [vmem:[%s5657_s5 + $0x68] sm:$0xff]  ;;  %v2543_v13 = vld [vmem:[%s5657_s5 + $0x60] sm:$0xff] }
 0x212   :  { %2289 = vmatmul.f32.gmra.mxu3 %v1014_v54  ;;  %2637 = vperm.xlu2 %3059, %v2539_v31  }
 0x213   :  { %2632 = vperm.xlu1 %3058, %v2538_v60   ;;  %2627 = vperm.xlu0 %3057, %v2537_v17   ;;  %v1068_v60 = vld [vmem:[%s5656_s3 + $0x268] sm:$0xff] }
 0x214   :  { %v4340_v51 = vpop.f32.mrf.mxu1  ;;  %v4400_v54 = vpop.permute.xlu2 %1508 }
 0x215   :  { %v4345_v49 = vpop.permute.xlu1 %1458  ;;  %v4347_v63 = vpop.permute.xlu0 %1453  ;;  %5732 = vst [vmem:[#allocation9_spill] sm:$0xff] %v4400_v54 }
 0x216   :  { %5727 = vst [vmem:[#allocation5_spill] sm:$0xff] %v4345_v49  ;;  %v4349_v22 = vpop.f32.mrf.mxu0  ;;  %v1100_v49 = vld [vmem:[%s5656_s3 + $0x368] sm:$0xff] }
 0x217   :  { %5728 = vst [vmem:[#allocation10_spill] sm:$0xff] %v4347_v63  ;;  %1907 = vmatmul.f32.gmra.mxu1 %v1060_v24 }
 0x219   :  { %1713 = vmatmul.f32.gmra.mxu0 %v1079_v62  ;;  %2098 = vmatmul.f32.gmra.mxu2 %v1037_v39  ;;  %v1087_v39 = vld [vmem:[%s5656_s3 + $0x300] sm:$0xff] }
 0x21a   :  { %2292 = vmatmul.f32.gmra.mxu3 %v1018_v59  ;;  %2652 = vperm.xlu2 %3059, %v2542_v61   ;;  %v1045_v59 = vld [vmem:[%s5656_s3 + $0x1b0] sm:$0xff]  ;;  %v1026_v61 = vld [vmem:[%s5656_s3 + $0x118] sm:$0xff] }
 0x21b   :  { %2647 = vperm.xlu1 %3058, %v2541_v7   ;;  %2642 = vperm.xlu0 %3057, %v2540_v47   ;;  %v2548_v7 = vld [vmem:[%s5657_s5 + $0x88] sm:$0xff]  ;;  %v2547_v47 = vld [vmem:[%s5657_s5 + $0x80] sm:$0xff] }
 0x21c   :  { %v4371_v38 = vpop.f32.mrf.mxu1 }
 0x21d   :  { %v4376_v55 = vpop.permute.xlu1 %1473  ;;  %v4378_v33 = vpop.permute.xlu0 %1468 }
 0x21e   :  { %5730 = vst [vmem:[#allocation4_spill] sm:$0xff] %v4376_v55  ;;  %v4380_v14 = vpop.f32.mrf.mxu0 }
 0x21f   :  { %5731 = vst [vmem:[#allocation8_spill] sm:$0xff] %v4378_v33  ;;  %1910 = vmatmul.f32.gmra.mxu1 %v1064_v0  ;;  %v2546_v0 = vld [vmem:[%s5657_s5 + $0x78] sm:$0xff] }
 0x221   :  { %1716 = vmatmul.f32.gmra.mxu0 %v1083_v45  ;;  %2101 = vmatmul.f32.gmra.mxu2 %v1041_v10  ;;  %v1072_v10 = vld [vmem:[%s5656_s3 + $0x288] sm:$0xff] }
 0x222   :  { %2295 = vmatmul.f32.gmra.mxu3 %v1022_v43  ;;  %2667 = vperm.xlu2 %3059, %v2545_v41  }
 0x223   :  { %2662 = vperm.xlu1 %3058, %v2544_v29   ;;  %2657 = vperm.xlu0 %3057, %v2543_v13   ;;  %v1091_v13 = vld [vmem:[%s5656_s3 + $0x320] sm:$0xff] }
 0x224   :  { %v4402_v31 = vpop.f32.mrf.mxu1 }
 0x225   :  { %v4407_v17 = vpop.permute.xlu1 %1488  ;;  %v4409_v24 = vpop.permute.xlu0 %1483 }
 0x226   :  { %5733 = vst [vmem:[#allocation3_spill] sm:$0xff] %v4407_v17  ;;  %v4411_v62 = vpop.f32.mrf.mxu0  ;;  %v1080_v17 = vld [vmem:[%s5656_s3 + $0x2c8] sm:$0xff] }
 0x227   :  { %5734 = vst [vmem:[#allocation23_spill] sm:$0xff] %v4409_v24  ;;  %1913 = vmatmul.f32.gmra.mxu1 %v1068_v60  ;;  %v1049_v60 = vld [vmem:[%s5656_s3 + $0x1d0] sm:$0xff] }
 0x229   :  { %1719 = vmatmul.f32.gmra.mxu0 %v1087_v39  ;;  %2104 = vmatmul.f32.gmra.mxu2 %v1045_v59  ;;  %v4448_v39 = vpop.permute.xlu2 %1523  ;;  %v1030_v59 = vld [vmem:[%s5656_s3 + $0x138] sm:$0xff] }
 0x22a   :  { %2298 = vmatmul.f32.gmra.mxu3 %v1026_v61  ;;  %2682 = vperm.xlu2 %3059, %v2548_v7   ;;  %5737 = vst [vmem:[#allocation31_spill] sm:$0xff] %v4448_v39  ;;  %v2551_v61 = vld [vmem:[%s5657_s5 + $0xa0] sm:$0xff]  ;;  %v2550_v7 = vld [vmem:[%s5657_s5 + $0x98] sm:$0xff]  ;;  %v1084_v39 = vld [vmem:[%s5656_s3 + $0x2e8] sm:$0xff] }
 0x22b   :  { %2677 = vperm.xlu1 %3058, %v2547_v47   ;;  %2672 = vperm.xlu0 %3057, %v2546_v0   ;;  %v2549_v47 = vld [vmem:[%s5657_s5 + $0x90] sm:$0xff] }
 0x22c   :  { %v4431_v45 = vpop.f32.mrf.mxu1 }
 0x22d   :  { %v4436_v43 = vpop.permute.xlu1 %1503  ;;  %v4438_v41 = vpop.permute.xlu0 %1498 }
 0x22e   :  { %5735 = vst [vmem:[#allocation32_spill] sm:$0xff] %v4436_v43  ;;  %v4440_v29 = vpop.f32.mrf.mxu0 }
 0x22f   :  { %5736 = vst [vmem:[#allocation30_spill] sm:$0xff] %v4438_v41  ;;  %1916 = vmatmul.f32.gmra.mxu1 %v1072_v10  ;;  %v1076_v10 = vld [vmem:[%s5656_s3 + $0x2a8] sm:$0xff] }
 0x231   :  { %1722 = vmatmul.f32.gmra.mxu0 %v1091_v13  ;;  %2107 = vmatmul.f32.gmra.mxu2 %v1049_v60  ;;  %v1095_v13 = vld [vmem:[%s5656_s3 + $0x340] sm:$0xff]  ;;  %v1053_v60 = vld [vmem:[%s5656_s3 + $0x1f0] sm:$0xff]  ;;  %v4491_v12 = vpop.permute.xlu2 %1538 }
 0x232   :  { %2301 = vmatmul.f32.gmra.mxu3 %v1030_v59  ;;  %2697 = vperm.xlu2 %3059, %v2551_v61   ;;  %v1034_v59 = vld [vmem:[%s5656_s3 + $0x158] sm:$0xff]  ;;  %5740 = vst [vmem:[#allocation29_spill] sm:$0xff] %v4491_v12  ;;  %v1649_v12 = vadd.f32 %v4173_v57, %v3949_v35 }
 0x233   :  { %2692 = vperm.xlu1 %3058, %v2550_v7   ;;  %2687 = vperm.xlu0 %3057, %v2549_v47   ;;  %v2554_v61 = vld [vmem:[%s5657_s5 + $0xb8] sm:$0xff]  ;;  %v2553_v7 = vld [vmem:[%s5657_s5 + $0xb0] sm:$0xff]  ;;  %v2552_v47 = vld [vmem:[%s5657_s5 + $0xa8] sm:$0xff] }
 0x234   :  { %v4462_v0 = vpop.f32.mrf.mxu1 }
 0x235   :  { %v4467_v54 = vpop.permute.xlu1 %1518  ;;  %v4469_v43 = vpop.permute.xlu0 %1513 }
 0x236   :  { %5738 = vst [vmem:[#allocation20_spill] sm:$0xff] %v4467_v54  ;;  %v4471_v41 = vpop.f32.mrf.mxu0 }
 0x237   :  { %5739 = vst [vmem:[#allocation28_spill] sm:$0xff] %v4469_v43  ;;  %1919 = vmatmul.f32.gmra.mxu1 %v1076_v10 }
 0x239   :  { %1725 = vmatmul.f32.gmra.mxu0 %v1095_v13  ;;  %2110 = vmatmul.f32.gmra.mxu2 %v1053_v60  ;;  %v1099_v13 = vld [vmem:[%s5656_s3 + $0x360] sm:$0xff]  ;;  %v1057_v60 = vld [vmem:[%s5656_s3 + $0x210] sm:$0xff] }
 0x23a   :  { %2304 = vmatmul.f32.gmra.mxu3 %v1034_v59  ;;  %2712 = vperm.xlu2 %3059, %v2554_v61   ;;  %v1038_v59 = vld [vmem:[%s5656_s3 + $0x178] sm:$0xff]  ;;  %v2557_v61 = vld [vmem:[%s5657_s5 + $0xd0] sm:$0xff] }
 0x23b   :  { %2707 = vperm.xlu1 %3058, %v2553_v7   ;;  %2702 = vperm.xlu0 %3057, %v2552_v47   ;;  %v2556_v7 = vld [vmem:[%s5657_s5 + $0xc8] sm:$0xff]  ;;  %v2555_v47 = vld [vmem:[%s5657_s5 + $0xc0] sm:$0xff] }
 0x23c   :  { %v4493_v10 = vpop.f32.mrf.mxu1 }
 0x23d   :  { %v4498_v24 = vpop.permute.xlu1 %1533  ;;  %v4500_v53 = vpop.permute.xlu0 %1528 }
 0x23e   :  { %5741 = vst [vmem:[#allocation18_spill] sm:$0xff] %v4498_v24  ;;  %v4502_v55 = vpop.f32.mrf.mxu0  ;;  %v4525_v24 = vpop.permute.xlu2 %1553 }
 0x23f   :  { %5742 = vst [vmem:[#allocation26_spill] sm:$0xff] %v4500_v53  ;;  %1922 = vmatmul.f32.gmra.mxu1 %v1080_v17  ;;  %v1858_v17 = vadd.f32 %v4309_v2, %v1649_v12  ;;  %v1103_v2 = vld [vmem:[%s5656_s3 + $0x380] sm:$0xff]  ;;  %v1061_v12 = vld [vmem:[%s5656_s3 + $0x230] sm:$0xff] }
 0x240   :  { %5743 = vst [vmem:[#allocation27_spill] sm:$0xff] %v4525_v24  ;;  %v1088_v24 = vld [vmem:[%s5656_s3 + $0x308] sm:$0xff] }
 0x241   :  { %1728 = vmatmul.f32.gmra.mxu0 %v1099_v13  ;;  %2113 = vmatmul.f32.gmra.mxu2 %v1057_v60  ;;  %v2560_v60 = vld [vmem:[%s5657_s5 + $0xe8] sm:$0xff] }
 0x242   :  { %2307 = vmatmul.f32.gmra.mxu3 %v1038_v59  ;;  %2727 = vperm.xlu2 %3059, %v2557_v61   ;;  %v2559_v59 = vld [vmem:[%s5657_s5 + $0xe0] sm:$0xff]  ;;  %v2558_v61 = vld [vmem:[%s5657_s5 + $0xd8] sm:$0xff] }
 0x243   :  { %2722 = vperm.xlu1 %3058, %v2556_v7   ;;  %2717 = vperm.xlu0 %3057, %v2555_v47   ;;  %v1652_v7 = vadd.f32 %v4202_v8, %v4070_v1 }
 0x244   :  { %v4527_v53 = vpop.f32.mrf.mxu1  ;;  %v2066_v33 = vpop.f32.mrf.mxu2 }
 0x245   :  { %v4532_v15 = vadd.f32 %v2066_v33, %v1858_v17  ;;  %v4534_v35 = vpop.permute.xlu1 %1548  ;;  %v4536_v57 = vpop.permute.xlu0 %1543  ;;  %v1042_v33 = vld [vmem:[%s5656_s3 + $0x198] sm:$0xff] }
 0x246   :  { %5744 = vst [vmem:[#allocation15_spill] sm:$0xff] %v4534_v35  ;;  %v4538_v13 = vpop.f32.mrf.mxu0  ;;  %v4566_v35 = vpop.permute.xlu2 %1568 }
 0x247   :  { %5745 = vst [vmem:[#allocation24_spill] sm:$0xff] %v4536_v57  ;;  %1925 = vmatmul.f32.gmra.mxu1 %v1084_v39  ;;  %v1861_v39 = vadd.f32 %v4340_v51, %v1652_v7  ;;  %v1107_v51 = vld [vmem:[%s5656_s3 + $0x3a0] sm:$0xff]  ;;  %v1655_v7 = vadd.f32 %v4231_v48, %v4068_v16 }
 0x248   :  { %5746 = vst [vmem:[#allocation25_spill] sm:$0xff] %v4566_v35  ;;  %v1092_v35 = vld [vmem:[%s5656_s3 + $0x328] sm:$0xff] }
 0x249   :  { %1731 = vmatmul.f32.gmra.mxu0 %v1103_v2  ;;  %2116 = vmatmul.f32.gmra.mxu2 %v1061_v12  ;;  %v1065_v12 = vld [vmem:[%s5656_s3 + $0x250] sm:$0xff] }
 0x24a   :  { %2310 = vmatmul.f32.gmra.mxu3 %v1042_v33  ;;  %2742 = vperm.xlu2 %3059, %v2560_v60   ;;  %v1046_v33 = vld [vmem:[%s5656_s3 + $0x1b8] sm:$0xff]  ;;  %v2563_v60 = vld [vmem:[%s5657_s5 + $0x100] sm:$0xff] }
 0x24b   :  { %2737 = vperm.xlu1 %3058, %v2559_v59   ;;  %2732 = vperm.xlu0 %3057, %v2558_v61   ;;  %v2562_v59 = vld [vmem:[%s5657_s5 + $0xf8] sm:$0xff]  ;;  %v2561_v61 = vld [vmem:[%s5657_s5 + $0xf0] sm:$0xff] }
 0x24c   :  { %v4561_v47 = vpop.f32.mrf.mxu1  ;;  %v2069_v17 = vpop.f32.mrf.mxu2 }
 0x24d   :  { %v4568_v57 = vadd.f32 %v2069_v17, %v1861_v39  ;;  %v4570_v1 = vpop.permute.xlu1 %1563  ;;  %v4572_v8 = vpop.permute.xlu0 %1558 }
 0x24e   :  { %5747 = vst [vmem:[#allocation12_spill] sm:$0xff] %v4570_v1  ;;  %v4574_v2 = vpop.f32.mrf.mxu0 }
 0x24f   :  { %5748 = vst [vmem:[#allocation21_spill] sm:$0xff] %v4572_v8  ;;  %1928 = vmatmul.f32.gmra.mxu1 %v1088_v24  ;;  %v1864_v24 = vadd.f32 %v4371_v38, %v1655_v7  ;;  %v1111_v38 = vld [vmem:[%s5656_s3 + $0x3c0] sm:$0xff] }
 0x251   :  { %1734 = vmatmul.f32.gmra.mxu0 %v1107_v51  ;;  %2119 = vmatmul.f32.gmra.mxu2 %v1065_v12  ;;  %v1069_v51 = vld [vmem:[%s5656_s3 + $0x270] sm:$0xff]  ;;  %v4616_v12 = vpop.permute.xlu2 %1583 }
 0x252   :  { %2313 = vmatmul.f32.gmra.mxu3 %v1046_v33  ;;  %2757 = vperm.xlu2 %3059, %v2563_v60   ;;  %5751 = vst [vmem:[#allocation34_spill] sm:$0xff] %v4616_v12  ;;  %v1050_v33 = vld [vmem:[%s5656_s3 + $0x1d8] sm:$0xff] }
 0x253   :  { %2752 = vperm.xlu1 %3058, %v2562_v59   ;;  %2747 = vperm.xlu0 %3057, %v2561_v61   ;;  %v2566_v60 = vld [vmem:[%s5657_s5 + $0x118] sm:$0xff]  ;;  %v2565_v59 = vld [vmem:[%s5657_s5 + $0x110] sm:$0xff]  ;;  %v2564_v61 = vld [vmem:[%s5657_s5 + $0x108] sm:$0xff] }
 0x254   :  { %v4597_v39 = vpop.f32.mrf.mxu1  ;;  %v2072_v17 = vpop.f32.mrf.mxu2 }
 0x255   :  { %v4602_v1 = vadd.f32 %v2072_v17, %v1864_v24  ;;  %v4604_v8 = vpop.permute.xlu1 %1578  ;;  %v4606_v16 = vpop.permute.xlu0 %1573  ;;  %v1096_v24 = vld [vmem:[%s5656_s3 + $0x348] sm:$0xff] }
 0x256   :  { %5749 = vst [vmem:[#allocation22_spill] sm:$0xff] %v4604_v8  ;;  %v4608_v48 = vpop.f32.mrf.mxu0 }
 0x257   :  { %5750 = vst [vmem:[#allocation33_spill] sm:$0xff] %v4606_v16  ;;  %1931 = vmatmul.f32.gmra.mxu1 %v1092_v35 }
 0x259   :  { %1737 = vmatmul.f32.gmra.mxu0 %v1111_v38  ;;  %2122 = vmatmul.f32.gmra.mxu2 %v1069_v51  ;;  %v1115_v38 = vld [vmem:[%s5656_s3 + $0x3e0] sm:$0xff]  ;;  %v1073_v51 = vld [vmem:[%s5656_s3 + $0x290] sm:$0xff] }
 0x25a   :  { %2316 = vmatmul.f32.gmra.mxu3 %v1050_v33  ;;  %2772 = vperm.xlu2 %3059, %v2566_v60   ;;  %v1054_v33 = vld [vmem:[%s5656_s3 + $0x1f8] sm:$0xff]  ;;  %v2569_v60 = vld [vmem:[%s5657_s5 + $0x130] sm:$0xff] }
 0x25b   :  { %2767 = vperm.xlu1 %3058, %v2565_v59   ;;  %2762 = vperm.xlu0 %3057, %v2564_v61   ;;  %v2568_v59 = vld [vmem:[%s5657_s5 + $0x128] sm:$0xff]  ;;  %v2567_v61 = vld [vmem:[%s5657_s5 + $0x120] sm:$0xff] }
 0x25c   :  { %v4630_v35 = vpop.f32.mrf.mxu1  ;;  %v4632_v7 = vpop.f32.mrf.mxu2 }
 0x25d   :  { %v4637_v17 = vpop.permute.xlu1 %1593  ;;  %v4639_v12 = vpop.permute.xlu0 %1588 }
 0x25e   :  { %5752 = vst [vmem:[#allocation35_spill] sm:$0xff] %v4637_v17  ;;  %v4641_v8 = vpop.f32.mrf.mxu0  ;;  %v1661_v17 = vadd.f32 %v4289_v9, %v4106_v30 }
 0x25f   :  { %5753 = vst [vmem:[#allocation36_spill] sm:$0xff] %v4639_v12  ;;  %1934 = vmatmul.f32.gmra.mxu1 %v1096_v24  ;;  %v4663_v24 = vpop.permute.xlu2 %1598 }
 0x260   :  { %5754 = vst [vmem:[#allocation37_spill] sm:$0xff] %v4663_v24  ;;  %v1870_v12 = vadd.f32 %v4431_v45, %v1661_v17  ;;  %v1119_v45 = vld [vmem:[%s5656_s3 + $0x400] sm:$0xff]  ;;  %v1077_v17 = vld [vmem:[%s5656_s3 + $0x2b0] sm:$0xff] }
 0x261   :  { %1740 = vmatmul.f32.gmra.mxu0 %v1115_v38  ;;  %2125 = vmatmul.f32.gmra.mxu2 %v1073_v51  ;;  %v2571_v51 = vld [vmem:[%s5657_s5 + $0x140] sm:$0xff] }
 0x262   :  { %2319 = vmatmul.f32.gmra.mxu3 %v1054_v33  ;;  %2787 = vperm.xlu2 %3059, %v2569_v60   ;;  %v2570_v33 = vld [vmem:[%s5657_s5 + $0x138] sm:$0xff]  ;;  %v1664_v60 = vadd.f32 %v4318_v28, %v4104_v5 }
 0x263   :  { %2782 = vperm.xlu1 %3058, %v2568_v59   ;;  %2777 = vperm.xlu0 %3057, %v2567_v61  }
 0x264   :  { %v4666_v16 = vpop.f32.mrf.mxu1  ;;  %v2078_v54 = vpop.f32.mrf.mxu2 }
 0x265   :  { %v4671_v43 = vadd.f32 %v2078_v54, %v1870_v12  ;;  %v4673_v30 = vpop.permute.xlu1 %1608  ;;  %v4675_v9 = vpop.permute.xlu0 %1603  ;;  %v1058_v54 = vld [vmem:[%s5656_s3 + $0x218] sm:$0xff]  ;;  %v2572_v12 = vld [vmem:[%s5657_s5 + $0x148] sm:$0xff] }
 0x266   :  { %5755 = vst [vmem:[#allocation38_spill] sm:$0xff] %v4673_v30  ;;  %v4677_v38 = vpop.f32.mrf.mxu0 }
 0x267   :  { %5756 = vst [vmem:[#allocation39_spill] sm:$0xff] %v4675_v9  ;;  %1937 = vmatmul.f32.gmra.mxu1 %v1100_v49  ;;  %v1873_v49 = vadd.f32 %v4462_v0, %v1664_v60  ;;  %v4700_v59 = vpop.permute.xlu2 %1613  ;;  %v1104_v9 = vld [vmem:[%s5656_s3 + $0x388] sm:$0xff]  ;;  %v1123_v0 = vld [vmem:[%s5656_s3 + $0x420] sm:$0xff] }
 0x268   :  { %5757 = vst [vmem:[#allocation40_spill] sm:$0xff] %v4700_v59  ;;  %v2576_v59 = vld [vmem:[%s5657_s5 + $0x168] sm:$0xff] }
 0x269   :  { %1743 = vmatmul.f32.gmra.mxu0 %v1119_v45  ;;  %2128 = vmatmul.f32.gmra.mxu2 %v1077_v17  ;;  %v1081_v17 = vld [vmem:[%s5656_s3 + $0x2d0] sm:$0xff] }
 0x26a   :  { %2322 = vmatmul.f32.gmra.mxu3 %v1058_v54  ;;  %2802 = vperm.xlu2 %3059, %v2572_v12  }
 0x26b   :  { %2797 = vperm.xlu1 %3058, %v2571_v51   ;;  %2792 = vperm.xlu0 %3057, %v2570_v33   ;;  %v2574_v51 = vld [vmem:[%s5657_s5 + $0x158] sm:$0xff]  ;;  %v2573_v33 = vld [vmem:[%s5657_s5 + $0x150] sm:$0xff] }
 0x26c   :  { %v4702_v61 = vpop.f32.mrf.mxu1  ;;  %v2081_v30 = vpop.f32.mrf.mxu2 }
 0x26d   :  { %v4707_v24 = vadd.f32 %v2081_v30, %v1873_v49  ;;  %v2275_v5 = vpop.f32.mrf.mxu3  ;;  %v4710_v45 = vpop.permute.xlu0 %1618  ;;  %v1062_v30 = vld [vmem:[%s5656_s3 + $0x238] sm:$0xff]  ;;  %v1108_v49 = vld [vmem:[%s5656_s3 + $0x3a8] sm:$0xff] }
 0x26e   :  { %v2276_v28 = vadd.f32 %v2275_v5, %v4532_v15  ;;  %5758 = vst [vmem:[#allocation41_spill] sm:$0xff] %v4710_v45  ;;  %v4718_v54 = vpop.permute.xlu1 %1623  ;;  %v4720_v12 = vpop.f32.mrf.mxu0  ;;  %v2575_v15 = vld [vmem:[%s5657_s5 + $0x160] sm:$0xff] }
 0x26f   :  { %5759 = vst [vmem:[#allocation42_spill] sm:$0xff] %v4718_v54  ;;  %1940 = vmatmul.f32.gmra.mxu1 %v1104_v9  ;;  %v4741_v54 = vpop.permute.xlu2 %1628 }
 0x270   :  { %5760 = vst [vmem:[#allocation43_spill] sm:$0xff] %v4741_v54  ;;  %v2577_v54 = vld [vmem:[%s5657_s5 + $0x170] sm:$0xff] }
 0x271   :  { %1746 = vmatmul.f32.gmra.mxu0 %v1123_v0  ;;  %2131 = vmatmul.f32.gmra.mxu2 %v1081_v17  ;;  %v1127_v0 = vld [vmem:[%s5656_s3 + $0x440] sm:$0xff]  ;;  %v1085_v17 = vld [vmem:[%s5656_s3 + $0x2f0] sm:$0xff] }
 0x272   :  { %2325 = vmatmul.f32.gmra.mxu3 %v1062_v30  ;;  %2817 = vperm.xlu2 %3059, %v2575_v15  }
 0x273   :  { %2812 = vperm.xlu1 %3058, %v2574_v51   ;;  %2807 = vperm.xlu0 %3057, %v2573_v33   ;;  %v1066_v51 = vld [vmem:[%s5656_s3 + $0x258] sm:$0xff]  ;;  %v2467_v33 = vmax.f32 %v2276_v28, 0.0 }
 0x274   :  { %v4734_v9 = vpop.f32.mrf.mxu1  ;;  %v4736_v60 = vpop.f32.mrf.mxu2 }
 0x275   :  { %v2278_v5 = vpop.f32.mrf.mxu3  ;;  %v2598_v30 = vpop.permute.xlu0 %2597 }
 0x276   :  { %v2279_v45 = vadd.f32 %v2278_v5, %v4568_v57  ;;  %v4750_v15 = vpop.f32.mrf.mxu0  ;;  %v2578_v57 = vld [vmem:[%s5657_s5 + $0x178] sm:$0xff]  ;;  %v2603_v63 = vpop.permute.xlu1 %2602  ;;  %v2915_v25 = vmul.f32 %v2598_v30, %v2467_v33 }
 0x277   :  { %1943 = vmatmul.f32.gmra.mxu1 %v1108_v49  ;;  %v1670_v49 = vadd.f32 %v4380_v14, %v4140_v4 }
 0x278   :  { %v2468_v5 = vmax.f32 %v2279_v45, 0.0 }
 0x279   :  { %1749 = vmatmul.f32.gmra.mxu0 %v1127_v0  ;;  %2134 = vmatmul.f32.gmra.mxu2 %v1085_v17  ;;  %v1879_v28 = vadd.f32 %v4527_v53, %v1670_v49  ;;  %v1131_v0 = vld [vmem:[%s5656_s3 + $0x460] sm:$0xff]  ;;  %v1070_v53 = vld [vmem:[%s5656_s3 + $0x278] sm:$0xff]  ;;  %v2608_v17 = vpop.permute.xlu2 %2607 }
 0x27a   :  { %v2916_v36 = vmul.f32 %v2603_v63, %v2468_v5  ;;  %2328 = vmatmul.f32.gmra.mxu3 %v1066_v51  ;;  %2832 = vperm.xlu2 %3059, %v2578_v57   ;;  %v1116_v5 = vld [vmem:[%s5656_s3 + $0x3e8] sm:$0xff] }
 0x27b   :  { %2827 = vperm.xlu1 %3058, %v2577_v54   ;;  %2822 = vperm.xlu0 %3057, %v2576_v59   ;;  %v2580_v54 = vld [vmem:[%s5657_s5 + $0x188] sm:$0xff] }
 0x27c   :  { %v2979_v45 = vadd.f32 %v2916_v36, %v2915_v25  ;;  %v4767_v6 = vpop.f32.mrf.mxu1  ;;  %v2087_v26 = vpop.f32.mrf.mxu2  ;;  %v1089_v36 = vld [vmem:[%s5656_s3 + $0x310] sm:$0xff] }
 0x27d   :  { %v4772_v4 = vadd.f32 %v2087_v26, %v1879_v28  ;;  %v2281_v14 = vpop.f32.mrf.mxu3  ;;  %v2581_v26 = vld [vmem:[%s5657_s5 + $0x190] sm:$0xff] }
 0x27e   :  { %v2282_v63 = vadd.f32 %v2281_v14, %v4602_v1  ;;  %v4781_v25 = vpop.f32.mrf.mxu0  ;;  %v1658_v1 = vadd.f32 %v4260_v42, %v3982_v19  ;;  %v1093_v14 = vld [vmem:[%s5656_s3 + $0x330] sm:$0xff] }
 0x27f   :  { %1946 = vmatmul.f32.gmra.mxu1 %v1112_v44  ;;  %v2579_v44 = vld [vmem:[%s5657_s5 + $0x180] sm:$0xff] }
 0x280   :  { %v2469_v59 = vmax.f32 %v2282_v63, 0.0  ;;  %v1867_v30 = vadd.f32 %v4402_v31, %v1658_v1  ;;  %v1135_v31 = vld [vmem:[%s5656_s3 + $0x480] sm:$0xff]  ;;  %v2584_v63 = vld [vmem:[%s5657_s5 + $0x1a8] sm:$0xff] }
 0x281   :  { %1752 = vmatmul.f32.gmra.mxu0 %v1131_v0  ;;  %2137 = vmatmul.f32.gmra.mxu2 %v1089_v36  ;;  %v2583_v36 = vld [vmem:[%s5657_s5 + $0x1a0] sm:$0xff] }
 0x282   :  { %v2917_v51 = vmul.f32 %v2608_v17, %v2469_v59  ;;  %2331 = vmatmul.f32.gmra.mxu3 %v1070_v53  ;;  %2847 = vperm.xlu2 %3059, %v2581_v26   ;;  %v2076_v19 = vadd.f32 %v4632_v7, %v1867_v30  ;;  %v2582_v53 = vld [vmem:[%s5657_s5 + $0x198] sm:$0xff]  ;;  %v2613_v26 = vpop.permute.xlu0 %2612  ;;  %v1120_v17 = vld [vmem:[%s5656_s3 + $0x408] sm:$0xff] }
 0x283   :  { %2842 = vperm.xlu1 %3058, %v2580_v54   ;;  %2837 = vperm.xlu0 %3057, %v2579_v44  }
 0x284   :  { %v2980_v42 = vadd.f32 %v2979_v45, %v2917_v51  ;;  %v4799_v57 = vpop.f32.mrf.mxu1  ;;  %v4801_v33 = vpop.f32.mrf.mxu2  ;;  %v1074_v45 = vld [vmem:[%s5656_s3 + $0x298] sm:$0xff] }
 0x285   :  { %v2284_v49 = vpop.f32.mrf.mxu3 }
 0x286   :  { %v2285_v28 = vadd.f32 %v2284_v49, %v2076_v19  ;;  %v4812_v7 = vpop.f32.mrf.mxu0  ;;  %v1139_v19 = vld [vmem:[%s5656_s3 + $0x4a0] sm:$0xff]  ;;  %v1078_v49 = vld [vmem:[%s5656_s3 + $0x2b8] sm:$0xff] }
 0x287   :  { %1949 = vmatmul.f32.gmra.mxu1 %v1116_v5  ;;  %v1097_v5 = vld [vmem:[%s5656_s3 + $0x350] sm:$0xff] }
 0x288   :  { %v2470_v0 = vmax.f32 %v2285_v28, 0.0  ;;  %v2587_v28 = vld [vmem:[%s5657_s5 + $0x1c0] sm:$0xff] }
 0x289   :  { %1755 = vmatmul.f32.gmra.mxu0 %v1135_v31  ;;  %2140 = vmatmul.f32.gmra.mxu2 %v1093_v14  ;;  %v2586_v31 = vld [vmem:[%s5657_s5 + $0x1b8] sm:$0xff]  ;;  %v2585_v14 = vld [vmem:[%s5657_s5 + $0x1b0] sm:$0xff] }
 0x28a   :  { %v2918_v1 = vmul.f32 %v2613_v26, %v2470_v0  ;;  %2334 = vmatmul.f32.gmra.mxu3 %v1074_v45  ;;  %2862 = vperm.xlu2 %3059, %v2584_v63   ;;  %v2618_v45 = vpop.permute.xlu1 %2617  ;;  %v1124_v26 = vld [vmem:[%s5656_s3 + $0x428] sm:$0xff] }
 0x28b   :  { %2857 = vperm.xlu1 %3058, %v2583_v36   ;;  %2852 = vperm.xlu0 %3057, %v2582_v53  }
 0x28c   :  { %v2981_v59 = vadd.f32 %v2980_v42, %v2918_v1  ;;  %v4826_v54 = vpop.f32.mrf.mxu1  ;;  %v4828_v44 = vpop.f32.mrf.mxu2 }
 0x28d   :  { %v2287_v30 = vpop.f32.mrf.mxu3 }
 0x28e   :  { %v2288_v51 = vadd.f32 %v2287_v30, %v4671_v43  ;;  %v4840_v42 = vpop.f32.mrf.mxu0  ;;  %v1143_v30 = vld [vmem:[%s5656_s3 + $0x4c0] sm:$0xff] }
 0x28f   :  { %1952 = vmatmul.f32.gmra.mxu1 %v1120_v17 }
 0x290   :  { %v2471_v43 = vmax.f32 %v2288_v51, 0.0  ;;  %v1101_v51 = vld [vmem:[%s5656_s3 + $0x370] sm:$0xff] }
 0x291   :  { %1758 = vmatmul.f32.gmra.mxu0 %v1139_v19  ;;  %2143 = vmatmul.f32.gmra.mxu2 %v1097_v5  ;;  %v1082_v19 = vld [vmem:[%s5656_s3 + $0x2d8] sm:$0xff] }
 0x292   :  { %v2919_v63 = vmul.f32 %v2618_v45, %v2471_v43  ;;  %2337 = vmatmul.f32.gmra.mxu3 %v1078_v49  ;;  %2877 = vperm.xlu2 %3059, %v2587_v28   ;;  %v2590_v5 = vld [vmem:[%s5657_s5 + $0x1d8] sm:$0xff]  ;;  %v2589_v28 = vld [vmem:[%s5657_s5 + $0x1d0] sm:$0xff]  ;;  %v2588_v43 = vld [vmem:[%s5657_s5 + $0x1c8] sm:$0xff] }
 0x293   :  { %2872 = vperm.xlu1 %3058, %v2586_v31   ;;  %2867 = vperm.xlu0 %3057, %v2585_v14   ;;  %v2623_v31 = vpop.permute.xlu2 %2622 }
 0x294   :  { %v2982_v0 = vadd.f32 %v2981_v59, %v2919_v63  ;;  %v4854_v36 = vpop.f32.mrf.mxu1  ;;  %v4856_v53 = vpop.f32.mrf.mxu2 }
 0x295   :  { %v2290_v1 = vpop.f32.mrf.mxu3 }
 0x296   :  { %v2291_v17 = vadd.f32 %v2290_v1, %v4707_v24  ;;  %v4868_v59 = vpop.f32.mrf.mxu0  ;;  %v1667_v24 = vadd.f32 %v4349_v22, %v4010_v50  ;;  %v1128_v1 = vld [vmem:[%s5656_s3 + $0x448] sm:$0xff] }
 0x297   :  { %1955 = vmatmul.f32.gmra.mxu1 %v1124_v26 }
 0x298   :  { %v2472_v49 = vmax.f32 %v2291_v17, 0.0  ;;  %v1876_v14 = vadd.f32 %v4493_v10, %v1667_v24  ;;  %v1147_v10 = vld [vmem:[%s5656_s3 + $0x4e0] sm:$0xff]  ;;  %v2592_v24 = vld [vmem:[%s5657_s5 + $0x1e8] sm:$0xff] }
 0x299   :  { %1761 = vmatmul.f32.gmra.mxu0 %v1143_v30  ;;  %2146 = vmatmul.f32.gmra.mxu2 %v1101_v51  ;;  %v1105_v51 = vld [vmem:[%s5656_s3 + $0x390] sm:$0xff] }
 0x29a   :  { %v2920_v45 = vmul.f32 %v2623_v31, %v2472_v49  ;;  %2340 = vmatmul.f32.gmra.mxu3 %v1082_v19  ;;  %2892 = vperm.xlu2 %3059, %v2590_v5   ;;  %v2085_v50 = vadd.f32 %v4736_v60, %v1876_v14  ;;  %v2593_v19 = vld [vmem:[%s5657_s5 + $0x1f0] sm:$0xff]  ;;  %v2591_v49 = vld [vmem:[%s5657_s5 + $0x1e0] sm:$0xff] }
 0x29b   :  { %2887 = vperm.xlu1 %3058, %v2589_v28   ;;  %2882 = vperm.xlu0 %3057, %v2588_v43   ;;  %v2628_v28 = vpop.permute.xlu0 %2627 }
 0x29c   :  { %v2983_v22 = vadd.f32 %v2982_v0, %v2920_v45  ;;  %v4886_v63 = vpop.f32.mrf.mxu1  ;;  %v4888_v26 = vpop.f32.mrf.mxu2  ;;  %v1086_v0 = vld [vmem:[%s5656_s3 + $0x2f8] sm:$0xff] }
 0x29d   :  { %v2293_v17 = vpop.f32.mrf.mxu3 }
 0x29e   :  { %v2294_v30 = vadd.f32 %v2293_v17, %v2085_v50  ;;  %v4899_v60 = vpop.f32.mrf.mxu0  ;;  %v1132_v50 = vld [vmem:[%s5656_s3 + $0x468] sm:$0xff] }
 0x29f   :  { %1958 = vmatmul.f32.gmra.mxu1 %v1128_v1 }
 0x2a0   :  { %v2473_v5 = vmax.f32 %v2294_v30, 0.0  ;;  %v1151_v30 = vld [vmem:[%s5656_s3 + $0x500] sm:$0xff] }
 0x2a1   :  { %1764 = vmatmul.f32.gmra.mxu0 %v1147_v10  ;;  %2149 = vmatmul.f32.gmra.mxu2 %v1105_v51  ;;  %v1109_v10 = vld [vmem:[%s5656_s3 + $0x3b0] sm:$0xff]  ;;  %v1090_v51 = vld [vmem:[%s5656_s3 + $0x318] sm:$0xff] }
 0x2a2   :  { %v2921_v43 = vmul.f32 %v2628_v28, %v2473_v5  ;;  %2343 = vmatmul.f32.gmra.mxu3 %v1086_v0  ;;  %2907 = vperm.xlu2 %3059, %v2593_v19   ;;  %v1673_v0 = vadd.f32 %v4411_v62, %v4138_v23  ;;  %v2633_v5 = vpop.permute.xlu1 %2632  ;;  %v1136_v23 = vld [vmem:[%s5656_s3 + $0x488] sm:$0xff] }
 0x2a3   :  { %2902 = vperm.xlu1 %3058, %v2592_v24   ;;  %2897 = vperm.xlu0 %3057, %v2591_v49  }
 0x2a4   :  { %v2984_v31 = vadd.f32 %v2983_v22, %v2921_v43  ;;  %v4913_v14 = vpop.f32.mrf.mxu1  ;;  %v4915_v45 = vpop.f32.mrf.mxu2  ;;  %v1882_v24 = vadd.f32 %v4561_v47, %v1673_v0  ;;  %v1155_v47 = vld [vmem:[%s5656_s3 + $0x520] sm:$0xff] }
 0x2a5   :  { %v2296_v1 = vpop.f32.mrf.mxu3  ;;  %v2638_v0 = vpop.permute.xlu2 %2637 }
 0x2a6   :  { %v2297_v17 = vadd.f32 %v2296_v1, %v4772_v4  ;;  %v4927_v22 = vpop.f32.mrf.mxu0  ;;  %v2594_v4 = vld [vmem:[%s5657_s5 + $0x1f8] sm:$0xff]  ;;  %v2091_v28 = vadd.f32 %v4801_v33, %v1882_v24 }
 0x2a7   :  { %1961 = vmatmul.f32.gmra.mxu1 %v1132_v50 }
 0x2a8   :  { %v2474_v19 = vmax.f32 %v2297_v17, 0.0 }
 0x2a9   :  { %1767 = vmatmul.f32.gmra.mxu0 %v1151_v30  ;;  %2152 = vmatmul.f32.gmra.mxu2 %v1109_v10  ;;  %v1113_v30 = vld [vmem:[%s5656_s3 + $0x3d0] sm:$0xff]  ;;  %v1676_v10 = vadd.f32 %v4440_v29, %v4034_v27 }
 0x2aa   :  { %v2922_v49 = vmul.f32 %v2633_v5, %v2474_v19  ;;  %2346 = vmatmul.f32.gmra.mxu3 %v1090_v51 }
 0x2ab   :  { %2912 = vperm.xlu0 %3057, %v2594_v4   ;;  %v1885_v19 = vadd.f32 %v4597_v39, %v1676_v10  ;;  %v1117_v39 = vld [vmem:[%s5656_s3 + $0x3f0] sm:$0xff] }
 0x2ac   :  { %v2985_v43 = vadd.f32 %v2984_v31, %v2922_v49  ;;  %v4939_v50 = vpop.f32.mrf.mxu1  ;;  %v4941_v1 = vpop.f32.mrf.mxu2  ;;  %v1094_v31 = vld [vmem:[%s5656_s3 + $0x338] sm:$0xff] }
 0x2ad   :  { %v2299_v62 = vpop.f32.mrf.mxu3  ;;  %v2094_v5 = vadd.f32 %v4828_v44, %v1885_v19 }
 0x2ae   :  { %v2300_v17 = vadd.f32 %v2299_v62, %v2091_v28  ;;  %v4952_v33 = vpop.f32.mrf.mxu0  ;;  %v1159_v62 = vld [vmem:[%s5656_s3 + $0x540] sm:$0xff] }
 0x2af   :  { %1964 = vmatmul.f32.gmra.mxu1 %v1136_v23  ;;  %v1140_v23 = vld [vmem:[%s5656_s3 + $0x4a8] sm:$0xff] }
 0x2b0   :  { %v2475_v51 = vmax.f32 %v2300_v17, 0.0  ;;  %v1679_v17 = vadd.f32 %v4471_v41, %v4171_v20 }
 0x2b1   :  { %1770 = vmatmul.f32.gmra.mxu0 %v1155_v47  ;;  %2155 = vmatmul.f32.gmra.mxu2 %v1113_v30  ;;  %v2643_v30 = vpop.permute.xlu0 %2642 }
 0x2b2   :  { %v2923_v4 = vmul.f32 %v2638_v0, %v2475_v51  ;;  %2349 = vmatmul.f32.gmra.mxu3 %v1094_v31  ;;  %v1888_v31 = vadd.f32 %v4630_v35, %v1679_v17  ;;  %v1121_v35 = vld [vmem:[%s5656_s3 + $0x410] sm:$0xff] }
 0x2b4   :  { %v2986_v24 = vadd.f32 %v2985_v43, %v2923_v4  ;;  %v4961_v49 = vpop.f32.mrf.mxu1  ;;  %v4963_v28 = vpop.f32.mrf.mxu2  ;;  %v1098_v43 = vld [vmem:[%s5656_s3 + $0x358] sm:$0xff]  ;;  %v2097_v51 = vadd.f32 %v4856_v53, %v1888_v31 }
 0x2b5   :  { %v2302_v27 = vpop.f32.mrf.mxu3 }
 0x2b6   :  { %v2303_v29 = vadd.f32 %v2302_v27, %v2094_v5  ;;  %v4974_v44 = vpop.f32.mrf.mxu0  ;;  %v1144_v5 = vld [vmem:[%s5656_s3 + $0x4c8] sm:$0xff]  ;;  %v1682_v27 = vadd.f32 %v4502_v55, %v4169_v34 }
 0x2b7   :  { %1967 = vmatmul.f32.gmra.mxu1 %v1140_v23  ;;  %v1163_v23 = vld [vmem:[%s5656_s3 + $0x560] sm:$0xff] }
 0x2b8   :  { %v2476_v47 = vmax.f32 %v2303_v29, 0.0 }
 0x2b9   :  { %1773 = vmatmul.f32.gmra.mxu0 %v1159_v62  ;;  %2158 = vmatmul.f32.gmra.mxu2 %v1117_v39  ;;  %v2648_v62 = vpop.permute.xlu1 %2647  ;;  %v1891_v39 = vadd.f32 %v4666_v16, %v1682_v27  ;;  %v1125_v16 = vld [vmem:[%s5656_s3 + $0x430] sm:$0xff] }
 0x2ba   :  { %v2924_v10 = vmul.f32 %v2643_v30, %v2476_v47  ;;  %2352 = vmatmul.f32.gmra.mxu3 %v1098_v43 }
 0x2bb   :  { %v2100_v17 = vadd.f32 %v4888_v26, %v1891_v39  ;;  %v1152_v39 = vld [vmem:[%s5656_s3 + $0x508] sm:$0xff] }
 0x2bc   :  { %v2987_v0 = vadd.f32 %v2986_v24, %v2924_v10  ;;  %v4983_v19 = vpop.f32.mrf.mxu1  ;;  %v4985_v4 = vpop.f32.mrf.mxu2  ;;  %v1102_v24 = vld [vmem:[%s5656_s3 + $0x378] sm:$0xff]  ;;  %v1148_v10 = vld [vmem:[%s5656_s3 + $0x4e8] sm:$0xff] }
 0x2bd   :  { %v2305_v20 = vpop.f32.mrf.mxu3 }
 0x2be   :  { %v2306_v41 = vadd.f32 %v2305_v20, %v2097_v51  ;;  %v4996_v53 = vpop.f32.mrf.mxu0  ;;  %v1167_v51 = vld [vmem:[%s5656_s3 + $0x580] sm:$0xff] }
 0x2bf   :  { %1970 = vmatmul.f32.gmra.mxu1 %v1144_v5  ;;  %v1685_v5 = vadd.f32 %v4538_v13, %v4063_v11 }
 0x2c0   :  { %v2477_v29 = vmax.f32 %v2306_v41, 0.0  ;;  %v2653_v41 = vpop.permute.xlu2 %2652 }
 0x2c1   :  { %1776 = vmatmul.f32.gmra.mxu0 %v1163_v23  ;;  %2161 = vmatmul.f32.gmra.mxu2 %v1121_v35  ;;  %v1894_v23 = vadd.f32 %v4702_v61, %v1685_v5  ;;  %v1129_v61 = vld [vmem:[%s5656_s3 + $0x450] sm:$0xff] }
 0x2c2   :  { %v2925_v43 = vmul.f32 %v2648_v62, %v2477_v29  ;;  %2355 = vmatmul.f32.gmra.mxu3 %v1102_v24 }
 0x2c3   :  { %v2103_v24 = vadd.f32 %v4915_v45, %v1894_v23  ;;  %v1175_v23 = vld [vmem:[%s5656_s3 + $0x5c0] sm:$0xff] }
 0x2c4   :  { %v2988_v47 = vadd.f32 %v2987_v0, %v2925_v43  ;;  %v5005_v30 = vpop.f32.mrf.mxu1  ;;  %v5007_v31 = vpop.f32.mrf.mxu2  ;;  %v1106_v0 = vld [vmem:[%s5656_s3 + $0x398] sm:$0xff]  ;;  %v1171_v43 = vld [vmem:[%s5656_s3 + $0x5a0] sm:$0xff] }
 0x2c5   :  { %v2308_v34 = vpop.f32.mrf.mxu3 }
 0x2c6   :  { %v2309_v55 = vadd.f32 %v2308_v34, %v2100_v17  ;;  %v5018_v26 = vpop.f32.mrf.mxu0  ;;  %v1110_v17 = vld [vmem:[%s5656_s3 + $0x3b8] sm:$0xff]  ;;  %v2658_v34 = vpop.permute.xlu0 %2657 }
 0x2c7   :  { %1973 = vmatmul.f32.gmra.mxu1 %v1148_v10 }
 0x2c8   :  { %v2478_v20 = vmax.f32 %v2309_v55, 0.0 }
 0x2c9   :  { %1779 = vmatmul.f32.gmra.mxu0 %v1167_v51  ;;  %2164 = vmatmul.f32.gmra.mxu2 %v1125_v16 }
 0x2ca   :  { %v2926_v35 = vmul.f32 %v2653_v41, %v2478_v20  ;;  %2358 = vmatmul.f32.gmra.mxu3 %v1106_v0  ;;  %v1156_v41 = vld [vmem:[%s5656_s3 + $0x528] sm:$0xff] }
 0x2cc   :  { %v2989_v27 = vadd.f32 %v2988_v47, %v2926_v35  ;;  %v5027_v29 = vpop.f32.mrf.mxu1  ;;  %v5029_v62 = vpop.f32.mrf.mxu2  ;;  %v1688_v47 = vadd.f32 %v4574_v2, %v4200_v52  ;;  %v1114_v35 = vld [vmem:[%s5656_s3 + $0x3d8] sm:$0xff] }
 0x2cd   :  { %v2311_v11 = vpop.f32.mrf.mxu3 }
 0x2ce   :  { %v2312_v13 = vadd.f32 %v2311_v11, %v2103_v24  ;;  %v5040_v45 = vpop.f32.mrf.mxu0  ;;  %v1897_v55 = vadd.f32 %v4734_v9, %v1688_v47  ;;  %v1133_v9 = vld [vmem:[%s5656_s3 + $0x470] sm:$0xff]  ;;  %v1691_v24 = vadd.f32 %v4608_v48, %v4198_v21 }
 0x2cf   :  { %1976 = vmatmul.f32.gmra.mxu1 %v1152_v39  ;;  %v2663_v39 = vpop.permute.xlu1 %2662 }
 0x2d0   :  { %v2479_v10 = vmax.f32 %v2312_v13, 0.0  ;;  %v2106_v16 = vadd.f32 %v4941_v1, %v1897_v55  ;;  %v1900_v11 = vadd.f32 %v4767_v6, %v1691_v24  ;;  %v1137_v6 = vld [vmem:[%s5656_s3 + $0x490] sm:$0xff]  ;;  %v1118_v55 = vld [vmem:[%s5656_s3 + $0x3f8] sm:$0xff]  ;;  %v1164_v24 = vld [vmem:[%s5656_s3 + $0x568] sm:$0xff] }
 0x2d1   :  { %1782 = vmatmul.f32.gmra.mxu0 %v1171_v43  ;;  %2167 = vmatmul.f32.gmra.mxu2 %v1129_v61 }
 0x2d2   :  { %v2927_v51 = vmul.f32 %v2658_v34, %v2479_v10  ;;  %2361 = vmatmul.f32.gmra.mxu3 %v1110_v17  ;;  %v2109_v43 = vadd.f32 %v4963_v28, %v1900_v11  ;;  %v1160_v10 = vld [vmem:[%s5656_s3 + $0x548] sm:$0xff]  ;;  %v1179_v34 = vld [vmem:[%s5656_s3 + $0x5e0] sm:$0xff]  ;;  %v1697_v11 = vadd.f32 %v4677_v38, %v4229_v3 }
 0x2d4   :  { %v2990_v0 = vadd.f32 %v2989_v27, %v2927_v51  ;;  %v5049_v5 = vpop.f32.mrf.mxu1  ;;  %v5051_v20 = vpop.f32.mrf.mxu2  ;;  %v1694_v51 = vadd.f32 %v4641_v8, %v4099_v40 }
 0x2d5   :  { %v2314_v52 = vpop.f32.mrf.mxu3 }
 0x2d6   :  { %v2315_v2 = vadd.f32 %v2314_v52, %v2106_v16  ;;  %v5062_v1 = vpop.f32.mrf.mxu0 }
 0x2d7   :  { %1979 = vmatmul.f32.gmra.mxu1 %v1156_v41  ;;  %v1903_v41 = vadd.f32 %v4799_v57, %v1694_v51  ;;  %v1141_v57 = vld [vmem:[%s5656_s3 + $0x4b0] sm:$0xff]  ;;  %v1187_v51 = vld [vmem:[%s5656_s3 + $0x620] sm:$0xff] }
 0x2d8   :  { %v2480_v27 = vmax.f32 %v2315_v2, 0.0 }
 0x2d9   :  { %1785 = vmatmul.f32.gmra.mxu0 %v1175_v23  ;;  %2170 = vmatmul.f32.gmra.mxu2 %v1133_v9  ;;  %v2112_v2 = vadd.f32 %v4985_v4, %v1903_v41 }
 0x2da   :  { %v2928_v13 = vmul.f32 %v2663_v39, %v2480_v27  ;;  %2364 = vmatmul.f32.gmra.mxu3 %v1114_v35  ;;  %v1183_v27 = vld [vmem:[%s5656_s3 + $0x600] sm:$0xff]  ;;  %v1122_v39 = vld [vmem:[%s5656_s3 + $0x418] sm:$0xff] }
 0x2dc   :  { %v2991_v61 = vadd.f32 %v2990_v0, %v2928_v13  ;;  %v5071_v17 = vpop.f32.mrf.mxu1  ;;  %v5073_v47 = vpop.f32.mrf.mxu2 }
 0x2dd   :  { %v2317_v21 = vpop.f32.mrf.mxu3  ;;  %v2668_v0 = vpop.permute.xlu2 %2667 }
 0x2de   :  { %v2318_v48 = vadd.f32 %v2317_v21, %v2109_v43  ;;  %v5084_v28 = vpop.f32.mrf.mxu0  ;;  %v2673_v43 = vpop.permute.xlu0 %2672 }
 0x2df   :  { %1982 = vmatmul.f32.gmra.mxu1 %v1160_v10 }
 0x2e0   :  { %v2481_v16 = vmax.f32 %v2318_v48, 0.0 }
 0x2e1   :  { %1788 = vmatmul.f32.gmra.mxu0 %v1179_v34  ;;  %2173 = vmatmul.f32.gmra.mxu2 %v1137_v6 }
 0x2e2   :  { %v2929_v52 = vmul.f32 %v2668_v0, %v2481_v16  ;;  %2367 = vmatmul.f32.gmra.mxu3 %v1118_v55  ;;  %v1168_v55 = vld [vmem:[%s5656_s3 + $0x588] sm:$0xff]  ;;  %v1126_v16 = vld [vmem:[%s5656_s3 + $0x438] sm:$0xff]  ;;  %v1700_v0 = vadd.f32 %v4720_v12, %v4227_v18 }
 0x2e4   :  { %v2992_v23 = vadd.f32 %v2991_v61, %v2929_v52  ;;  %v5093_v9 = vpop.f32.mrf.mxu1  ;;  %v5095_v35 = vpop.f32.mrf.mxu2  ;;  %v1906_v61 = vadd.f32 %v4826_v54, %v1697_v11  ;;  %v1145_v54 = vld [vmem:[%s5656_s3 + $0x4d0] sm:$0xff]  ;;  %v1130_v11 = vld [vmem:[%s5656_s3 + $0x458] sm:$0xff] }
 0x2e5   :  { %v2320_v40 = vpop.f32.mrf.mxu3  ;;  %v2678_v52 = vpop.permute.xlu1 %2677 }
 0x2e6   :  { %v2321_v8 = vadd.f32 %v2320_v40, %v2112_v2  ;;  %v5106_v4 = vpop.f32.mrf.mxu0  ;;  %v2115_v21 = vadd.f32 %v5007_v31, %v1906_v61  ;;  %v1909_v2 = vadd.f32 %v4854_v36, %v1700_v0  ;;  %v1149_v36 = vld [vmem:[%s5656_s3 + $0x4f0] sm:$0xff]  ;;  %v2683_v61 = vpop.permute.xlu2 %2682  ;;  %v1706_v0 = vadd.f32 %v4781_v25, %v4258_v37 }
 0x2e7   :  { %1985 = vmatmul.f32.gmra.mxu1 %v1164_v24 }
 0x2e8   :  { %v2482_v13 = vmax.f32 %v2321_v8, 0.0  ;;  %v2118_v24 = vadd.f32 %v5029_v62, %v1909_v2  ;;  %v1915_v2 = vadd.f32 %v4913_v14, %v1706_v0  ;;  %v1157_v14 = vld [vmem:[%s5656_s3 + $0x530] sm:$0xff] }
 0x2e9   :  { %1791 = vmatmul.f32.gmra.mxu0 %v1183_v27  ;;  %2176 = vmatmul.f32.gmra.mxu2 %v1141_v57  ;;  %v1172_v57 = vld [vmem:[%s5656_s3 + $0x5a8] sm:$0xff] }
 0x2ea   :  { %v2930_v10 = vmul.f32 %v2673_v43, %v2482_v13  ;;  %2370 = vmatmul.f32.gmra.mxu3 %v1122_v39  ;;  %v1191_v39 = vld [vmem:[%s5656_s3 + $0x640] sm:$0xff]  ;;  %v1703_v13 = vadd.f32 %v4750_v15, %v4145_v32 }
 0x2ec   :  { %v2993_v48 = vadd.f32 %v2992_v23, %v2930_v10  ;;  %v5115_v34 = vpop.f32.mrf.mxu1  ;;  %v5117_v6 = vpop.f32.mrf.mxu2  ;;  %v1912_v10 = vadd.f32 %v4886_v63, %v1703_v13  ;;  %v1153_v63 = vld [vmem:[%s5656_s3 + $0x510] sm:$0xff] }
 0x2ed   :  { %v2323_v3 = vpop.f32.mrf.mxu3 }
 0x2ee   :  { %v2324_v38 = vadd.f32 %v2323_v3, %v2115_v21  ;;  %v5128_v31 = vpop.f32.mrf.mxu0 }
 0x2ef   :  { %1988 = vmatmul.f32.gmra.mxu1 %v1168_v55 }
 0x2f0   :  { %v2483_v41 = vmax.f32 %v2324_v38, 0.0 }
 0x2f1   :  { %1794 = vmatmul.f32.gmra.mxu0 %v1187_v51  ;;  %2179 = vmatmul.f32.gmra.mxu2 %v1145_v54  ;;  %v1176_v51 = vld [vmem:[%s5656_s3 + $0x5c8] sm:$0xff]  ;;  %v1195_v54 = vld [vmem:[%s5656_s3 + $0x660] sm:$0xff] }
 0x2f2   :  { %v2931_v23 = vmul.f32 %v2678_v52, %v2483_v41  ;;  %2373 = vmatmul.f32.gmra.mxu3 %v1126_v16  ;;  %v1134_v16 = vld [vmem:[%s5656_s3 + $0x478] sm:$0xff]  ;;  %v2688_v52 = vpop.permute.xlu0 %2687 }
 0x2f4   :  { %v2994_v40 = vadd.f32 %v2993_v48, %v2931_v23  ;;  %v5137_v8 = vpop.f32.mrf.mxu1  ;;  %v5139_v27 = vpop.f32.mrf.mxu2  ;;  %v2121_v48 = vadd.f32 %v5051_v20, %v1912_v10 }
 0x2f5   :  { %v2326_v18 = vpop.f32.mrf.mxu3 }
 0x2f6   :  { %v2327_v12 = vadd.f32 %v2326_v18, %v2118_v24  ;;  %v5150_v62 = vpop.f32.mrf.mxu0  ;;  %v2124_v24 = vadd.f32 %v5073_v47, %v1915_v2 }
 0x2f7   :  { %1991 = vmatmul.f32.gmra.mxu1 %v1172_v57 }
 0x2f8   :  { %v2484_v43 = vmax.f32 %v2327_v12, 0.0  ;;  %v1180_v12 = vld [vmem:[%s5656_s3 + $0x5e8] sm:$0xff] }
 0x2f9   :  { %1797 = vmatmul.f32.gmra.mxu0 %v1191_v39  ;;  %2182 = vmatmul.f32.gmra.mxu2 %v1149_v36  ;;  %v1199_v39 = vld [vmem:[%s5656_s3 + $0x680] sm:$0xff]  ;;  %v1138_v36 = vld [vmem:[%s5656_s3 + $0x498] sm:$0xff] }
 0x2fa   :  { %v2932_v21 = vmul.f32 %v2683_v61, %v2484_v43  ;;  %2376 = vmatmul.f32.gmra.mxu3 %v1130_v11  ;;  %v1709_v11 = vadd.f32 %v4812_v7, %v4256_v58  ;;  %v2693_v43 = vpop.permute.xlu1 %2692 }
 0x2fc   :  { %v2995_v55 = vadd.f32 %v2994_v40, %v2932_v21  ;;  %v5159_v3 = vpop.f32.mrf.mxu1  ;;  %v5161_v38 = vpop.f32.mrf.mxu2  ;;  %v1918_v61 = vadd.f32 %v4939_v50, %v1709_v11  ;;  %v1161_v50 = vld [vmem:[%s5656_s3 + $0x550] sm:$0xff] }
 0x2fd   :  { %v2329_v32 = vpop.f32.mrf.mxu3 }
 0x2fe   :  { %v2330_v15 = vadd.f32 %v2329_v32, %v2121_v48  ;;  %v5172_v20 = vpop.f32.mrf.mxu0  ;;  %v2127_v21 = vadd.f32 %v5095_v35, %v1918_v61  ;;  %v1184_v32 = vld [vmem:[%s5656_s3 + $0x608] sm:$0xff]  ;;  %v1142_v35 = vld [vmem:[%s5656_s3 + $0x4b8] sm:$0xff] }
 0x2ff   :  { %1994 = vmatmul.f32.gmra.mxu1 %v1176_v51 }
 0x300   :  { %v2485_v41 = vmax.f32 %v2330_v15, 0.0  ;;  %v1203_v15 = vld [vmem:[%s5656_s3 + $0x6a0] sm:$0xff] }
 0x301   :  { %1800 = vmatmul.f32.gmra.mxu0 %v1195_v54  ;;  %2185 = vmatmul.f32.gmra.mxu2 %v1153_v63  ;;  %v1712_v54 = vadd.f32 %v4840_v42, %v4187_v46  ;;  %v1188_v46 = vld [vmem:[%s5656_s3 + $0x628] sm:$0xff] }
 0x302   :  { %v2933_v23 = vmul.f32 %v2688_v52, %v2485_v41  ;;  %2379 = vmatmul.f32.gmra.mxu3 %v1134_v16  ;;  %v2698_v16 = vpop.permute.xlu2 %2697 }
 0x303   :  { %v1921_v41 = vadd.f32 %v4961_v49, %v1712_v54  ;;  %v1165_v49 = vld [vmem:[%s5656_s3 + $0x570] sm:$0xff] }
 0x304   :  { %v2996_v40 = vadd.f32 %v2995_v55, %v2933_v23  ;;  %v5181_v57 = vpop.f32.mrf.mxu1  ;;  %v5183_v18 = vpop.f32.mrf.mxu2 }
 0x305   :  { %v2332_v37 = vpop.f32.mrf.mxu3  ;;  %v2130_v2 = vadd.f32 %v5117_v6, %v1921_v41  ;;  %v1146_v6 = vld [vmem:[%s5656_s3 + $0x4d8] sm:$0xff] }
 0x306   :  { %v2333_v25 = vadd.f32 %v2332_v37, %v2124_v24  ;;  %v5194_v47 = vpop.f32.mrf.mxu0  ;;  %v1207_v37 = vld [vmem:[%s5656_s3 + $0x6c0] sm:$0xff] }
 0x307   :  { %1997 = vmatmul.f32.gmra.mxu1 %v1180_v12 }
 0x308   :  { %v2486_v13 = vmax.f32 %v2333_v25, 0.0  ;;  %v1715_v25 = vadd.f32 %v4868_v59, %v4285_v56  ;;  %v1192_v56 = vld [vmem:[%s5656_s3 + $0x648] sm:$0xff] }
 0x309   :  { %1803 = vmatmul.f32.gmra.mxu0 %v1199_v39  ;;  %2188 = vmatmul.f32.gmra.mxu2 %v1157_v14  ;;  %v2703_v14 = vpop.permute.xlu0 %2702 }
 0x30a   :  { %v2934_v10 = vmul.f32 %v2693_v43, %v2486_v13  ;;  %2382 = vmatmul.f32.gmra.mxu3 %v1138_v36  ;;  %v1924_v36 = vadd.f32 %v4983_v19, %v1715_v25  ;;  %v1211_v19 = vld [vmem:[%s5656_s3 + $0x6e0] sm:$0xff] }
 0x30c   :  { %v2997_v48 = vadd.f32 %v2996_v40, %v2934_v10  ;;  %v5203_v55 = vpop.f32.mrf.mxu1  ;;  %v5205_v51 = vpop.f32.mrf.mxu2  ;;  %v2133_v43 = vadd.f32 %v5139_v27, %v1924_v36  ;;  %v1150_v27 = vld [vmem:[%s5656_s3 + $0x4f8] sm:$0xff] }
 0x30d   :  { %v2335_v58 = vpop.f32.mrf.mxu3 }
 0x30e   :  { %v2336_v7 = vadd.f32 %v2335_v58, %v2127_v21  ;;  %v5221_v0 = vpop.f32.mrf.mxu0  ;;  %v5761_v58 = vld [vmem:[#allocation16_spill] sm:$0xff] }
 0x30f   :  { %2000 = vmatmul.f32.gmra.mxu1 %v1184_v32  ;;  %v1169_v32 = vld [vmem:[%s5656_s3 + $0x590] sm:$0xff] }
 0x310   :  { %v2487_v63 = vmax.f32 %v2336_v7, 0.0  ;;  %v1718_v7 = vadd.f32 %v4899_v60, %v5761_v58 }
 0x311   :  { %1806 = vmatmul.f32.gmra.mxu0 %v1203_v15  ;;  %2191 = vmatmul.f32.gmra.mxu2 %v1161_v50  ;;  %v2708_v50 = vpop.permute.xlu1 %2707  ;;  %v2718_v58 = vpop.permute.xlu0 %2717 }
 0x312   :  { %v2935_v52 = vmul.f32 %v2698_v16, %v2487_v63  ;;  %2385 = vmatmul.f32.gmra.mxu3 %v1142_v35  ;;  %v1927_v35 = vadd.f32 %v5005_v30, %v1718_v7  ;;  %v1215_v30 = vld [vmem:[%s5656_s3 + $0x700] sm:$0xff] }
 0x314   :  { %v2998_v23 = vadd.f32 %v2997_v48, %v2935_v52  ;;  %v5225_v24 = vpop.f32.mrf.mxu1  ;;  %v5227_v40 = vpop.f32.mrf.mxu2  ;;  %v2136_v63 = vadd.f32 %v5161_v38, %v1927_v35  ;;  %v1173_v38 = vld [vmem:[%s5656_s3 + $0x5b0] sm:$0xff] }
 0x315   :  { %v2338_v42 = vpop.f32.mrf.mxu3 }
 0x316   :  { %v2339_v12 = vadd.f32 %v2338_v42, %v2130_v2  ;;  %v5244_v13 = vpop.f32.mrf.mxu0  ;;  %v1196_v2 = vld [vmem:[%s5656_s3 + $0x668] sm:$0xff]  ;;  %v1154_v42 = vld [vmem:[%s5656_s3 + $0x518] sm:$0xff] }
 0x317   :  { %2003 = vmatmul.f32.gmra.mxu1 %v1188_v46 }
 0x318   :  { %v2488_v39 = vmax.f32 %v2339_v12, 0.0  ;;  %v5762_v12 = vld [vmem:[#allocation19_spill] sm:$0xff] }
 0x319   :  { %1809 = vmatmul.f32.gmra.mxu0 %v1207_v37  ;;  %2194 = vmatmul.f32.gmra.mxu2 %v1165_v49  ;;  %v1721_v37 = vadd.f32 %v4927_v22, %v5762_v12 }
 0x31a   :  { %v2936_v11 = vmul.f32 %v2703_v14, %v2488_v39  ;;  %2388 = vmatmul.f32.gmra.mxu3 %v1146_v6  ;;  %v2713_v6 = vpop.permute.xlu2 %2712 }
 0x31b   :  { %v1930_v25 = vadd.f32 %v5027_v29, %v1721_v37  ;;  %v1177_v29 = vld [vmem:[%s5656_s3 + $0x5d0] sm:$0xff] }
 0x31c   :  { %v2999_v61 = vadd.f32 %v2998_v23, %v2936_v11  ;;  %v5247_v10 = vpop.f32.mrf.mxu1  ;;  %v5249_v21 = vpop.f32.mrf.mxu2 }
 0x31d   :  { %v2341_v59 = vpop.f32.mrf.mxu3  ;;  %v2139_v14 = vadd.f32 %v5183_v18, %v1930_v25 }
 0x31e   :  { %v2342_v48 = vadd.f32 %v2341_v59, %v2133_v43  ;;  %v5274_v60 = vpop.f32.mrf.mxu0  ;;  %v1219_v59 = vld [vmem:[%s5656_s3 + $0x720] sm:$0xff] }
 0x31f   :  { %2006 = vmatmul.f32.gmra.mxu1 %v1192_v56 }
 0x320   :  { %v2489_v15 = vmax.f32 %v2342_v48, 0.0  ;;  %v1158_v48 = vld [vmem:[%s5656_s3 + $0x538] sm:$0xff] }
 0x321   :  { %1812 = vmatmul.f32.gmra.mxu0 %v1211_v19  ;;  %2197 = vmatmul.f32.gmra.mxu2 %v1169_v32  ;;  %v5763_v19 = vld [vmem:[#allocation13_spill] sm:$0xff] }
 0x322   :  { %v2937_v54 = vmul.f32 %v2708_v50, %v2489_v15  ;;  %2391 = vmatmul.f32.gmra.mxu3 %v1150_v27  ;;  %v1724_v32 = vadd.f32 %v4952_v33, %v5763_v19 }
 0x324   :  { %v3000_v16 = vadd.f32 %v2999_v61, %v2937_v54  ;;  %v5267_v41 = vpop.f32.mrf.mxu1  ;;  %v5269_v52 = vpop.f32.mrf.mxu2  ;;  %v1200_v61 = vld [vmem:[%s5656_s3 + $0x688] sm:$0xff]  ;;  %v1933_v7 = vadd.f32 %v5049_v5, %v1724_v32  ;;  %v1181_v5 = vld [vmem:[%s5656_s3 + $0x5f0] sm:$0xff] }
 0x325   :  { %v2344_v23 = vpop.f32.mrf.mxu3 }
 0x326   :  { %v2345_v46 = vadd.f32 %v2344_v23, %v2136_v63  ;;  %v5302_v18 = vpop.f32.mrf.mxu0  ;;  %v2142_v50 = vadd.f32 %v5205_v51, %v1933_v7  ;;  %v1223_v23 = vld [vmem:[%s5656_s3 + $0x740] sm:$0xff]  ;;  %v1162_v51 = vld [vmem:[%s5656_s3 + $0x558] sm:$0xff] }
 0x327   :  { %2009 = vmatmul.f32.gmra.mxu1 %v1196_v2 }
 0x328   :  { %v2490_v49 = vmax.f32 %v2345_v46, 0.0  ;;  %v5764_v46 = vld [vmem:[#allocation6_spill] sm:$0xff] }
 0x329   :  { %1815 = vmatmul.f32.gmra.mxu0 %v1215_v30  ;;  %2200 = vmatmul.f32.gmra.mxu2 %v1173_v38  ;;  %v1727_v30 = vadd.f32 %v4974_v44, %v5764_v46  ;;  %v1208_v44 = vld [vmem:[%s5656_s3 + $0x6c8] sm:$0xff] }
 0x32a   :  { %v2938_v39 = vmul.f32 %v2713_v6, %v2490_v49  ;;  %2394 = vmatmul.f32.gmra.mxu3 %v1154_v42  ;;  %v2723_v42 = vpop.permute.xlu1 %2722 }
 0x32b   :  { %v1936_v37 = vadd.f32 %v5071_v17, %v1727_v30  ;;  %v1185_v17 = vld [vmem:[%s5656_s3 + $0x610] sm:$0xff] }
 0x32c   :  { %v3001_v36 = vadd.f32 %v3000_v16, %v2938_v39  ;;  %v5289_v11 = vpop.f32.mrf.mxu1  ;;  %v5291_v43 = vpop.f32.mrf.mxu2  ;;  %v1204_v16 = vld [vmem:[%s5656_s3 + $0x6a8] sm:$0xff] }
 0x32d   :  { %v2347_v22 = vpop.f32.mrf.mxu3  ;;  %v2145_v6 = vadd.f32 %v5227_v40, %v1936_v37  ;;  %v1166_v40 = vld [vmem:[%s5656_s3 + $0x578] sm:$0xff] }
 0x32e   :  { %v2348_v56 = vadd.f32 %v2347_v22, %v2139_v14  ;;  %v5329_v12 = vpop.f32.mrf.mxu0  ;;  %v1227_v22 = vld [vmem:[%s5656_s3 + $0x760] sm:$0xff] }
 0x32f   :  { %2012 = vmatmul.f32.gmra.mxu1 %v1200_v61 }
 0x330   :  { %v2491_v27 = vmax.f32 %v2348_v56, 0.0  ;;  %v5765_v56 = vld [vmem:[#allocation7_spill] sm:$0xff] }
 0x331   :  { %1818 = vmatmul.f32.gmra.mxu0 %v1219_v59  ;;  %2203 = vmatmul.f32.gmra.mxu2 %v1177_v29  ;;  %v1730_v59 = vadd.f32 %v4996_v53, %v5765_v56  ;;  %v1212_v53 = vld [vmem:[%s5656_s3 + $0x6e8] sm:$0xff] }
 0x332   :  { %v2939_v15 = vmul.f32 %v2718_v58, %v2491_v27  ;;  %2397 = vmatmul.f32.gmra.mxu3 %v1158_v48  ;;  %v2728_v48 = vpop.permute.xlu2 %2727 }
 0x333   :  { %v1939_v19 = vadd.f32 %v5093_v9, %v1730_v59  ;;  %v1231_v9 = vld [vmem:[%s5656_s3 + $0x780] sm:$0xff]  ;;  %v2738_v59 = vpop.permute.xlu1 %2737 }
 0x334   :  { %v3002_v35 = vadd.f32 %v3001_v36, %v2939_v15  ;;  %v5311_v54 = vpop.f32.mrf.mxu1  ;;  %v5313_v63 = vpop.f32.mrf.mxu2 }
 0x335   :  { %v2350_v33 = vpop.f32.mrf.mxu3  ;;  %v2148_v58 = vadd.f32 %v5249_v21, %v1939_v19  ;;  %v1170_v21 = vld [vmem:[%s5656_s3 + $0x598] sm:$0xff]  ;;  %v5769_v19 = vld [vmem:[#allocation20_spill] sm:$0xff] }
 0x336   :  { %v2351_v2 = vadd.f32 %v2350_v33, %v2142_v50  ;;  %v5352_v27 = vpop.f32.mrf.mxu0  ;;  %v1189_v33 = vld [vmem:[%s5656_s3 + $0x630] sm:$0xff] }
 0x337   :  { %2015 = vmatmul.f32.gmra.mxu1 %v1204_v16 }
 0x338   :  { %v2492_v38 = vmax.f32 %v2351_v2, 0.0  ;;  %v5766_v2 = vld [vmem:[#allocation10_spill] sm:$0xff] }
 0x339   :  { %1821 = vmatmul.f32.gmra.mxu0 %v1223_v23  ;;  %2206 = vmatmul.f32.gmra.mxu2 %v1181_v5  ;;  %v1733_v23 = vadd.f32 %v5018_v26, %v5766_v2  ;;  %v1216_v26 = vld [vmem:[%s5656_s3 + $0x708] sm:$0xff]  ;;  %v5770_v2 = vld [vmem:[#allocation17_spill] sm:$0xff] }
 0x33a   :  { %v2940_v49 = vmul.f32 %v2723_v42, %v2492_v38  ;;  %2400 = vmatmul.f32.gmra.mxu3 %v1162_v51  ;;  %v2733_v51 = vpop.permute.xlu0 %2732  ;;  %v5767_v38 = vld [vmem:[#allocation28_spill] sm:$0xff] }
 0x33b   :  { %v1942_v46 = vadd.f32 %v5115_v34, %v1733_v23  ;;  %v1769_v42 = vadd.f32 %v5302_v18, %v5767_v38  ;;  %v1174_v18 = vld [vmem:[%s5656_s3 + $0x5b8] sm:$0xff]  ;;  %v1739_v23 = vadd.f32 %v5062_v1, %v5770_v2  ;;  %v5771_v38 = vld [vmem:[#allocation31_spill] sm:$0xff]  ;;  %v1224_v1 = vld [vmem:[%s5656_s3 + $0x748] sm:$0xff] }
 0x33c   :  { %v3003_v25 = vadd.f32 %v3002_v35, %v2940_v49  ;;  %v5333_v39 = vpop.f32.mrf.mxu1  ;;  %v5335_v14 = vpop.f32.mrf.mxu2 }
 0x33d   :  { %v2353_v36 = vpop.f32.mrf.mxu3  ;;  %v2151_v37 = vadd.f32 %v5269_v52, %v1942_v46  ;;  %v1193_v52 = vld [vmem:[%s5656_s3 + $0x650] sm:$0xff]  ;;  %v1948_v46 = vadd.f32 %v5159_v3, %v1739_v23  ;;  %v1243_v3 = vld [vmem:[%s5656_s3 + $0x7e0] sm:$0xff] }
 0x33e   :  { %v2354_v61 = vadd.f32 %v2353_v36, %v2145_v6 }
 0x33f   :  { %2018 = vmatmul.f32.gmra.mxu1 %v1208_v44  ;;  %v1777_v44 = vpop.f32.mrf.mxu0 }
 0x340   :  { %v2493_v29 = vmax.f32 %v2354_v61, 0.0 }
 0x341   :  { %1824 = vmatmul.f32.gmra.mxu0 %v1227_v22  ;;  %2209 = vmatmul.f32.gmra.mxu2 %v1185_v17  ;;  %v1235_v22 = vld [vmem:[%s5656_s3 + $0x7a0] sm:$0xff]  ;;  %v5768_v17 = vld [vmem:[#allocation5_spill] sm:$0xff] }
 0x342   :  { %v2941_v32 = vmul.f32 %v2728_v48, %v2493_v29  ;;  %2403 = vmatmul.f32.gmra.mxu3 %v1166_v40  ;;  %v1736_v40 = vadd.f32 %v5040_v45, %v5768_v17  ;;  %v1220_v45 = vld [vmem:[%s5656_s3 + $0x728] sm:$0xff] }
 0x344   :  { %v3004_v7 = vadd.f32 %v3003_v25, %v2941_v32  ;;  %v5355_v15 = vpop.f32.mrf.mxu1  ;;  %v5357_v50 = vpop.f32.mrf.mxu2  ;;  %v1945_v29 = vadd.f32 %v5137_v8, %v1736_v40  ;;  %v1772_v32 = vadd.f32 %v5329_v12, %v5769_v19  ;;  %v1239_v8 = vld [vmem:[%s5656_s3 + $0x7c0] sm:$0xff] }
 0x345   :  { %v2356_v35 = vpop.f32.mrf.mxu3  ;;  %v2748_v40 = vpop.permute.xlu0 %2747 }
 0x346   :  { %v2357_v16 = vadd.f32 %v2356_v35, %v2148_v58  ;;  %v2154_v58 = vadd.f32 %v5291_v43, %v1945_v29  ;;  %v1197_v43 = vld [vmem:[%s5656_s3 + $0x670] sm:$0xff] }
 0x347   :  { %2021 = vmatmul.f32.gmra.mxu1 %v1212_v53  ;;  %v1780_v12 = vpop.f32.mrf.mxu0 }
 0x348   :  { %v2494_v5 = vmax.f32 %v2357_v16, 0.0 }
 0x349   :  { %1827 = vmatmul.f32.gmra.mxu0 %v1231_v9  ;;  %2212 = vmatmul.f32.gmra.mxu2 %v1189_v33 }
 0x34a   :  { %v2942_v30 = vmul.f32 %v2733_v51, %v2494_v5  ;;  %2406 = vmatmul.f32.gmra.mxu3 %v1170_v21  ;;  %v1178_v21 = vld [vmem:[%s5656_s3 + $0x5d8] sm:$0xff]  ;;  %v2743_v51 = vpop.permute.xlu2 %2742 }
 0x34c   :  { %v3005_v49 = vadd.f32 %v3004_v7, %v2942_v30  ;;  %v1977_v6 = vpop.f32.mrf.mxu1  ;;  %v5377_v25 = vpop.f32.mrf.mxu2 }
 0x34d   :  { %v5382_v36 = vadd.f32 %v1977_v6, %v1769_v42  ;;  %v2359_v61 = vpop.f32.mrf.mxu3  ;;  %v1775_v42 = vadd.f32 %v5352_v27, %v5771_v38  ;;  %v1182_v27 = vld [vmem:[%s5656_s3 + $0x5f8] sm:$0xff] }
 0x34e   :  { %v2360_v34 = vadd.f32 %v2359_v61, %v2151_v37  ;;  %v2157_v37 = vadd.f32 %v5313_v63, %v1948_v46  ;;  %v1201_v63 = vld [vmem:[%s5656_s3 + $0x690] sm:$0xff] }
 0x34f   :  { %2024 = vmatmul.f32.gmra.mxu1 %v1216_v26 }
 0x350   :  { %v2495_v56 = vmax.f32 %v2360_v34, 0.0 }
 0x351   :  { %1830 = vmatmul.f32.gmra.mxu0 %v1235_v22  ;;  %2215 = vmatmul.f32.gmra.mxu2 %v1193_v52  ;;  %v5772_v52 = vld [vmem:[#allocation8_spill] sm:$0xff] }
 0x352   :  { %v2943_v48 = vmul.f32 %v2738_v59, %v2495_v56  ;;  %2409 = vmatmul.f32.gmra.mxu3 %v1174_v18  ;;  %v1742_v18 = vadd.f32 %v5084_v28, %v5772_v52  ;;  %v1783_v56 = vpop.f32.mrf.mxu0  ;;  %v1228_v28 = vld [vmem:[%s5656_s3 + $0x768] sm:$0xff]  ;;  %v5777_v52 = vld [vmem:[#allocation29_spill] sm:$0xff] }
 0x354   :  { %v3006_v7 = vadd.f32 %v3005_v49, %v2943_v48  ;;  %v1980_v53 = vpop.f32.mrf.mxu1  ;;  %v5399_v35 = vpop.f32.mrf.mxu2  ;;  %v1951_v59 = vadd.f32 %v5181_v57, %v1742_v18  ;;  %v5773_v48 = vld [vmem:[#allocation26_spill] sm:$0xff]  ;;  %v1205_v57 = vld [vmem:[%s5656_s3 + $0x6b0] sm:$0xff]  ;;  %v1784_v18 = vadd.f32 %v1783_v56, %v5777_v52  ;;  %v5778_v56 = vld [vmem:[#allocation23_spill] sm:$0xff] }
 0x355   :  { %v5404_v16 = vadd.f32 %v1980_v53, %v1772_v32  ;;  %v2362_v9 = vpop.f32.mrf.mxu3  ;;  %v1778_v19 = vadd.f32 %v1777_v44, %v5773_v48  ;;  %v5774_v44 = vld [vmem:[#allocation4_spill] sm:$0xff] }
 0x356   :  { %v2363_v33 = vadd.f32 %v2362_v9, %v2154_v58  ;;  %v2160_v32 = vadd.f32 %v5335_v14, %v1951_v59  ;;  %v1186_v14 = vld [vmem:[%s5656_s3 + $0x618] sm:$0xff]  ;;  %v1236_v48 = vld [vmem:[%s5656_s3 + $0x7a8] sm:$0xff] }
 0x357   :  { %2027 = vmatmul.f32.gmra.mxu1 %v1220_v45 }
 0x358   :  { %v2496_v5 = vmax.f32 %v2363_v33, 0.0 }
 0x359   :  { %1833 = vmatmul.f32.gmra.mxu0 %v1239_v8  ;;  %2218 = vmatmul.f32.gmra.mxu2 %v1197_v43  ;;  %v1745_v8 = vadd.f32 %v5106_v4, %v5774_v44  ;;  %v1232_v4 = vld [vmem:[%s5656_s3 + $0x788] sm:$0xff] }
 0x35a   :  { %v2944_v30 = vmul.f32 %v2743_v51, %v2496_v5  ;;  %2412 = vmatmul.f32.gmra.mxu3 %v1178_v21  ;;  %v2753_v21 = vpop.permute.xlu1 %2752  ;;  %v5775_v5 = vld [vmem:[#allocation18_spill] sm:$0xff]  ;;  %v1786_v46 = vpop.f32.mrf.mxu0 }
 0x35b   :  { %v1954_v2 = vadd.f32 %v5203_v55, %v1745_v8  ;;  %v1781_v51 = vadd.f32 %v1780_v12, %v5775_v5  ;;  %v1209_v55 = vld [vmem:[%s5656_s3 + $0x6d0] sm:$0xff]  ;;  %v5776_v12 = vld [vmem:[#allocation14_spill] sm:$0xff] }
 0x35c   :  { %v3007_v49 = vadd.f32 %v3006_v7, %v2944_v30  ;;  %v1983_v6 = vpop.f32.mrf.mxu1  ;;  %v5421_v26 = vpop.f32.mrf.mxu2 }
 0x35d   :  { %v5426_v61 = vadd.f32 %v1983_v6, %v1775_v42  ;;  %v2365_v34 = vpop.f32.mrf.mxu3  ;;  %v2163_v30 = vadd.f32 %v5357_v50, %v1954_v2  ;;  %v1190_v50 = vld [vmem:[%s5656_s3 + $0x638] sm:$0xff] }
 0x35e   :  { %v2366_v22 = vadd.f32 %v2365_v34, %v2157_v37  ;;  %v1748_v34 = vadd.f32 %v5128_v31, %v5776_v12 }
 0x35f   :  { %2030 = vmatmul.f32.gmra.mxu1 %v1224_v1 }
 0x360   :  { %v2497_v17 = vmax.f32 %v2366_v22, 0.0 }
 0x361   :  { %1836 = vmatmul.f32.gmra.mxu0 %v1243_v3  ;;  %2221 = vmatmul.f32.gmra.mxu2 %v1201_v63  ;;  %v2758_v3 = vpop.permute.xlu2 %2757  ;;  %v1957_v63 = vadd.f32 %v5225_v24, %v1748_v34  ;;  %v1213_v24 = vld [vmem:[%s5656_s3 + $0x6f0] sm:$0xff] }
 0x362   :  { %v2945_v29 = vmul.f32 %v2748_v40, %v2497_v17  ;;  %2415 = vmatmul.f32.gmra.mxu3 %v1182_v27  ;;  %v1789_v31 = vpop.f32.mrf.mxu0 }
 0x363   :  { %v2166_v17 = vadd.f32 %v5377_v25, %v1957_v63  ;;  %v1194_v25 = vld [vmem:[%s5656_s3 + $0x658] sm:$0xff]  ;;  %v1244_v63 = vld [vmem:[%s5656_s3 + $0x7e8] sm:$0xff] }
 0x364   :  { %v3008_v58 = vadd.f32 %v3007_v49, %v2945_v29  ;;  %v1986_v7 = vpop.f32.mrf.mxu1  ;;  %v5442_v53 = vpop.f32.mrf.mxu2 }
 0x365   :  { %v5447_v45 = vadd.f32 %v1986_v7, %v1778_v19  ;;  %v2368_v9 = vpop.f32.mrf.mxu3  ;;  %v1751_v7 = vadd.f32 %v5150_v62, %v5778_v56 }
 0x366   :  { %v2369_v33 = vadd.f32 %v2368_v9, %v2160_v32  ;;  %v2763_v9 = vpop.permute.xlu0 %2762 }
 0x367   :  { %2033 = vmatmul.f32.gmra.mxu1 %v1228_v28 }
 0x368   :  { %v2498_v43 = vmax.f32 %v2369_v33, 0.0  ;;  %v1960_v33 = vadd.f32 %v5247_v10, %v1751_v7  ;;  %v1217_v10 = vld [vmem:[%s5656_s3 + $0x710] sm:$0xff] }
 0x369   :  { %2224 = vmatmul.f32.gmra.mxu2 %v1205_v57 }
 0x36a   :  { %v2946_v23 = vmul.f32 %v2753_v21, %v2498_v43  ;;  %2418 = vmatmul.f32.gmra.mxu3 %v1186_v14  ;;  %v5779_v14 = vld [vmem:[#allocation24_spill] sm:$0xff]  ;;  %v2169_v8 = vadd.f32 %v5399_v35, %v1960_v33  ;;  %v1198_v35 = vld [vmem:[%s5656_s3 + $0x678] sm:$0xff] }
 0x36b   :  { %v1787_v44 = vadd.f32 %v1786_v46, %v5779_v14  ;;  %v5780_v46 = vld [vmem:[#allocation3_spill] sm:$0xff]  ;;  %v1206_v14 = vld [vmem:[%s5656_s3 + $0x6b8] sm:$0xff] }
 0x36c   :  { %v3009_v38 = vadd.f32 %v3008_v58, %v2946_v23  ;;  %v1989_v42 = vpop.f32.mrf.mxu1  ;;  %v5460_v37 = vpop.f32.mrf.mxu2  ;;  %v1240_v23 = vld [vmem:[%s5656_s3 + $0x7c8] sm:$0xff] }
 0x36d   :  { %v5465_v49 = vadd.f32 %v1989_v42, %v1781_v51  ;;  %v2371_v6 = vpop.f32.mrf.mxu3 }
 0x36e   :  { %v2372_v1 = vadd.f32 %v2371_v6, %v2163_v30  ;;  %v1792_v30 = vpop.f32.mrf.mxu0 }
 0x36f   :  { %2036 = vmatmul.f32.gmra.mxu1 %v1232_v4  ;;  %v2768_v4 = vpop.permute.xlu1 %2767 }
 0x370   :  { %v2499_v22 = vmax.f32 %v2372_v1, 0.0 }
 0x371   :  { %2227 = vmatmul.f32.gmra.mxu2 %v1209_v55  ;;  %v5781_v55 = vld [vmem:[#allocation15_spill] sm:$0xff] }
 0x372   :  { %v2947_v27 = vmul.f32 %v2758_v3, %v2499_v22  ;;  %2421 = vmatmul.f32.gmra.mxu3 %v1190_v50  ;;  %v1790_v50 = vadd.f32 %v1789_v31, %v5781_v55 }
 0x374   :  { %v3010_v40 = vadd.f32 %v3009_v38, %v2947_v27  ;;  %v1992_v59 = vpop.f32.mrf.mxu1  ;;  %v5478_v29 = vpop.f32.mrf.mxu2  ;;  %v1754_v38 = vadd.f32 %v5172_v20, %v5780_v46 }
 0x375   :  { %v5483_v19 = vadd.f32 %v1992_v59, %v1784_v18  ;;  %v2374_v32 = vpop.f32.mrf.mxu3  ;;  %v1221_v18 = vld [vmem:[%s5656_s3 + $0x730] sm:$0xff] }
 0x376   :  { %v2375_v58 = vadd.f32 %v2374_v32, %v2166_v17  ;;  %v1963_v6 = vadd.f32 %v5267_v41, %v1754_v38  ;;  %v5782_v17 = vld [vmem:[#allocation11_spill] sm:$0xff]  ;;  %v1795_v31 = vpop.f32.mrf.mxu0 }
 0x377   :  { %2039 = vmatmul.f32.gmra.mxu1 %v1236_v48  ;;  %v2773_v48 = vpop.permute.xlu2 %2772 }
 0x378   :  { %v2500_v28 = vmax.f32 %v2375_v58, 0.0  ;;  %v2172_v12 = vadd.f32 %v5421_v26, %v1963_v6  ;;  %v1202_v26 = vld [vmem:[%s5656_s3 + $0x698] sm:$0xff]  ;;  %v5783_v58 = vld [vmem:[#allocation27_spill] sm:$0xff] }
 0x379   :  { %2230 = vmatmul.f32.gmra.mxu2 %v1213_v24  ;;  %v1793_v24 = vadd.f32 %v1792_v30, %v5783_v58  ;;  %v1210_v6 = vld [vmem:[%s5656_s3 + $0x6d8] sm:$0xff]  ;;  %v5789_v58 = vld [vmem:[#allocation25_spill] sm:$0xff] }
 0x37a   :  { %v2948_v57 = vmul.f32 %v2763_v9, %v2500_v28  ;;  %2424 = vmatmul.f32.gmra.mxu3 %v1194_v25 }
 0x37c   :  { %v3011_v43 = vadd.f32 %v3010_v40, %v2948_v57  ;;  %v1995_v21 = vpop.f32.mrf.mxu1  ;;  %v5496_v2 = vpop.f32.mrf.mxu2  ;;  %v1757_v40 = vadd.f32 %v5194_v47, %v5782_v17 }
 0x37d   :  { %v5501_v62 = vadd.f32 %v1995_v21, %v1787_v44  ;;  %v2377_v5 = vpop.f32.mrf.mxu3  ;;  %v5784_v44 = vld [vmem:[#allocation30_spill] sm:$0xff] }
 0x37e   :  { %v2378_v51 = vadd.f32 %v2377_v5, %v2169_v8 }
 0x37f   :  { %2042 = vmatmul.f32.gmra.mxu1 %v1240_v23  ;;  %v5785_v23 = vld [vmem:[#allocation21_spill] sm:$0xff] }
 0x380   :  { %v2501_v42 = vmax.f32 %v2378_v51, 0.0  ;;  %v1796_v5 = vadd.f32 %v1795_v31, %v5785_v23  ;;  %v1798_v51 = vpop.f32.mrf.mxu0 }
 0x381   :  { %2233 = vmatmul.f32.gmra.mxu2 %v1217_v10 }
 0x382   :  { %v2949_v1 = vmul.f32 %v2768_v4, %v2501_v42  ;;  %2427 = vmatmul.f32.gmra.mxu3 %v1198_v35 }
 0x384   :  { %v3012_v34 = vadd.f32 %v3011_v43, %v2949_v1  ;;  %v1998_v22 = vpop.f32.mrf.mxu1  ;;  %v2186_v3 = vpop.f32.mrf.mxu2  ;;  %v5786_v1 = vld [vmem:[#allocation32_spill] sm:$0xff] }
 0x385   :  { %v5517_v27 = vadd.f32 %v1998_v22, %v1790_v50  ;;  %v5520_v20 = vadd.f32 %v2186_v3, %v5382_v36  ;;  %v2380_v52 = vpop.f32.mrf.mxu3  ;;  %v1966_v36 = vadd.f32 %v5289_v11, %v1757_v40  ;;  %v1225_v11 = vld [vmem:[%s5656_s3 + $0x750] sm:$0xff]  ;;  %v2778_v43 = vpop.permute.xlu0 %2777 }
 0x386   :  { %v2381_v41 = vadd.f32 %v2380_v52, %v2172_v12  ;;  %v2783_v50 = vpop.permute.xlu1 %2782 }
 0x387   :  { %2045 = vmatmul.f32.gmra.mxu1 %v1244_v63  ;;  %v2175_v25 = vadd.f32 %v5442_v53, %v1966_v36  ;;  %v1760_v53 = vadd.f32 %v5221_v0, %v5784_v44  ;;  %v2788_v36 = vpop.permute.xlu2 %2787 }
 0x388   :  { %v2502_v59 = vmax.f32 %v2381_v41, 0.0  ;;  %v1801_v17 = vpop.f32.mrf.mxu0 }
 0x389   :  { %2236 = vmatmul.f32.gmra.mxu2 %v1221_v18  ;;  %v1969_v21 = vadd.f32 %v5311_v54, %v1760_v53  ;;  %v1229_v54 = vld [vmem:[%s5656_s3 + $0x770] sm:$0xff] }
 0x38a   :  { %v2950_v32 = vmul.f32 %v2773_v48, %v2502_v59  ;;  %2430 = vmatmul.f32.gmra.mxu3 %v1202_v26  ;;  %v1214_v59 = vld [vmem:[%s5656_s3 + $0x6f8] sm:$0xff] }
 0x38b   :  { %v2178_v10 = vadd.f32 %v5460_v37, %v1969_v21  ;;  %v1763_v37 = vadd.f32 %v5244_v13, %v5786_v1 }
 0x38c   :  { %v3013_v56 = vadd.f32 %v3012_v34, %v2950_v32  ;;  %v2001_v7 = vpop.f32.mrf.mxu1  ;;  %v2189_v28 = vpop.f32.mrf.mxu2  ;;  %v5787_v34 = vld [vmem:[#allocation12_spill] sm:$0xff] }
 0x38d   :  { %v5533_v9 = vadd.f32 %v2001_v7, %v1793_v24  ;;  %v5536_v33 = vadd.f32 %v2189_v28, %v5404_v16  ;;  %v2383_v47 = vpop.f32.mrf.mxu3  ;;  %v1972_v12 = vadd.f32 %v5333_v39, %v1763_v37  ;;  %v1799_v22 = vadd.f32 %v1798_v51, %v5787_v34  ;;  %v1233_v39 = vld [vmem:[%s5656_s3 + $0x790] sm:$0xff] }
 0x38e   :  { %v2384_v57 = vadd.f32 %v2383_v47, %v2175_v25  ;;  %v1802_v24 = vadd.f32 %v1801_v17, %v5789_v58 }
 0x38f   :  { %v2181_v3 = vadd.f32 %v5478_v29, %v1972_v12  ;;  %v5788_v29 = vld [vmem:[#allocation9_spill] sm:$0xff] }
 0x390   :  { %v2503_v8 = vmax.f32 %v2384_v57, 0.0  ;;  %v1766_v48 = vadd.f32 %v5274_v60, %v5788_v29  ;;  %v1804_v44 = vpop.f32.mrf.mxu0 }
 0x391   :  { %2239 = vmatmul.f32.gmra.mxu2 %v1225_v11 }
 0x392   :  { %v2951_v16 = vmul.f32 %v2778_v43, %v2503_v8  ;;  %2433 = vmatmul.f32.gmra.mxu3 %v1206_v14  ;;  %v1237_v14 = vld [vmem:[%s5656_s3 + $0x7b0] sm:$0xff] }
 0x393   :  { %v5790_v43 = vld [vmem:[#allocation33_spill] sm:$0xff] }
 0x394   :  { %v3014_v30 = vadd.f32 %v3013_v56, %v2951_v16  ;;  %v2004_v35 = vpop.f32.mrf.mxu1  ;;  %v2192_v46 = vpop.f32.mrf.mxu2  ;;  %v1805_v21 = vadd.f32 %v1804_v44, %v5790_v43 }
 0x395   :  { %v5549_v38 = vadd.f32 %v2004_v35, %v1796_v5  ;;  %v5552_v42 = vadd.f32 %v2192_v46, %v5426_v61  ;;  %v2386_v0 = vpop.f32.mrf.mxu3  ;;  %v1241_v35 = vld [vmem:[%s5656_s3 + $0x7d0] sm:$0xff]  ;;  %v1222_v46 = vld [vmem:[%s5656_s3 + $0x738] sm:$0xff] }
 0x396   :  { %v2387_v4 = vadd.f32 %v2386_v0, %v2178_v10 }
 0x398   :  { %v2504_v55 = vmax.f32 %v2387_v4, 0.0  ;;  %v2798_v4 = vpop.permute.xlu1 %2797 }
 0x399   :  { %2242 = vmatmul.f32.gmra.mxu2 %v1229_v54 }
 0x39a   :  { %v2952_v61 = vmul.f32 %v2783_v50, %v2504_v55  ;;  %2436 = vmatmul.f32.gmra.mxu3 %v1210_v6  ;;  %v1245_v55 = vld [vmem:[%s5656_s3 + $0x7f0] sm:$0xff]  ;;  %v1226_v50 = vld [vmem:[%s5656_s3 + $0x758] sm:$0xff] }
 0x39c   :  { %v3015_v63 = vadd.f32 %v3014_v30, %v2952_v61  ;;  %v2007_v52 = vpop.f32.mrf.mxu1  ;;  %v2195_v41 = vpop.f32.mrf.mxu2 }
 0x39d   :  { %v5565_v18 = vadd.f32 %v2007_v52, %v1799_v22  ;;  %v5568_v26 = vadd.f32 %v2195_v41, %v5447_v45  ;;  %v2389_v13 = vpop.f32.mrf.mxu3  ;;  %v1975_v45 = vadd.f32 %v5355_v15, %v1766_v48  ;;  %v1218_v15 = vld [vmem:[%s5656_s3 + $0x718] sm:$0xff]  ;;  %v2803_v61 = vpop.permute.xlu2 %2802 }
 0x39e   :  { %v2390_v40 = vadd.f32 %v2389_v13, %v2181_v3  ;;  %v1230_v52 = vld [vmem:[%s5656_s3 + $0x778] sm:$0xff] }
 0x39f   :  { %v2184_v25 = vadd.f32 %v5496_v2, %v1975_v45  ;;  %v2793_v2 = vpop.permute.xlu0 %2792 }
 0x3a0   :  { %v2505_v31 = vmax.f32 %v2390_v40, 0.0 }
 0x3a1   :  { %2245 = vmatmul.f32.gmra.mxu2 %v1233_v39 }
 0x3a2   :  { %v2953_v32 = vmul.f32 %v2788_v36, %v2505_v31  ;;  %2439 = vmatmul.f32.gmra.mxu3 %v1214_v59  ;;  %v2813_v31 = vpop.permute.xlu1 %2812 }
 0x3a4   :  { %v3016_v56 = vadd.f32 %v3015_v63, %v2953_v32  ;;  %v2010_v7 = vpop.f32.mrf.mxu1  ;;  %v2198_v28 = vpop.f32.mrf.mxu2 }
 0x3a5   :  { %v5581_v47 = vadd.f32 %v2010_v7, %v1802_v24  ;;  %v2199_v57 = vadd.f32 %v2198_v28, %v5465_v49  ;;  %v2392_v11 = vpop.f32.mrf.mxu3 }
 0x3a6   :  { %v2393_v60 = vadd.f32 %v2392_v11, %v2184_v25 }
 0x3a7   :  { %v2808_v13 = vpop.permute.xlu0 %2807 }
 0x3a8   :  { %v2506_v53 = vmax.f32 %v2393_v60, 0.0 }
 0x3a9   :  { %2248 = vmatmul.f32.gmra.mxu2 %v1237_v14 }
 0x3aa   :  { %v2954_v8 = vmul.f32 %v2793_v2, %v2506_v53  ;;  %2442 = vmatmul.f32.gmra.mxu3 %v1218_v15 }
 0x3ac   :  { %v3017_v16 = vadd.f32 %v3016_v56, %v2954_v8  ;;  %v2013_v49 = vpop.f32.mrf.mxu1  ;;  %v2201_v23 = vpop.f32.mrf.mxu2 }
 0x3ad   :  { %v5591_v5 = vadd.f32 %v2013_v49, %v1805_v21  ;;  %v2202_v51 = vadd.f32 %v2201_v23, %v5483_v19  ;;  %v2395_v10 = vpop.f32.mrf.mxu3  ;;  %v2828_v23 = vpop.permute.xlu1 %2827 }
 0x3ae   :  { %v2396_v30 = vadd.f32 %v2395_v10, %v5520_v20 }
 0x3b0   :  { %v2507_v0 = vmax.f32 %v2396_v30, 0.0 }
 0x3b1   :  { %2251 = vmatmul.f32.gmra.mxu2 %v1241_v35 }
 0x3b2   :  { %v2955_v54 = vmul.f32 %v2798_v4, %v2507_v0  ;;  %2445 = vmatmul.f32.gmra.mxu3 %v1222_v46 }
 0x3b4   :  { %v3018_v6 = vadd.f32 %v3017_v16, %v2955_v54  ;;  %v2204_v1 = vpop.f32.mrf.mxu2 }
 0x3b5   :  { %v2205_v19 = vadd.f32 %v2204_v1, %v5501_v62  ;;  %v2398_v37 = vpop.f32.mrf.mxu3 }
 0x3b6   :  { %v2399_v20 = vadd.f32 %v2398_v37, %v5536_v33 }
 0x3b8   :  { %v2508_v12 = vmax.f32 %v2399_v20, 0.0 }
 0x3b9   :  { %2254 = vmatmul.f32.gmra.mxu2 %v1245_v55 }
 0x3ba   :  { %v2956_v34 = vmul.f32 %v2803_v61, %v2508_v12  ;;  %2448 = vmatmul.f32.gmra.mxu3 %v1226_v50 }
 0x3bc   :  { %v3019_v22 = vadd.f32 %v3018_v6, %v2956_v34  ;;  %v2207_v3 = vpop.f32.mrf.mxu2 }
 0x3bd   :  { %v2208_v62 = vadd.f32 %v2207_v3, %v5517_v27  ;;  %v2401_v63 = vpop.f32.mrf.mxu3  ;;  %v1234_v27 = vld [vmem:[%s5656_s3 + $0x798] sm:$0xff]  ;;  %v1807_v3 = vpop.f32.mrf.mxu0 }
 0x3be   :  { %v2402_v33 = vadd.f32 %v2401_v63, %v5552_v42 }
 0x3c0   :  { %v2509_v41 = vmax.f32 %v2402_v33, 0.0  ;;  %v2016_v33 = vpop.f32.mrf.mxu1 }
 0x3c2   :  { %v2957_v17 = vmul.f32 %v2808_v13, %v2509_v41  ;;  %2451 = vmatmul.f32.gmra.mxu3 %v1230_v52 }
 0x3c4   :  { %v3020_v40 = vadd.f32 %v3019_v22, %v2957_v17  ;;  %v2210_v39 = vpop.f32.mrf.mxu2  ;;  %v2843_v22 = vpop.permute.xlu1 %2842 }
 0x3c5   :  { %v2211_v59 = vadd.f32 %v2210_v39, %v5533_v9  ;;  %v2404_v29 = vpop.f32.mrf.mxu3  ;;  %v1238_v9 = vld [vmem:[%s5656_s3 + $0x7b8] sm:$0xff]  ;;  %v1810_v39 = vpop.f32.mrf.mxu0 }
 0x3c6   :  { %v2405_v48 = vadd.f32 %v2404_v29, %v5568_v26  ;;  %v2818_v26 = vpop.permute.xlu2 %2817 }
 0x3c8   :  { %v2510_v42 = vmax.f32 %v2405_v48, 0.0  ;;  %v2019_v29 = vpop.f32.mrf.mxu1 }
 0x3ca   :  { %v2958_v36 = vmul.f32 %v2813_v31, %v2510_v42  ;;  %2454 = vmatmul.f32.gmra.mxu3 %v1234_v27 }
 0x3cc   :  { %v3021_v45 = vadd.f32 %v3020_v40, %v2958_v36  ;;  %v2213_v32 = vpop.f32.mrf.mxu2 }
 0x3cd   :  { %v2214_v58 = vadd.f32 %v2213_v32, %v5549_v38  ;;  %v2407_v24 = vpop.f32.mrf.mxu3  ;;  %v1242_v38 = vld [vmem:[%s5656_s3 + $0x7d8] sm:$0xff] }
 0x3ce   :  { %v2408_v25 = vadd.f32 %v2407_v24, %v2199_v57  ;;  %v2823_v57 = vpop.permute.xlu0 %2822  ;;  %v2833_v54 = vpop.permute.xlu2 %2832 }
 0x3d0   :  { %v2511_v56 = vmax.f32 %v2408_v25, 0.0 }
 0x3d2   :  { %v2959_v7 = vmul.f32 %v2818_v26, %v2511_v56  ;;  %2457 = vmatmul.f32.gmra.mxu3 %v1238_v9  ;;  %v2022_v9 = vpop.f32.mrf.mxu1  ;;  %v2858_v26 = vpop.permute.xlu1 %2857 }
 0x3d4   :  { %v3022_v28 = vadd.f32 %v3021_v45, %v2959_v7  ;;  %v2216_v11 = vpop.f32.mrf.mxu2 }
 0x3d5   :  { %v2217_v60 = vadd.f32 %v2216_v11, %v5565_v18  ;;  %v2410_v14 = vpop.f32.mrf.mxu3  ;;  %v1246_v18 = vld [vmem:[%s5656_s3 + $0x7f8] sm:$0xff] }
 0x3d6   :  { %v2411_v15 = vadd.f32 %v2410_v14, %v2202_v51  ;;  %v2838_v20 = vpop.permute.xlu0 %2837  ;;  %v2848_v17 = vpop.permute.xlu2 %2847 }
 0x3d8   :  { %v2512_v44 = vmax.f32 %v2411_v15, 0.0 }
 0x3da   :  { %v2960_v53 = vmul.f32 %v2823_v57, %v2512_v44  ;;  %2460 = vmatmul.f32.gmra.mxu3 %v1242_v38  ;;  %v2025_v15 = vpop.f32.mrf.mxu1 }
 0x3dc   :  { %v3023_v2 = vadd.f32 %v3022_v28, %v2960_v53  ;;  %v2219_v8 = vpop.f32.mrf.mxu2 }
 0x3dd   :  { %v2220_v43 = vadd.f32 %v2219_v8, %v5581_v47  ;;  %v2413_v21 = vpop.f32.mrf.mxu3 }
 0x3de   :  { %v2414_v16 = vadd.f32 %v2413_v21, %v2205_v19  ;;  %v2853_v36 = vpop.permute.xlu0 %2852 }
 0x3e0   :  { %v2513_v49 = vmax.f32 %v2414_v16, 0.0 }
 0x3e2   :  { %v2961_v51 = vmul.f32 %v2828_v23, %v2513_v49  ;;  %2463 = vmatmul.f32.gmra.mxu3 %v1246_v18  ;;  %v2028_v53 = vpop.f32.mrf.mxu1 }
 0x3e4   :  { %v3024_v10 = vadd.f32 %v3023_v2, %v2961_v51  ;;  %v2222_v30 = vpop.f32.mrf.mxu2 }
 0x3e5   :  { %v2223_v35 = vadd.f32 %v2222_v30, %v5591_v5  ;;  %v2416_v46 = vpop.f32.mrf.mxu3 }
 0x3e6   :  { %v2417_v0 = vadd.f32 %v2416_v46, %v2208_v62 }
 0x3e8   :  { %v2514_v4 = vmax.f32 %v2417_v0, 0.0 }
 0x3ea   :  { %v2962_v6 = vmul.f32 %v2833_v54, %v2514_v4  ;;  %v2031_v21 = vpop.f32.mrf.mxu1  ;;  %v5791_v4 = vld [vmem:[#allocation22_spill] sm:$0xff] }
 0x3eb   :  { %v1808_v54 = vadd.f32 %v1807_v3, %v5791_v4 }
 0x3ec   :  { %v3025_v47 = vadd.f32 %v3024_v10, %v2962_v6  ;;  %v2225_v52 = vpop.f32.mrf.mxu2 }
 0x3ed   :  { %v2419_v1 = vpop.f32.mrf.mxu3 }
 0x3ee   :  { %v2420_v19 = vadd.f32 %v2419_v1, %v2211_v59  ;;  %v5792_v1 = vld [vmem:[#allocation34_spill] sm:$0xff] }
 0x3f0   :  { %v2515_v37 = vmax.f32 %v2420_v19, 0.0  ;;  %v1811_v19 = vadd.f32 %v1810_v39, %v5792_v1 }
 0x3f2   :  { %v2963_v55 = vmul.f32 %v2838_v20, %v2515_v37  ;;  %v2034_v51 = vpop.f32.mrf.mxu1  ;;  %v2017_v37 = vadd.f32 %v2016_v33, %v1808_v54  ;;  %v5793_v20 = vld [vmem:[#allocation36_spill] sm:$0xff]  ;;  %v2873_v33 = vpop.permute.xlu1 %2872  ;;  %v5799_v54 = vld [vmem:[#allocation41_spill] sm:$0xff] }
 0x3f4   :  { %v3026_v50 = vadd.f32 %v3025_v47, %v2963_v55  ;;  %v2228_v42 = vpop.f32.mrf.mxu2  ;;  %v2863_v47 = vpop.permute.xlu2 %2862 }
 0x3f5   :  { %v2422_v12 = vpop.f32.mrf.mxu3 }
 0x3f6   :  { %v2423_v61 = vadd.f32 %v2422_v12, %v2214_v58  ;;  %v1813_v58 = vpop.f32.mrf.mxu0 }
 0x3f7   :  { %v1814_v55 = vadd.f32 %v1813_v58, %v5793_v20 }
 0x3f8   :  { %v2516_v34 = vmax.f32 %v2423_v61, 0.0  ;;  %v2226_v61 = vadd.f32 %v2225_v52, %v2017_v37 }
 0x3fa   :  { %v2964_v63 = vmul.f32 %v2843_v22, %v2516_v34  ;;  %v2037_v46 = vpop.f32.mrf.mxu1  ;;  %v2868_v34 = vpop.permute.xlu0 %2867  ;;  %v2023_v22 = vadd.f32 %v2022_v9, %v1814_v55 }
 0x3fc   :  { %v3027_v5 = vadd.f32 %v3026_v50, %v2964_v63  ;;  %v2231_v7 = vpop.f32.mrf.mxu2  ;;  %v2020_v50 = vadd.f32 %v2019_v29, %v1811_v19  ;;  %v5796_v29 = vld [vmem:[#allocation39_spill] sm:$0xff]  ;;  %v2878_v58 = vpop.permute.xlu2 %2877 }
 0x3fd   :  { %v2425_v62 = vpop.f32.mrf.mxu3 }
 0x3fe   :  { %v2426_v41 = vadd.f32 %v2425_v62, %v2217_v60  ;;  %v1816_v14 = vpop.f32.mrf.mxu0 }
 0x400   :  { %v2517_v13 = vmax.f32 %v2426_v41, 0.0  ;;  %v5794_v41 = vld [vmem:[#allocation35_spill] sm:$0xff] }
 0x402   :  { %v2965_v40 = vmul.f32 %v2848_v17, %v2517_v13  ;;  %v2040_v63 = vpop.f32.mrf.mxu1  ;;  %v1817_v13 = vadd.f32 %v1816_v14, %v5794_v41  ;;  %v2232_v17 = vadd.f32 %v2231_v7, %v2023_v22  ;;  %v2883_v14 = vpop.permute.xlu0 %2882 }
 0x404   :  { %v3028_v59 = vadd.f32 %v3027_v5, %v2965_v40  ;;  %v2234_v38 = vpop.f32.mrf.mxu2  ;;  %v2229_v5 = vadd.f32 %v2228_v42, %v2020_v50  ;;  %v2026_v39 = vadd.f32 %v2025_v15, %v1817_v13  ;;  %v5797_v42 = vld [vmem:[#allocation38_spill] sm:$0xff] }
 0x405   :  { %v2428_v48 = vpop.f32.mrf.mxu3 }
 0x406   :  { %v2429_v27 = vadd.f32 %v2428_v48, %v2220_v43  ;;  %v1819_v57 = vpop.f32.mrf.mxu0  ;;  %v5795_v48 = vld [vmem:[#allocation37_spill] sm:$0xff] }
 0x408   :  { %v2518_v31 = vmax.f32 %v2429_v27, 0.0  ;;  %v1820_v27 = vadd.f32 %v1819_v57, %v5795_v48 }
 0x40a   :  { %v2966_v45 = vmul.f32 %v2853_v36, %v2518_v31  ;;  %v2029_v52 = vadd.f32 %v2028_v53, %v1820_v27  ;;  %v2043_v53 = vpop.f32.mrf.mxu1 }
 0x40c   :  { %v3029_v32 = vadd.f32 %v3028_v59, %v2966_v45  ;;  %v2237_v2 = vpop.f32.mrf.mxu2 }
 0x40d   :  { %v2431_v24 = vpop.f32.mrf.mxu3 }
 0x40e   :  { %v2432_v25 = vadd.f32 %v2431_v24, %v2223_v35  ;;  %v1822_v43 = vpop.f32.mrf.mxu0 }
 0x40f   :  { %v1823_v45 = vadd.f32 %v1822_v43, %v5796_v29 }
 0x410   :  { %v2519_v56 = vmax.f32 %v2432_v25, 0.0 }
 0x411   :  { %v2032_v9 = vadd.f32 %v2031_v21, %v1823_v45 }
 0x412   :  { %v2967_v28 = vmul.f32 %v2858_v26, %v2519_v56  ;;  %v2238_v56 = vadd.f32 %v2237_v2, %v2029_v52  ;;  %v5800_v2 = vld [vmem:[#allocation42_spill] sm:$0xff] }
 0x414   :  { %v5632_v11 = vadd.f32 %v3029_v32, %v2967_v28  ;;  %v2240_v18 = vpop.f32.mrf.mxu2  ;;  %v2235_v32 = vadd.f32 %v2234_v38, %v2026_v39  ;;  %v2046_v39 = vpop.f32.mrf.mxu1 }
 0x415   :  { %v2434_v60 = vpop.f32.mrf.mxu3  ;;  %v2241_v4 = vadd.f32 %v2240_v18, %v2032_v9 }
 0x416   :  { %v1825_v49 = vpop.f32.mrf.mxu0  ;;  %v2435_v62 = vadd.f32 %v2434_v60, %v2226_v61 }
 0x417   :  { %v1826_v25 = vadd.f32 %v1825_v49, %v5797_v42 }
 0x418   :  { %v2520_v31 = vmax.f32 %v2435_v62, 0.0 }
 0x419   :  { %v2035_v57 = vadd.f32 %v2034_v51, %v1826_v25 }
 0x41a   :  { %v2968_v28 = vmul.f32 %v2863_v47, %v2520_v31 }
 0x41c   :  { %v2243_v10 = vpop.f32.mrf.mxu2  ;;  %v3031_v47 = vadd.f32 %v5632_v11, %v2968_v28 }
 0x41d   :  { %v2437_v44 = vpop.f32.mrf.mxu3  ;;  %v2244_v37 = vadd.f32 %v2243_v10, %v2035_v57  ;;  %v2893_v10 = vpop.permute.xlu2 %2892 }
 0x41e   :  { %v1828_v35 = vpop.f32.mrf.mxu0  ;;  %v2438_v40 = vadd.f32 %v2437_v44, %v2229_v5  ;;  %v5798_v44 = vld [vmem:[#allocation40_spill] sm:$0xff] }
 0x41f   :  { %v1829_v15 = vadd.f32 %v1828_v35, %v5798_v44 }
 0x420   :  { %v2521_v24 = vmax.f32 %v2438_v40, 0.0 }
 0x421   :  { %v2038_v19 = vadd.f32 %v2037_v46, %v1829_v15 }
 0x422   :  { %v2969_v38 = vmul.f32 %v2868_v34, %v2521_v24 }
 0x424   :  { %v2246_v0 = vpop.f32.mrf.mxu2 }
 0x425   :  { %v2440_v8 = vpop.f32.mrf.mxu3  ;;  %v2247_v35 = vadd.f32 %v2246_v0, %v2038_v19  ;;  %v3049_v19 = vstv %s5658_s6 }
 0x426   :  { %v1831_v12 = vpop.f32.mrf.mxu0  ;;  %v2441_v36 = vadd.f32 %v2440_v8, %v2232_v17 }
 0x427   :  { %v1832_v43 = vadd.f32 %v1831_v12, %v5799_v54  ;;  %v3032_v12 = vadd.f32 %v3031_v47, %v2969_v38 }
 0x428   :  { %v2522_v60 = vmax.f32 %v2441_v36, 0.0 }
 0x429   :  { %v2041_v50 = vadd.f32 %v2040_v63, %v1832_v43 }
 0x42a   :  { %v2970_v20 = vmul.f32 %v2873_v33, %v2522_v60  ;;  %v5801_v33 = vld [vmem:[#allocation43_spill] sm:$0xff] }
 0x42c   :  { %v2249_v3 = vpop.f32.mrf.mxu2  ;;  %v3033_v62 = vadd.f32 %v3032_v12, %v2970_v20 }
 0x42d   :  { %v2443_v16 = vpop.f32.mrf.mxu3  ;;  %v2250_v22 = vadd.f32 %v2249_v3, %v2041_v50 }
 0x42e   :  { %v2444_v26 = vadd.f32 %v2443_v16, %v2235_v32  ;;  %v1834_v7 = vpop.f32.mrf.mxu0 }
 0x42f   :  { %v1835_v16 = vadd.f32 %v1834_v7, %v5800_v2 }
 0x430   :  { %v2523_v49 = vmax.f32 %v2444_v26, 0.0 }
 0x431   :  { %v2044_v61 = vadd.f32 %v2043_v53, %v1835_v16 }
 0x432   :  { %v2971_v34 = vmul.f32 %v2878_v58, %v2523_v49 }
 0x434   :  { %v2252_v55 = vpop.f32.mrf.mxu2  ;;  %v3034_v48 = vadd.f32 %v3033_v62, %v2971_v34 }
 0x435   :  { %v2446_v23 = vpop.f32.mrf.mxu3 }
 0x436   :  { %v2447_v8 = vadd.f32 %v2446_v23, %v2238_v56  ;;  %v2888_v23 = vpop.permute.xlu1 %2887  ;;  %v1837_v11 = vpop.f32.mrf.mxu0 }
 0x437   :  { %v1838_v31 = vadd.f32 %v1837_v11, %v5801_v33  ;;  %v2908_v56 = vpop.permute.xlu2 %2907 }
 0x438   :  { %v2524_v51 = vmax.f32 %v2447_v8, 0.0 }
 0x439   :  { %v2047_v45 = vadd.f32 %v2046_v39, %v1838_v31 }
 0x43a   :  { %v2972_v41 = vmul.f32 %v2883_v14, %v2524_v51 }
 0x43c   :  { %v3035_v3 = vadd.f32 %v3034_v48, %v2972_v41 }
 0x43d   :  { %v2449_v30 = vpop.f32.mrf.mxu3 }
 0x43e   :  { %v2450_v21 = vadd.f32 %v2449_v30, %v2241_v4  ;;  %v2253_v30 = vadd.f32 %v2252_v55, %v2044_v61  ;;  %v2903_v24 = vpop.permute.xlu1 %2902 }
 0x440   :  { %v2525_v5 = vmax.f32 %v2450_v21, 0.0 }
 0x442   :  { %v2973_v63 = vmul.f32 %v2888_v23, %v2525_v5 }
 0x444   :  { %v3036_v52 = vadd.f32 %v3035_v3, %v2973_v63 }
 0x445   :  { %v2452_v6 = vpop.f32.mrf.mxu3 }
 0x446   :  { %v2453_v18 = vadd.f32 %v2452_v6, %v2244_v37  ;;  %v2898_v6 = vpop.permute.xlu0 %2897 }
 0x448   :  { %v2526_v13 = vmax.f32 %v2453_v18, 0.0 }
 0x44a   :  { %v2974_v36 = vmul.f32 %v2893_v10, %v2526_v13 }
 0x44c   :  { %v3037_v25 = vadd.f32 %v3036_v52, %v2974_v36 }
 0x44d   :  { %v2455_v59 = vpop.f32.mrf.mxu3 }
 0x44e   :  { %v2456_v46 = vadd.f32 %v2455_v59, %v2247_v35  ;;  %v2255_v59 = vpop.f32.mrf.mxu2  ;;  %v2913_v15 = vpop.permute.xlu0 %2912 }
 0x44f   :  { %v2256_v42 = vadd.f32 %v2255_v59, %v2047_v45 }
 0x450   :  { %v2527_v0 = vmax.f32 %v2456_v46, 0.0 }
 0x452   :  { %v2975_v32 = vmul.f32 %v2898_v6, %v2527_v0 }
 0x454   :  { %v3038_v7 = vadd.f32 %v3037_v25, %v2975_v32 }
 0x455   :  { %v2458_v1 = vpop.f32.mrf.mxu3 }
 0x456   :  { %v2459_v17 = vadd.f32 %v2458_v1, %v2250_v22 }
 0x458   :  { %v2528_v29 = vmax.f32 %v2459_v17, 0.0 }
 0x45a   :  { %v2976_v9 = vmul.f32 %v2903_v24, %v2528_v29 }
 0x45c   :  { %v3039_v14 = vadd.f32 %v3038_v7, %v2976_v9 }
 0x45d   :  { %v2461_v40 = vpop.f32.mrf.mxu3 }
 0x45e   :  { %v2462_v27 = vadd.f32 %v2461_v40, %v2253_v30 }
 0x460   :  { %v2529_v58 = vmax.f32 %v2462_v27, 0.0 }
 0x462   :  { %v2977_v28 = vmul.f32 %v2908_v56, %v2529_v58 }
 0x464   :  { %v3040_v57 = vadd.f32 %v3039_v14, %v2977_v28 }
 0x465   :  { %v2464_v26 = vpop.f32.mrf.mxu3 }
 0x466   :  { %v2465_v60 = vadd.f32 %v2464_v26, %v2256_v42 }
 0x468   :  { %v2530_v44 = vmax.f32 %v2465_v60, 0.0 }
 0x46a   :  { %v2978_v4 = vmul.f32 %v2913_v15, %v2530_v44 }
 0x46c   :  { %v3041_v8 = vadd.f32 %v3040_v57, %v2978_v4 }
 0x46e   :  { %v3042_v54 = vrot.slane %v3041_v8, 4 }
 0x470   :  { %v3043_v43 = vadd.f32 %v3042_v54, %v3041_v8 }
 0x472   :  { %v3044_v53 = vrot.slane %v3043_v43, 2 }
 0x474   :  { %v3045_v38 = vadd.f32 %v3044_v53, %v3043_v43 }
 0x476   :  { %v3046_v1 = vrot.slane %v3045_v38, 1 }
 0x478   :  { %v3047_v37 = vadd.f32 %v3046_v1, %v3045_v38 }
 0x47a   :  { %v3050_v49 = vadd.f32 %v3049_v19, %v3047_v37 }
 0x47c   :  { %3051 = vst [vmem:[%s5659_s7] sm:$0x1] %v3050_v49 }

</bundles_post_ra>
